<compile_context>
chip_gen: v7x
topology: tpu7x:2x2x1
jax: 0.10.0
libtpu: 0.0.40
codegen_flags: <defaults>
</compile_context>

<pallas_src>
import functools

import jax
import jax.numpy as jnp
from jax.experimental import pallas as pl
from jax.experimental.pallas import tpu as pltpu

_VMEM_LIMIT = 32 * 1024 * 1024  # safe on v5e (128 MiB), v6e (128 MiB), v7x (64 MiB)


# ----------------------------- Pallas kernels ------------------------------

def _conv_mm_kernel(x_ref, w_ref, b_ref, o_ref):
    """o = relu(x @ w + b); x/w are bf16 (conv+BN folded, lane-padded), acc f32."""
    acc = jnp.dot(x_ref[...], w_ref[...], preferred_element_type=jnp.float32)
    o_ref[...] = jnp.maximum(acc + b_ref[...], 0.0)


def _pick_tm(m, cap=512):
    """Largest row tile <= cap (multiple of 8) dividing m; whole m if small."""
    if m <= cap:
        return m
    for tm in range(cap, 0, -8):
        if m % tm == 0:
            return tm
    return m


def conv_matmul(patches, w_mat, b):
    """relu(patches @ w_mat + b) with lane-dense (128-padded) output channels.

    patches: (M, K) bf16 with K a multiple of 128, w_mat: (K, Cout) bf16,
    b: (Cout,) f32.  Returns (M, Np) f32 with Np = round_up(Cout, 128); the
    padded channels are exact zeros (relu(0 + 0)) and are consumed by the
    next layer's zero weight rows.
    """
    M, K = patches.shape
    Cout = w_mat.shape[1]
    Np = max(128, ((Cout + 127) // 128) * 128)
    if Np != Cout:
        w_mat = jnp.pad(w_mat, ((0, 0), (0, Np - Cout)))
        b = jnp.pad(b, (0, Np - Cout))
    tm = _pick_tm(M)
    # TODO(synk): on v7x, use pltpu.CORE_PARALLEL (or pl.core_map over
    # create_tensorcore_mesh) on the M axis with >=2 steps per core; plain
    # "parallel" is kept here for portability across single-TC v5e/v6e.
    # TODO(synk): at real VGG channel counts (K up to 4608, Cout up to 512),
    # add a K grid axis marked "arbitrary" with a VMEM f32 accumulator
    # (tk ~ 512) so tiles fit v5e's 16 MiB scoped VMEM / v7x's 64 MiB; and
    # consider pl.Buffered(3) on the RHS spec on v6e if DMA is exposed.
    out = pl.pallas_call(
        _conv_mm_kernel,
        out_shape=jax.ShapeDtypeStruct((M, Np), jnp.float32),
        grid=(M // tm,),
        in_specs=[
            pl.BlockSpec((tm, K), lambda i: (i, 0)),
            pl.BlockSpec((K, Np), lambda i: (0, 0)),
            pl.BlockSpec((1, Np), lambda i: (0, 0)),
        ],
        out_specs=pl.BlockSpec((tm, Np), lambda i: (i, 0)),
        compiler_params=pltpu.CompilerParams(
            dimension_semantics=("parallel",),
            vmem_limit_bytes=_VMEM_LIMIT),
    )(patches, w_mat, b.astype(jnp.float32).reshape(1, Np))
    return out


def _head_kernel(x_ref, w1_ref, b1_ref, w2_ref, b2_ref, wr_ref, br_ref,
                 probas_ref, codes_ref):
    # classifier_trunc: Linear -> ReLU -> Dropout(eval: identity) -> Linear
    h1 = jnp.dot(x_ref[...], w1_ref[...], preferred_element_type=jnp.float32)
    h1 = jnp.maximum(h1 + b1_ref[...], 0.0)
    logits = jnp.dot(h1, w2_ref[...], preferred_element_type=jnp.float32)
    logits = logits + b2_ref[...]            # padded lanes carry ~-1e9 bias
    # probas = softmax(logits, dim=1); padded lanes -> exp(-1e9) = 0.
    m = jnp.max(logits, axis=-1, keepdims=True)
    e = jnp.exp(logits - m)
    probas_ref[...] = e / jnp.sum(e, axis=-1, keepdims=True)
    # features = relu(logits); latent_codes = relu(regression(features))
    feat = jnp.maximum(logits, 0.0)           # padded lanes relu(-1e9) -> 0
    codes = jnp.dot(feat, wr_ref[...], preferred_element_type=jnp.float32)
    codes_ref[...] = jnp.maximum(codes + br_ref[...], 0.0)


def classifier_head(pooled, w1, b1, w2, b2, wr, br):
    """Fused fc1->ReLU->fc2->softmax/ReLU->regression->ReLU (one pallas_call).

    All hidden / output columns are lane-padded to 128 so every store is a
    full-width vst; padded fc2 bias lanes are a large negative value so the
    in-kernel softmax ignores them.  Real columns are sliced outside (fuses
    under jit).
    """
    M, F = pooled.shape
    H = w2.shape[1]
    E = wr.shape[1]
    Hp = max(128, ((H + 127) // 128) * 128)
    Ep = max(128, ((E + 127) // 128) * 128)
    w1p = jnp.pad(w1, ((0, 0), (0, Hp - H)))
    b1p = jnp.pad(b1, (0, Hp - H))
    w2p = jnp.pad(w2, ((0, Hp - H), (0, Hp - H)))
    b2p = jnp.pad(b2, (0, Hp - H), constant_values=-1e9)
    wrp = jnp.pad(wr, ((0, Hp - H), (0, Ep - E)))
    brp = jnp.pad(br, (0, Ep - E))
    probas_p, codes_p = pl.pallas_call(
        _head_kernel,
        out_shape=(jax.ShapeDtypeStruct((M, Hp), jnp.float32),
                   jax.ShapeDtypeStruct((M, Ep), jnp.float32)),
        grid=(1,),
        in_specs=[
            pl.BlockSpec((M, F), lambda i: (0, 0)),
            pl.BlockSpec((F, Hp), lambda i: (0, 0)),
            pl.BlockSpec((1, Hp), lambda i: (0, 0)),
            pl.BlockSpec((Hp, Hp), lambda i: (0, 0)),
            pl.BlockSpec((1, Hp), lambda i: (0, 0)),
            pl.BlockSpec((Hp, Ep), lambda i: (0, 0)),
            pl.BlockSpec((1, Ep), lambda i: (0, 0)),
        ],
        out_specs=(pl.BlockSpec((M, Hp), lambda i: (0, 0)),
                   pl.BlockSpec((M, Ep), lambda i: (0, 0))),
        compiler_params=pltpu.CompilerParams(vmem_limit_bytes=_VMEM_LIMIT),
    )(pooled, w1p, b1p.reshape(1, Hp), w2p, b2p.reshape(1, Hp),
      wrp, brp.reshape(1, Ep))
    return probas_p[:, :H], codes_p[:, :E]


# --------------------------- pure-JAX reference -----------------------------

def _conv_mm_ref(patches, w_mat, b):
    """Same math as conv_matmul (bf16 inputs, f32 acc, padded channels)."""
    Cout = w_mat.shape[1]
    Np = max(128, ((Cout + 127) // 128) * 128)
    y = jnp.dot(patches, w_mat, preferred_element_type=jnp.float32) + b[None, :]
    y = jnp.maximum(y, 0.0)
    if Np != Cout:
        y = jnp.pad(y, ((0, 0), (0, Np - Cout)))
    return y


def _head_ref(pooled, w1, b1, w2, b2, wr, br):
    h1 = jnp.maximum(jnp.dot(pooled, w1, preferred_element_type=jnp.float32)
                     + b1[None, :], 0.0)
    logits = jnp.dot(h1, w2, preferred_element_type=jnp.float32) + b2[None, :]
    probas = jax.nn.softmax(logits, axis=1)
    feat = jnp.maximum(logits, 0.0)
    codes = jnp.dot(feat, wr, preferred_element_type=jnp.float32) + br[None, :]
    return probas, jnp.maximum(codes, 0.0)


# ------------------------------- glue (JAX) ---------------------------------

def conv3x3_bn_relu(x, conv_w, conv_b, gamma, beta, mean, var, *,
                    matmul_fn, eps=1e-5):
    """3x3 same-padding conv + eval-mode BatchNorm (folded) + ReLU, NHWC.

    Accepts an input whose channel dim is already zero-padded (previous layer
    keeps 128-lane channels); the folded weight is padded with zero rows to
    match, so no slice/repack happens between layers.
    """
    N, H, W, Cx = x.shape
    Cout, Cin = conv_w.shape[0], conv_w.shape[1]
    scale = gamma / jnp.sqrt(var + eps)
    w_fold = conv_w * scale[:, None, None, None]            # (Cout, Cin, 3, 3)
    b_fold = beta + scale * (conv_b - mean)                  # (Cout,)
    if Cx > Cin:                       # consume lane-padded channels directly
        w_fold = jnp.pad(w_fold, ((0, 0), (0, Cx - Cin), (0, 0), (0, 0)))
    # TODO(synk): for real VGG resolutions, move this im2col in-kernel
    # (halo'd row tiles + 9 shifted taps accumulated in VMEM) to avoid the 9x
    # patches HBM blow-up; under jit at these toy shapes it fuses.
    xp = jnp.pad(x, ((0, 0), (1, 1), (1, 1), (0, 0)))
    cols = [xp[:, i:i + H, j:j + W, :] for i in range(3) for j in range(3)]
    patches = jnp.concatenate(cols, axis=-1).reshape(N * H * W, 9 * Cx)
    w_mat = jnp.transpose(w_fold, (2, 3, 1, 0)).reshape(9 * Cx, Cout)
    # Zero-pad K (contraction dim) to a multiple of 128: lane-dense LHS loads,
    # clean (8,128)/(16,128) RHS tiling; zero rows add nothing to the matmul.
    K = patches.shape[1]
    Kp = ((K + 127) // 128) * 128
    if Kp != K:
        patches = jnp.pad(patches, ((0, 0), (0, Kp - K)))
        w_mat = jnp.pad(w_mat, ((0, Kp - K), (0, 0)))
    # bf16 at the kernel boundary (halves patch DMA bytes); f32 acc + epilogue.
    out = matmul_fn(patches.astype(jnp.bfloat16),
                    w_mat.astype(jnp.bfloat16), b_fold)
    return out.reshape(N, H, W, -1)     # channels stay padded to 128 lanes


def maxpool2x2(x):
    N, H, W, C = x.shape
    return jnp.max(x.reshape(N, H // 2, 2, W // 2, 2, C), axis=(2, 4))


def adaptive_avgpool(x, out_hw):
    N, H, W, C = x.shape
    kh, kw = H // out_hw, W // out_hw
    return jnp.mean(x.reshape(N, out_hw, kh, out_hw, kw, C), axis=(2, 4))


def _forward_impl(x_nchw, p, matmul_fn, head_fn):
    """Returns (probas, latent_codes) like DimensionPredictor.forward."""
    N = x_nchw.shape[0]
    x = jnp.transpose(x_nchw, (0, 2, 3, 1)).astype(jnp.float32)   # NCHW -> NHWC
    # feature_extractor (VGG-style, last maxpool removed as in children()[:-1])
    x = conv3x3_bn_relu(x, *p["block1"], matmul_fn=matmul_fn)
    x = maxpool2x2(x)
    x = conv3x3_bn_relu(x, *p["block2"], matmul_fn=matmul_fn)
    x = maxpool2x2(x)
    feats = conv3x3_bn_relu(x, *p["block3"], matmul_fn=matmul_fn)
    # NOTE: reference calls self.maxpool(features) but discards the result (it
    # only exists for the gradient hook) -> no effect on outputs, skipped.
    C3 = p["block3"][0].shape[0]                        # real (unpadded) channels
    pooled = adaptive_avgpool(feats, 4)[..., :C3]       # avgpool analog (8x8 -> 4x4)
    pooled = jnp.transpose(pooled, (0, 3, 1, 2)).reshape(N, -1)  # torch flatten order
    # Fused head: fc1 -> ReLU -> fc2 -> softmax(dim=1) / relu -> regression -> relu
    probas, codes = head_fn(pooled, p["fc1_w"], p["fc1_b"],
                            p["fc2_w"], p["fc2_b"], p["reg_w"], p["reg_b"])
    return probas, jnp.squeeze(codes)                              # .squeeze()


forward_pallas = jax.jit(functools.partial(
    _forward_impl, matmul_fn=conv_matmul, head_fn=classifier_head))
forward_ref = jax.jit(functools.partial(
    _forward_impl, matmul_fn=_conv_mm_ref, head_fn=_head_ref))


# ----------------------------------- main ------------------------------------

if __name__ == "__main__":
    key = jax.random.PRNGKey(0)
    keys = iter(jax.random.split(key, 32))

    def normal(shape, s=0.1):
        return s * jax.random.normal(next(keys), shape, dtype=jnp.float32)

    def make_block(cin, cout):
        return (
            normal((cout, cin, 3, 3)),          # conv weight (OIHW, torch layout)
            normal((cout,), 0.05),              # conv bias
            1.0 + normal((cout,), 0.1),         # bn gamma
            normal((cout,), 0.05),              # bn beta
            normal((cout,), 0.05),              # bn running_mean
            0.5 + jax.random.uniform(next(keys), (cout,), dtype=jnp.float32),  # running_var
        )

    C1, C2, C3, H, E = 8, 16, 32, 64, 10        # H ~ classifier hidden, E ~ embedding_dim
    params = {
        "block1": make_block(3, C1),
        "block2": make_block(C1, C2),
        "block3": make_block(C2, C3),
        "fc1_w": normal((C3 * 4 * 4, H)),       # stored (in, out)
        "fc1_b": normal((H,), 0.05),
        "fc2_w": normal((H, H)),
        "fc2_b": normal((H,), 0.05),
        "reg_w": normal((H, E)),                # regression Linear(n_clf_features, embedding_dim)
        "reg_b": normal((E,), 0.05),
    }

    # Example input, NCHW like the PyTorch module (transform=False path).
    x = jax.random.normal(next(keys), (2, 3, 32, 32), dtype=jnp.float32)

    probas, codes = jax.block_until_ready(forward_pallas(x, params))
    probas_ref, codes_ref = jax.block_until_ready(forward_ref(x, params))

    assert probas.shape == (2, H) and codes.shape == (2, E)
    assert bool(jnp.all(jnp.isfinite(probas))) and bool(jnp.all(jnp.isfinite(codes)))
    assert float(jnp.max(jnp.abs(probas - probas_ref))) < 5e-3
    assert float(jnp.max(jnp.abs(codes - codes_ref))) < 2e-2

    print("KERNEL_OK")
</pallas_src>

<mosaic_0001>
module attributes {stable_mosaic.version = 11 : i64} {
  func.func @_conv_mm_kernel(%arg0: i32, %arg1: memref<512x128xbf16, #tpu.memory_space<vmem>>, %arg2: memref<128x128xbf16, #tpu.memory_space<vmem>>, %arg3: memref<1x128xf32, #tpu.memory_space<vmem>>, %arg4: memref<512x128xf32, #tpu.memory_space<vmem>>) attributes {dimension_semantics = [#tpu.dimension_semantics<parallel>], iteration_bounds = array<i64: 4>, scalar_prefetch = 0 : i64, scratch_operands = 0 : i64, tpu.core_type = #tpu.core_type<tc>, window_params = [{transform_indices = @transform_0, window_bounds = array<i64: 512, 128>}, {pipeline_mode = #tpu.pipeline_mode<synchronous>, transform_indices = @transform_1, window_bounds = array<i64: 128, 128>}, {pipeline_mode = #tpu.pipeline_mode<synchronous>, transform_indices = @transform_2, window_bounds = array<i64: 1, 128>}, {transform_indices = @transform_3, window_bounds = array<i64: 512, 128>}]} {
    %c0 = arith.constant 0 : index
    %c0_0 = arith.constant 0 : index
    %0 = vector.load %arg1[%c0, %c0_0] : memref<512x128xbf16, #tpu.memory_space<vmem>>, vector<512x128xbf16>
    %c0_1 = arith.constant 0 : index
    %c0_2 = arith.constant 0 : index
    %1 = vector.load %arg2[%c0_1, %c0_2] : memref<128x128xbf16, #tpu.memory_space<vmem>>, vector<128x128xbf16>
    %cst = arith.constant dense<0.000000e+00> : vector<512x128xf32>
    %2 = tpu.matmul %0, %1, %cst {dimension_numbers = #tpu.dot_dimension_numbers<[1], [0], [0], [1], [0, 0, 1, 1], [], []>} : vector<512x128xbf16>, vector<128x128xbf16>, vector<512x128xf32> -> vector<512x128xf32>
    %c0_3 = arith.constant 0 : index
    %c0_4 = arith.constant 0 : index
    %3 = vector.load %arg3[%c0_3, %c0_4] : memref<1x128xf32, #tpu.memory_space<vmem>>, vector<1x128xf32>
    %4 = vector.broadcast %3 : vector<1x128xf32> to vector<512x128xf32>
    %5 = arith.addf %2, %4 : vector<512x128xf32>
    %cst_5 = arith.constant 0.000000e+00 : f32
    %6 = vector.broadcast %cst_5 : f32 to vector<512x128xf32>
    %7 = arith.maximumf %5, %6 : vector<512x128xf32>
    %c0_6 = arith.constant 0 : index
    %c0_7 = arith.constant 0 : index
    %8 = vector.load %arg4[%c0_6, %c0_7] : memref<512x128xf32, #tpu.memory_space<vmem>>, vector<512x128xf32>
    tpu.vector_store %arg4[%c0_6, %c0_7], %7 {strides = array<i32>} : memref<512x128xf32, #tpu.memory_space<vmem>>, vector<512x128xf32>,
    return
  }
  func.func @transform_0(%arg0: i32) -> (i32, i32) {
    %c0_i32 = arith.constant 0 : i32
    %c0_i32_0 = arith.constant 0 : i32
    return %arg0, %c0_i32 : i32, i32
  }
  func.func @transform_1(%arg0: i32) -> (i32, i32) {
    %c0_i32 = arith.constant 0 : i32
    %c0_i32_0 = arith.constant 0 : i32
    %c0_i32_1 = arith.constant 0 : i32
    return %c0_i32, %c0_i32_0 : i32, i32
  }
  func.func @transform_2(%arg0: i32) -> (i32, i32) {
    %c0_i32 = arith.constant 0 : i32
    %c0_i32_0 = arith.constant 0 : i32
    %c0_i32_1 = arith.constant 0 : i32
    return %c0_i32, %c0_i32_0 : i32, i32
  }
  func.func @transform_3(%arg0: i32) -> (i32, i32) {
    %c0_i32 = arith.constant 0 : i32
    %c0_i32_0 = arith.constant 0 : i32
    return %arg0, %c0_i32 : i32, i32
  }
}

module attributes {stable_mosaic.version = 11 : i64} {
  func.func @_conv_mm_kernel(%arg0: i32, %arg1: memref<512x1152xbf16, #tpu.memory_space<vmem>>, %arg2: memref<1152x128xbf16, #tpu.memory_space<vmem>>, %arg3: memref<1x128xf32, #tpu.memory_space<vmem>>, %arg4: memref<512x128xf32, #tpu.memory_space<vmem>>) attributes {dimension_semantics = [#tpu.dimension_semantics<parallel>], iteration_bounds = array<i64: 1>, scalar_prefetch = 0 : i64, scratch_operands = 0 : i64, tpu.core_type = #tpu.core_type<tc>, window_params = [{transform_indices = @transform_0, window_bounds = array<i64: 512, 1152>}, {pipeline_mode = #tpu.pipeline_mode<synchronous>, transform_indices = @transform_1, window_bounds = array<i64: 1152, 128>}, {pipeline_mode = #tpu.pipeline_mode<synchronous>, transform_indices = @transform_2, window_bounds = array<i64: 1, 128>}, {transform_indices = @transform_3, window_bounds = array<i64: 512, 128>}]} {
    %c0 = arith.constant 0 : index
    %c0_0 = arith.constant 0 : index
    %0 = vector.load %arg1[%c0, %c0_0] : memref<512x1152xbf16, #tpu.memory_space<vmem>>, vector<512x1152xbf16>
    %c0_1 = arith.constant 0 : index
    %c0_2 = arith.constant 0 : index
    %1 = vector.load %arg2[%c0_1, %c0_2] : memref<1152x128xbf16, #tpu.memory_space<vmem>>, vector<1152x128xbf16>
    %cst = arith.constant dense<0.000000e+00> : vector<512x128xf32>
    %2 = tpu.matmul %0, %1, %cst {dimension_numbers = #tpu.dot_dimension_numbers<[1], [0], [0], [1], [0, 0, 1, 1], [], []>} : vector<512x1152xbf16>, vector<1152x128xbf16>, vector<512x128xf32> -> vector<512x128xf32>
    %c0_3 = arith.constant 0 : index
    %c0_4 = arith.constant 0 : index
    %3 = vector.load %arg3[%c0_3, %c0_4] : memref<1x128xf32, #tpu.memory_space<vmem>>, vector<1x128xf32>
    %4 = vector.broadcast %3 : vector<1x128xf32> to vector<512x128xf32>
    %5 = arith.addf %2, %4 : vector<512x128xf32>
    %cst_5 = arith.constant 0.000000e+00 : f32
    %6 = vector.broadcast %cst_5 : f32 to vector<512x128xf32>
    %7 = arith.maximumf %5, %6 : vector<512x128xf32>
    %c0_6 = arith.constant 0 : index
    %c0_7 = arith.constant 0 : index
    %8 = vector.load %arg4[%c0_6, %c0_7] : memref<512x128xf32, #tpu.memory_space<vmem>>, vector<512x128xf32>
    tpu.vector_store %arg4[%c0_6, %c0_7], %7 {strides = array<i32>} : memref<512x128xf32, #tpu.memory_space<vmem>>, vector<512x128xf32>,
    return
  }
  func.func @transform_0(%arg0: i32) -> (i32, i32) {
    %c0_i32 = arith.constant 0 : i32
    %c0_i32_0 = arith.constant 0 : i32
    return %arg0, %c0_i32 : i32, i32
  }
  func.func @transform_1(%arg0: i32) -> (i32, i32) {
    %c0_i32 = arith.constant 0 : i32
    %c0_i32_0 = arith.constant 0 : i32
    %c0_i32_1 = arith.constant 0 : i32
    return %c0_i32, %c0_i32_0 : i32, i32
  }
  func.func @transform_2(%arg0: i32) -> (i32, i32) {
    %c0_i32 = arith.constant 0 : i32
    %c0_i32_0 = arith.constant 0 : i32
    %c0_i32_1 = arith.constant 0 : i32
    return %c0_i32, %c0_i32_0 : i32, i32
  }
  func.func @transform_3(%arg0: i32) -> (i32, i32) {
    %c0_i32 = arith.constant 0 : i32
    %c0_i32_0 = arith.constant 0 : i32
    return %arg0, %c0_i32 : i32, i32
  }
}

module attributes {stable_mosaic.version = 11 : i64} {
  func.func @_conv_mm_kernel(%arg0: i32, %arg1: memref<128x1152xbf16, #tpu.memory_space<vmem>>, %arg2: memref<1152x128xbf16, #tpu.memory_space<vmem>>, %arg3: memref<1x128xf32, #tpu.memory_space<vmem>>, %arg4: memref<128x128xf32, #tpu.memory_space<vmem>>) attributes {dimension_semantics = [#tpu.dimension_semantics<parallel>], iteration_bounds = array<i64: 1>, scalar_prefetch = 0 : i64, scratch_operands = 0 : i64, tpu.core_type = #tpu.core_type<tc>, window_params = [{transform_indices = @transform_0, window_bounds = array<i64: 128, 1152>}, {pipeline_mode = #tpu.pipeline_mode<synchronous>, transform_indices = @transform_1, window_bounds = array<i64: 1152, 128>}, {pipeline_mode = #tpu.pipeline_mode<synchronous>, transform_indices = @transform_2, window_bounds = array<i64: 1, 128>}, {transform_indices = @transform_3, window_bounds = array<i64: 128, 128>}]} {
    %c0 = arith.constant 0 : index
    %c0_0 = arith.constant 0 : index
    %0 = vector.load %arg1[%c0, %c0_0] : memref<128x1152xbf16, #tpu.memory_space<vmem>>, vector<128x1152xbf16>
    %c0_1 = arith.constant 0 : index
    %c0_2 = arith.constant 0 : index
    %1 = vector.load %arg2[%c0_1, %c0_2] : memref<1152x128xbf16, #tpu.memory_space<vmem>>, vector<1152x128xbf16>
    %cst = arith.constant dense<0.000000e+00> : vector<128x128xf32>
    %2 = tpu.matmul %0, %1, %cst {dimension_numbers = #tpu.dot_dimension_numbers<[1], [0], [0], [1], [0, 0, 1, 1], [], []>} : vector<128x1152xbf16>, vector<1152x128xbf16>, vector<128x128xf32> -> vector<128x128xf32>
    %c0_3 = arith.constant 0 : index
    %c0_4 = arith.constant 0 : index
    %3 = vector.load %arg3[%c0_3, %c0_4] : memref<1x128xf32, #tpu.memory_space<vmem>>, vector<1x128xf32>
    %4 = vector.broadcast %3 : vector<1x128xf32> to vector<128x128xf32>
    %5 = arith.addf %2, %4 : vector<128x128xf32>
    %cst_5 = arith.constant 0.000000e+00 : f32
    %6 = vector.broadcast %cst_5 : f32 to vector<128x128xf32>
    %7 = arith.maximumf %5, %6 : vector<128x128xf32>
    %c0_6 = arith.constant 0 : index
    %c0_7 = arith.constant 0 : index
    %8 = vector.load %arg4[%c0_6, %c0_7] : memref<128x128xf32, #tpu.memory_space<vmem>>, vector<128x128xf32>
    tpu.vector_store %arg4[%c0_6, %c0_7], %7 {strides = array<i32>} : memref<128x128xf32, #tpu.memory_space<vmem>>, vector<128x128xf32>,
    return
  }
  func.func @transform_0(%arg0: i32) -> (i32, i32) {
    %c0_i32 = arith.constant 0 : i32
    %c0_i32_0 = arith.constant 0 : i32
    return %arg0, %c0_i32 : i32, i32
  }
  func.func @transform_1(%arg0: i32) -> (i32, i32) {
    %c0_i32 = arith.constant 0 : i32
    %c0_i32_0 = arith.constant 0 : i32
    %c0_i32_1 = arith.constant 0 : i32
    return %c0_i32, %c0_i32_0 : i32, i32
  }
  func.func @transform_2(%arg0: i32) -> (i32, i32) {
    %c0_i32 = arith.constant 0 : i32
    %c0_i32_0 = arith.constant 0 : i32
    %c0_i32_1 = arith.constant 0 : i32
    return %c0_i32, %c0_i32_0 : i32, i32
  }
  func.func @transform_3(%arg0: i32) -> (i32, i32) {
    %c0_i32 = arith.constant 0 : i32
    %c0_i32_0 = arith.constant 0 : i32
    return %arg0, %c0_i32 : i32, i32
  }
}

module attributes {stable_mosaic.version = 11 : i64} {
  func.func @_head_kernel(%arg0: i32, %arg1: memref<2x512xf32, #tpu.memory_space<vmem>>, %arg2: memref<512x128xf32, #tpu.memory_space<vmem>>, %arg3: memref<1x128xf32, #tpu.memory_space<vmem>>, %arg4: memref<128x128xf32, #tpu.memory_space<vmem>>, %arg5: memref<1x128xf32, #tpu.memory_space<vmem>>, %arg6: memref<128x128xf32, #tpu.memory_space<vmem>>, %arg7: memref<1x128xf32, #tpu.memory_space<vmem>>, %arg8: memref<2x128xf32, #tpu.memory_space<vmem>>, %arg9: memref<2x128xf32, #tpu.memory_space<vmem>>) attributes {dimension_semantics = [#tpu.dimension_semantics<arbitrary>], iteration_bounds = array<i64: 1>, scalar_prefetch = 0 : i64, scratch_operands = 0 : i64, tpu.core_type = #tpu.core_type<tc>, window_params = [{pipeline_mode = #tpu.pipeline_mode<synchronous>, transform_indices = @transform_0, window_bounds = array<i64: 2, 512>}, {pipeline_mode = #tpu.pipeline_mode<synchronous>, transform_indices = @transform_1, window_bounds = array<i64: 512, 128>}, {pipeline_mode = #tpu.pipeline_mode<synchronous>, transform_indices = @transform_2, window_bounds = array<i64: 1, 128>}, {pipeline_mode = #tpu.pipeline_mode<synchronous>, transform_indices = @transform_3, window_bounds = array<i64: 128, 128>}, {pipeline_mode = #tpu.pipeline_mode<synchronous>, transform_indices = @transform_4, window_bounds = array<i64: 1, 128>}, {pipeline_mode = #tpu.pipeline_mode<synchronous>, transform_indices = @transform_5, window_bounds = array<i64: 128, 128>}, {pipeline_mode = #tpu.pipeline_mode<synchronous>, transform_indices = @transform_6, window_bounds = array<i64: 1, 128>}, {pipeline_mode = #tpu.pipeline_mode<synchronous>, transform_indices = @transform_7, window_bounds = array<i64: 2, 128>}, {pipeline_mode = #tpu.pipeline_mode<synchronous>, transform_indices = @transform_8, window_bounds = array<i64: 2, 128>}]} {
    %c0 = arith.constant 0 : index
    %c0_0 = arith.constant 0 : index
    %0 = vector.load %arg1[%c0, %c0_0] : memref<2x512xf32, #tpu.memory_space<vmem>>, vector<2x512xf32>
    %c0_1 = arith.constant 0 : index
    %c0_2 = arith.constant 0 : index
    %1 = vector.load %arg2[%c0_1, %c0_2] : memref<512x128xf32, #tpu.memory_space<vmem>>, vector<512x128xf32>
    %cst = arith.constant dense<0.000000e+00> : vector<2x128xf32>
    %2 = tpu.matmul %0, %1, %cst {dimension_numbers = #tpu.dot_dimension_numbers<[1], [0], [0], [1], [0, 0, 1, 1], [], []>} : vector<2x512xf32>, vector<512x128xf32>, vector<2x128xf32> -> vector<2x128xf32>
    %c0_3 = arith.constant 0 : index
    %c0_4 = arith.constant 0 : index
    %3 = vector.load %arg3[%c0_3, %c0_4] : memref<1x128xf32, #tpu.memory_space<vmem>>, vector<1x128xf32>
    %4 = vector.broadcast %3 : vector<1x128xf32> to vector<2x128xf32>
    %5 = arith.addf %2, %4 : vector<2x128xf32>
    %cst_5 = arith.constant 0.000000e+00 : f32
    %6 = vector.broadcast %cst_5 : f32 to vector<2x128xf32>
    %7 = arith.maximumf %5, %6 : vector<2x128xf32>
    %c0_6 = arith.constant 0 : index
    %c0_7 = arith.constant 0 : index
    %8 = vector.load %arg4[%c0_6, %c0_7] : memref<128x128xf32, #tpu.memory_space<vmem>>, vector<128x128xf32>
    %cst_8 = arith.constant dense<0.000000e+00> : vector<2x128xf32>
    %9 = tpu.matmul %7, %8, %cst_8 {dimension_numbers = #tpu.dot_dimension_numbers<[1], [0], [0], [1], [0, 0, 1, 1], [], []>} : vector<2x128xf32>, vector<128x128xf32>, vector<2x128xf32> -> vector<2x128xf32>
    %c0_9 = arith.constant 0 : index
    %c0_10 = arith.constant 0 : index
    %10 = vector.load %arg5[%c0_9, %c0_10] : memref<1x128xf32, #tpu.memory_space<vmem>>, vector<1x128xf32>
    %11 = vector.broadcast %10 : vector<1x128xf32> to vector<2x128xf32>
    %12 = arith.addf %9, %11 : vector<2x128xf32>
    %cst_11 = arith.constant dense<0xFF800000> : vector<2xf32>
    %13 = vector.multi_reduction <maximumf>, %12, %cst_11 [1] : vector<2x128xf32> to vector<2xf32>
    %14 = vector.shape_cast %13 : vector<2xf32> to vector<2x1xf32>
    %15 = vector.broadcast %14 : vector<2x1xf32> to vector<2x128xf32>
    %16 = arith.subf %12, %15 : vector<2x128xf32>
    %17 = math.exp %16 : vector<2x128xf32>
    %cst_12 = arith.constant dense<0.000000e+00> : vector<2xf32>
    %18 = vector.multi_reduction <add>, %17, %cst_12 [1] : vector<2x128xf32> to vector<2xf32>
    %19 = vector.shape_cast %18 : vector<2xf32> to vector<2x1xf32>
    %20 = vector.broadcast %19 : vector<2x1xf32> to vector<2x128xf32>
    %21 = arith.divf %17, %20 : vector<2x128xf32>
    %c0_13 = arith.constant 0 : index
    %c0_14 = arith.constant 0 : index
    %22 = vector.load %arg8[%c0_13, %c0_14] : memref<2x128xf32, #tpu.memory_space<vmem>>, vector<2x128xf32>
    tpu.vector_store %arg8[%c0_13, %c0_14], %21 {strides = array<i32>} : memref<2x128xf32, #tpu.memory_space<vmem>>, vector<2x128xf32>,
    %cst_15 = arith.constant 0.000000e+00 : f32
    %23 = vector.broadcast %cst_15 : f32 to vector<2x128xf32>
    %24 = arith.maximumf %12, %23 : vector<2x128xf32>
    %c0_16 = arith.constant 0 : index
    %c0_17 = arith.constant 0 : index
    %25 = vector.load %arg6[%c0_16, %c0_17] : memref<128x128xf32, #tpu.memory_space<vmem>>, vector<128x128xf32>
    %cst_18 = arith.constant dense<0.000000e+00> : vector<2x128xf32>
    %26 = tpu.matmul %24, %25, %cst_18 {dimension_numbers = #tpu.dot_dimension_numbers<[1], [0], [0], [1], [0, 0, 1, 1], [], []>} : vector<2x128xf32>, vector<128x128xf32>, vector<2x128xf32> -> vector<2x128xf32>
    %c0_19 = arith.constant 0 : index
    %c0_20 = arith.constant 0 : index
    %27 = vector.load %arg7[%c0_19, %c0_20] : memref<1x128xf32, #tpu.memory_space<vmem>>, vector<1x128xf32>
    %28 = vector.broadcast %27 : vector<1x128xf32> to vector<2x128xf32>
    %29 = arith.addf %26, %28 : vector<2x128xf32>
    %cst_21 = arith.constant 0.000000e+00 : f32
    %30 = vector.broadcast %cst_21 : f32 to vector<2x128xf32>
    %31 = arith.maximumf %29, %30 : vector<2x128xf32>
    %c0_22 = arith.constant 0 : index
    %c0_23 = arith.constant 0 : index
    %32 = vector.load %arg9[%c0_22, %c0_23] : memref<2x128xf32, #tpu.memory_space<vmem>>, vector<2x128xf32>
    tpu.vector_store %arg9[%c0_22, %c0_23], %31 {strides = array<i32>} : memref<2x128xf32, #tpu.memory_space<vmem>>, vector<2x128xf32>,
    return
  }
  func.func @transform_0(%arg0: i32) -> (i32, i32) {
    %c0_i32 = arith.constant 0 : i32
    %c0_i32_0 = arith.constant 0 : i32
    %c0_i32_1 = arith.constant 0 : i32
    return %c0_i32, %c0_i32_0 : i32, i32
  }
  func.func @transform_1(%arg0: i32) -> (i32, i32) {
    %c0_i32 = arith.constant 0 : i32
    %c0_i32_0 = arith.constant 0 : i32
    %c0_i32_1 = arith.constant 0 : i32
    return %c0_i32, %c0_i32_0 : i32, i32
  }
  func.func @transform_2(%arg0: i32) -> (i32, i32) {
    %c0_i32 = arith.constant 0 : i32
    %c0_i32_0 = arith.constant 0 : i32
    %c0_i32_1 = arith.constant 0 : i32
    return %c0_i32, %c0_i32_0 : i32, i32
  }
  func.func @transform_3(%arg0: i32) -> (i32, i32) {
    %c0_i32 = arith.constant 0 : i32
    %c0_i32_0 = arith.constant 0 : i32
    %c0_i32_1 = arith.constant 0 : i32
    return %c0_i32, %c0_i32_0 : i32, i32
  }
  func.func @transform_4(%arg0: i32) -> (i32, i32) {
    %c0_i32 = arith.constant 0 : i32
    %c0_i32_0 = arith.constant 0 : i32
    %c0_i32_1 = arith.constant 0 : i32
    return %c0_i32, %c0_i32_0 : i32, i32
  }
  func.func @transform_5(%arg0: i32) -> (i32, i32) {
    %c0_i32 = arith.constant 0 : i32
    %c0_i32_0 = arith.constant 0 : i32
    %c0_i32_1 = arith.constant 0 : i32
    return %c0_i32, %c0_i32_0 : i32, i32
  }
  func.func @transform_6(%arg0: i32) -> (i32, i32) {
    %c0_i32 = arith.constant 0 : i32
    %c0_i32_0 = arith.constant 0 : i32
    %c0_i32_1 = arith.constant 0 : i32
    return %c0_i32, %c0_i32_0 : i32, i32
  }
  func.func @transform_7(%arg0: i32) -> (i32, i32) {
    %c0_i32 = arith.constant 0 : i32
    %c0_i32_0 = arith.constant 0 : i32
    %c0_i32_1 = arith.constant 0 : i32
    return %c0_i32, %c0_i32_0 : i32, i32
  }
  func.func @transform_8(%arg0: i32) -> (i32, i32) {
    %c0_i32 = arith.constant 0 : i32
    %c0_i32_0 = arith.constant 0 : i32
    %c0_i32_1 = arith.constant 0 : i32
    return %c0_i32, %c0_i32_0 : i32, i32
  }
}

</mosaic_0001>

<bundles_post_ra>
// kernel: _forward_impl.4
= control target key start
LH: loop header
LB: loop body
LE: loop exit
PB: predicated region body
PF: predicated region fallthrough
CT: control target
= control target key end

     0   :  { %s1239_s12 = smov 0   ;;  %s1453_s0 = inlined_call_operand.vmem [shape: bf16[2048,128], index: 0, kind: input, shape index: {}]   ;;  %s1454_s1 = inlined_call_operand.vmem [shape: bf16[128,128], index: 1, kind: input, shape index: {}]   ;;  %s1455_s2 = inlined_call_operand.vmem [shape: f32[1,128], index: 2, kind: input, shape index: {}]   ;;  %s1456_s3 = inlined_call_operand.vmem [shape: f32[2048,128], index: 3, kind: output, shape index: {}]  }
   0x1 LB: > { %s975_s13 = sadd.s32 4294967295, %s1217_s12   ;;  %p979_p0 = scmp.ge.s32.totalorder %s1217_s12, 1  ;;  %s1217_s12 = sphi %s1239_s12, %s13_s12  }
   0x2   : > { %p138_p1 = scmp.lt.s32.totalorder %s1217_s12, 5 }
   0x4   : > { %p139_p2 = pnand %p979_p0, %p138_p1 }
   0x5   : > { %v1171_v0 = vld [vmem:[%s1454_s1] sm:$0xff] (!%p139_p2)   ;;  %s980_s16 = sshll.u32 (!%p139_p2), %s975_s13, 6  ;;  %v1172_v1 = vld [vmem:[%s1454_s1 + $0x8] sm:$0xff] (!%p139_p2)   ;;  %v1173_v2 = vld [vmem:[%s1454_s1 + $0x10] sm:$0xff] (!%p139_p2)  }
   0x6   : > { %142 = sbr.rel (%p139_p2) target bundleno = 314 (0x13a), region = 32  ;;  %p163_p3 = scmp.lt.s32.totalorder (!%p139_p2), %s980_s16, 255  ;;  %1067 = vmatprep.subr.bf16.mxu0 (!%p139_p2), %v1171_v0  ;;  %1147 = vmatprep.subr.bf16.mxu1 (!%p139_p2), %v1171_v0  ;;  %v1174_v3 = vld [vmem:[%s1454_s1 + $0x18] sm:$0xff] (!%p139_p2)   ;;  %v1175_v6 = vld [vmem:[%s1454_s1 + $0x20] sm:$0xff] (!%p139_p2)   ;;  %v1176_v7 = vld [vmem:[%s1454_s1 + $0x28] sm:$0xff] (!%p139_p2)  }
   0x7   : > { %1068 = vmatpush3.bf16.msra.mxu0 (!%p139_p2), %v1171_v0  ;;  %1155 = vmatpush3.bf16.msra.mxu1 (!%p139_p2), %v1171_v0  ;;  %v1177_v8 = vld [vmem:[%s1454_s1 + $0x30] sm:$0xff] (!%p139_p2)   ;;  %v1178_v9 = vld [vmem:[%s1454_s1 + $0x38] sm:$0xff] (!%p139_p2)   ;;  %v1314_v40 = vld [vmem:[%s1455_s2] ss:$0 sm:$0xff] (!%p139_p2) }
   0x8   : > { %1069 = vmatprep.subr.bf16.mxu0 (!%p139_p2), %v1172_v1  ;;  %1148 = vmatprep.subr.bf16.mxu1 (!%p139_p2), %v1172_v1 }
   0xb   : > { %1070 = vmatpush3.bf16.msra.mxu0 (!%p139_p2), %v1172_v1  ;;  %1156 = vmatpush3.bf16.msra.mxu1 (!%p139_p2), %v1172_v1 }
   0xc   : > { %1071 = vmatprep.subr.bf16.mxu0 (!%p139_p2), %v1173_v2  ;;  %1149 = vmatprep.subr.bf16.mxu1 (!%p139_p2), %v1173_v2 }
   0xd   : > { %s1458_s16 = smov (!%p163_p3, %s980_s16), 255 }
   0xe   : > { %s981_s21 = sshll.u32 %s1458_s16, 2  ;;  %s983_s10 = sshll.u32 %s1458_s16, 3 }
   0xf   : > { %s1262_s24 = scalar_lea.vmem %s1453_s0, %s981_s21  ;;  %1072 = vmatpush3.bf16.msra.mxu0 %v1173_v2  ;;  %1157 = vmatpush3.bf16.msra.mxu1 %v1173_v2  ;;  %s1322_s14 = scalar_lea.vmem %s1456_s3, %s983_s10 }
  0x10   : > { %v1179_v4 = vld [vmem:[%s1262_s24] sm:$0xff]   ;;  %1073 = vmatprep.subr.bf16.mxu0 %v1174_v3  ;;  %1150 = vmatprep.subr.bf16.mxu1 %v1174_v3  ;;  %v1181_v10 = vld [vmem:[%s1262_s24 + $0x8] sm:$0xff]   ;;  %v1183_v12 = vld [vmem:[%s1262_s24 + $0x10] sm:$0xff]  }
  0x11   : > { %v1180_v5 = vld [vmem:[%s1262_s24 + $0x80] sm:$0xff]   ;;  %1083 = vmatprep.mubr.bf16.mxu0 %v1179_v4  ;;  %v1182_v11 = vld [vmem:[%s1262_s24 + $0x88] sm:$0xff]   ;;  %v1184_v13 = vld [vmem:[%s1262_s24 + $0x90] sm:$0xff]  }
  0x12   : > { %1115 = vmatprep.mubr.bf16.mxu1 %v1180_v5  ;;  %v1185_v14 = vld [vmem:[%s1262_s24 + $0x18] sm:$0xff]   ;;  %v1187_v16 = vld [vmem:[%s1262_s24 + $0x20] sm:$0xff]   ;;  %v1189_v18 = vld [vmem:[%s1262_s24 + $0x28] sm:$0xff]  }
  0x13   : > { %1074 = vmatpush3.bf16.msra.mxu0 %v1174_v3  ;;  %1158 = vmatpush3.bf16.msra.mxu1 %v1174_v3  ;;  %v1186_v15 = vld [vmem:[%s1262_s24 + $0x98] sm:$0xff]   ;;  %v1188_v17 = vld [vmem:[%s1262_s24 + $0xa0] sm:$0xff]   ;;  %v1190_v19 = vld [vmem:[%s1262_s24 + $0xa8] sm:$0xff]  }
  0x14   : > { %1075 = vmatprep.subr.bf16.mxu0 %v1175_v6  ;;  %1151 = vmatprep.subr.bf16.mxu1 %v1175_v6  ;;  %v1191_v20 = vld [vmem:[%s1262_s24 + $0x30] sm:$0xff]   ;;  %v1193_v22 = vld [vmem:[%s1262_s24 + $0x38] sm:$0xff]   ;;  %v1195_v24 = vld [vmem:[%s1262_s24 + $0x40] sm:$0xff]  }
  0x15   : > { %v1192_v21 = vld [vmem:[%s1262_s24 + $0xb0] sm:$0xff]   ;;  %v1194_v23 = vld [vmem:[%s1262_s24 + $0xb8] sm:$0xff]   ;;  %v1196_v25 = vld [vmem:[%s1262_s24 + $0xc0] sm:$0xff]  }
  0x16   : > { %v1197_v26 = vld [vmem:[%s1262_s24 + $0x48] sm:$0xff]   ;;  %v1199_v28 = vld [vmem:[%s1262_s24 + $0x50] sm:$0xff]   ;;  %v1201_v30 = vld [vmem:[%s1262_s24 + $0x58] sm:$0xff]  }
  0x17   : > { %1076 = vmatpush3.bf16.msra.mxu0 %v1175_v6  ;;  %1159 = vmatpush3.bf16.msra.mxu1 %v1175_v6  ;;  %v1198_v27 = vld [vmem:[%s1262_s24 + $0xc8] sm:$0xff]   ;;  %v1200_v29 = vld [vmem:[%s1262_s24 + $0xd0] sm:$0xff]   ;;  %v1202_v31 = vld [vmem:[%s1262_s24 + $0xd8] sm:$0xff]  }
  0x18   : > { %1077 = vmatprep.subr.bf16.mxu0 %v1176_v7  ;;  %1152 = vmatprep.subr.bf16.mxu1 %v1176_v7  ;;  %v1203_v32 = vld [vmem:[%s1262_s24 + $0x60] sm:$0xff]   ;;  %v1205_v34 = vld [vmem:[%s1262_s24 + $0x68] sm:$0xff]   ;;  %v1207_v36 = vld [vmem:[%s1262_s24 + $0x70] sm:$0xff]  }
  0x19   : > { %v1204_v33 = vld [vmem:[%s1262_s24 + $0xe0] sm:$0xff]   ;;  %v1206_v35 = vld [vmem:[%s1262_s24 + $0xe8] sm:$0xff]   ;;  %v1208_v37 = vld [vmem:[%s1262_s24 + $0xf0] sm:$0xff]  }
  0x1a   : > { %v1209_v38 = vld [vmem:[%s1262_s24 + $0x78] sm:$0xff]  }
  0x1b   : > { %1078 = vmatpush3.bf16.msra.mxu0 %v1176_v7  ;;  %1160 = vmatpush3.bf16.msra.mxu1 %v1176_v7  ;;  %v1210_v39 = vld [vmem:[%s1262_s24 + $0xf8] sm:$0xff]  }
  0x1c   : > { %1079 = vmatprep.subr.bf16.mxu0 %v1177_v8  ;;  %1153 = vmatprep.subr.bf16.mxu1 %v1177_v8 }
  0x1f   : > { %1080 = vmatpush3.bf16.msra.mxu0 %v1177_v8  ;;  %1161 = vmatpush3.bf16.msra.mxu1 %v1177_v8 }
  0x20   : > { %1081 = vmatprep.subr.bf16.mxu0 %v1178_v9  ;;  %1154 = vmatprep.subr.bf16.mxu1 %v1178_v9 }
  0x23   : > { %1082 = vmatpush3.bf16.msra.mxu0 %v1178_v9  ;;  %1162 = vmatpush3.bf16.msra.mxu1 %v1178_v9 }
  0x26   : > { %1084 = vmatmul.mubr.bf16.vlgmr.msra.gmra.mrb[0].mxu0 %v1181_v10  ;;  %1116 = vmatmul.mubr.bf16.vlgmr.msra.gmra.mrb[0].mxu1 %v1182_v11 }
  0x27   : > { %1087 = vmatprep.mubr.bf16.mxu0 %v1183_v12  ;;  %1119 = vmatprep.mubr.bf16.mxu1 %v1184_v13 }
  0x2e   : > { %1088 = vmatmul.mubr.bf16.gmra.mrb[4].mxu0 %v1185_v14  ;;  %1120 = vmatmul.mubr.bf16.gmra.mrb[4].mxu1 %v1186_v15 }
  0x2f   : > { %1091 = vmatprep.mubr.bf16.mxu0 %v1187_v16  ;;  %1123 = vmatprep.mubr.bf16.mxu1 %v1188_v17 }
  0x36   : > { %1092 = vmatmul.mubr.bf16.gmra.mrb[8].mxu0 %v1189_v18  ;;  %1124 = vmatmul.mubr.bf16.gmra.mrb[8].mxu1 %v1190_v19 }
  0x37   : > { %1095 = vmatprep.mubr.bf16.mxu0 %v1191_v20  ;;  %1127 = vmatprep.mubr.bf16.mxu1 %v1192_v21 }
  0x3e   : > { %1096 = vmatmul.mubr.bf16.gmra.mrb[12].mxu0 %v1193_v22  ;;  %1128 = vmatmul.mubr.bf16.gmra.mrb[12].mxu1 %v1194_v23 }
  0x3f   : > { %1099 = vmatprep.mubr.bf16.mxu0 %v1195_v24  ;;  %1131 = vmatprep.mubr.bf16.mxu1 %v1196_v25 }
  0x46   : > { %1100 = vmatmul.mubr.bf16.gmra.mrb[16].mxu0 %v1197_v26  ;;  %1132 = vmatmul.mubr.bf16.gmra.mrb[16].mxu1 %v1198_v27 }
  0x47   : > { %1103 = vmatprep.mubr.bf16.mxu0 %v1199_v28  ;;  %1135 = vmatprep.mubr.bf16.mxu1 %v1200_v29 }
  0x4e   : > { %1104 = vmatmul.mubr.bf16.gmra.mrb[20].mxu0 %v1201_v30  ;;  %1136 = vmatmul.mubr.bf16.gmra.mrb[20].mxu1 %v1202_v31 }
  0x4f   : > { %1107 = vmatprep.mubr.bf16.mxu0 %v1203_v32  ;;  %1139 = vmatprep.mubr.bf16.mxu1 %v1204_v33 }
  0x56   : > { %1108 = vmatmul.mubr.bf16.gmra.mrb[24].mxu0 %v1205_v34  ;;  %1140 = vmatmul.mubr.bf16.gmra.mrb[24].mxu1 %v1206_v35 }
  0x57   : > { %1111 = vmatprep.mubr.bf16.mxu0 %v1207_v36  ;;  %1143 = vmatprep.mubr.bf16.mxu1 %v1208_v37 }
  0x5e   : > { %1112 = vmatmul.mubr.bf16.gmra.mrb[28].mxu0 %v1209_v38  ;;  %1144 = vmatmul.mubr.bf16.gmra.mrb[28].mxu1 %v1210_v39 }
  0xf9   : > { %v1085_v41 = vpop.f32.mrb[0].mxu0  ;;  %v1117_v42 = vpop.f32.mrb[0].mxu1 }
  0xfa   : > { %v545_v43 = vadd.f32 %v1085_v41, %v1314_v40  ;;  %v673_v44 = vadd.f32 %v1117_v42, %v1314_v40  ;;  %v536_v45 = vpop.f32.mrb[1].mxu0  ;;  %v664_v46 = vpop.f32.mrb[1].mxu1 }
  0xfb   : > { %v537_v47 = vadd.f32 %v1314_v40, %v536_v45  ;;  %v665_v48 = vadd.f32 %v1314_v40, %v664_v46  ;;  %v1086_v49 = vpop.f32.mrb[2].mxu0  ;;  %v1118_v50 = vpop.f32.mrb[2].mxu1 }
  0xfc   : > { %v793_v51 = vmax.f32 %v545_v43, 0.0  ;;  %v825_v52 = vmax.f32 %v673_v44, 0.0  ;;  %v548_v53 = vadd.f32 %v1086_v49, %v1314_v40  ;;  %v676_v54 = vadd.f32 %v1118_v50, %v1314_v40  ;;  %v539_v55 = vpop.f32.mrb[3].mxu0  ;;  %v667_v56 = vpop.f32.mrb[3].mxu1 }
  0xfd   : > { %v791_v57 = vmax.f32 %v537_v47, 0.0  ;;  %v823_v58 = vmax.f32 %v665_v48, 0.0  ;;  %v540_v59 = vadd.f32 %v1314_v40, %v539_v55  ;;  %v668_v60 = vadd.f32 %v1314_v40, %v667_v56 }
  0xfe   : > { %857 = vst [vmem:[%s1322_s14 + $0x10] sm:$0xff] %v793_v51  ;;  %889 = vst [vmem:[%s1322_s14 + $0x110] sm:$0xff] %v825_v52  ;;  %v794_v61 = vmax.f32 %v548_v53, 0.0  ;;  %v826_v62 = vmax.f32 %v676_v54, 0.0 }
  0xff   : > { %855 = vst [vmem:[%s1322_s14] sm:$0xff] %v791_v57  ;;  %887 = vst [vmem:[%s1322_s14 + $0x100] sm:$0xff] %v823_v58  ;;  %v792_v63 = vmax.f32 %v540_v59, 0.0  ;;  %v824_v0 = vmax.f32 %v668_v60, 0.0 }
 0x100   : > { %858 = vst [vmem:[%s1322_s14 + $0x18] sm:$0xff] %v794_v61  ;;  %890 = vst [vmem:[%s1322_s14 + $0x118] sm:$0xff] %v826_v62 }
 0x101   : > { %856 = vst [vmem:[%s1322_s14 + $0x8] sm:$0xff] %v792_v63  ;;  %888 = vst [vmem:[%s1322_s14 + $0x108] sm:$0xff] %v824_v0  ;;  %v1089_v1 = vpop.f32.mrb[4].mxu0  ;;  %v1121_v2 = vpop.f32.mrb[4].mxu1 }
 0x102   : > { %v561_v3 = vadd.f32 %v1089_v1, %v1314_v40  ;;  %v689_v4 = vadd.f32 %v1121_v2, %v1314_v40  ;;  %v552_v5 = vpop.f32.mrb[5].mxu0  ;;  %v680_v6 = vpop.f32.mrb[5].mxu1 }
 0x103   : > { %v553_v7 = vadd.f32 %v1314_v40, %v552_v5  ;;  %v681_v8 = vadd.f32 %v1314_v40, %v680_v6  ;;  %v1090_v9 = vpop.f32.mrb[6].mxu0  ;;  %v1122_v10 = vpop.f32.mrb[6].mxu1 }
 0x104   : > { %v797_v11 = vmax.f32 %v561_v3, 0.0  ;;  %v829_v12 = vmax.f32 %v689_v4, 0.0  ;;  %v564_v13 = vadd.f32 %v1090_v9, %v1314_v40  ;;  %v692_v14 = vadd.f32 %v1122_v10, %v1314_v40  ;;  %v555_v15 = vpop.f32.mrb[7].mxu0  ;;  %v683_v16 = vpop.f32.mrb[7].mxu1 }
 0x105   : > { %v795_v17 = vmax.f32 %v553_v7, 0.0  ;;  %v827_v18 = vmax.f32 %v681_v8, 0.0  ;;  %v556_v19 = vadd.f32 %v1314_v40, %v555_v15  ;;  %v684_v20 = vadd.f32 %v1314_v40, %v683_v16 }
 0x106   : > { %861 = vst [vmem:[%s1322_s14 + $0x30] sm:$0xff] %v797_v11  ;;  %893 = vst [vmem:[%s1322_s14 + $0x130] sm:$0xff] %v829_v12  ;;  %v798_v21 = vmax.f32 %v564_v13, 0.0  ;;  %v830_v22 = vmax.f32 %v692_v14, 0.0 }
 0x107   : > { %859 = vst [vmem:[%s1322_s14 + $0x20] sm:$0xff] %v795_v17  ;;  %891 = vst [vmem:[%s1322_s14 + $0x120] sm:$0xff] %v827_v18  ;;  %v796_v23 = vmax.f32 %v556_v19, 0.0  ;;  %v828_v24 = vmax.f32 %v684_v20, 0.0 }
 0x108   : > { %862 = vst [vmem:[%s1322_s14 + $0x38] sm:$0xff] %v798_v21  ;;  %894 = vst [vmem:[%s1322_s14 + $0x138] sm:$0xff] %v830_v22 }
 0x109   : > { %860 = vst [vmem:[%s1322_s14 + $0x28] sm:$0xff] %v796_v23  ;;  %892 = vst [vmem:[%s1322_s14 + $0x128] sm:$0xff] %v828_v24  ;;  %v1093_v25 = vpop.f32.mrb[8].mxu0  ;;  %v1125_v26 = vpop.f32.mrb[8].mxu1 }
 0x10a   : > { %v577_v27 = vadd.f32 %v1093_v25, %v1314_v40  ;;  %v705_v28 = vadd.f32 %v1125_v26, %v1314_v40  ;;  %v568_v29 = vpop.f32.mrb[9].mxu0  ;;  %v696_v30 = vpop.f32.mrb[9].mxu1 }
 0x10b   : > { %v569_v31 = vadd.f32 %v1314_v40, %v568_v29  ;;  %v697_v32 = vadd.f32 %v1314_v40, %v696_v30  ;;  %v1094_v33 = vpop.f32.mrb[10].mxu0  ;;  %v1126_v34 = vpop.f32.mrb[10].mxu1 }
 0x10c   : > { %v801_v35 = vmax.f32 %v577_v27, 0.0  ;;  %v833_v36 = vmax.f32 %v705_v28, 0.0  ;;  %v580_v37 = vadd.f32 %v1094_v33, %v1314_v40  ;;  %v708_v38 = vadd.f32 %v1126_v34, %v1314_v40  ;;  %v571_v39 = vpop.f32.mrb[11].mxu0  ;;  %v699_v41 = vpop.f32.mrb[11].mxu1 }
 0x10d   : > { %v799_v42 = vmax.f32 %v569_v31, 0.0  ;;  %v831_v43 = vmax.f32 %v697_v32, 0.0  ;;  %v572_v44 = vadd.f32 %v1314_v40, %v571_v39  ;;  %v700_v45 = vadd.f32 %v1314_v40, %v699_v41 }
 0x10e   : > { %865 = vst [vmem:[%s1322_s14 + $0x50] sm:$0xff] %v801_v35  ;;  %897 = vst [vmem:[%s1322_s14 + $0x150] sm:$0xff] %v833_v36  ;;  %v802_v46 = vmax.f32 %v580_v37, 0.0  ;;  %v834_v47 = vmax.f32 %v708_v38, 0.0 }
 0x10f   : > { %863 = vst [vmem:[%s1322_s14 + $0x40] sm:$0xff] %v799_v42  ;;  %895 = vst [vmem:[%s1322_s14 + $0x140] sm:$0xff] %v831_v43  ;;  %v800_v48 = vmax.f32 %v572_v44, 0.0  ;;  %v832_v49 = vmax.f32 %v700_v45, 0.0 }
 0x110   : > { %866 = vst [vmem:[%s1322_s14 + $0x58] sm:$0xff] %v802_v46  ;;  %898 = vst [vmem:[%s1322_s14 + $0x158] sm:$0xff] %v834_v47 }
 0x111   : > { %864 = vst [vmem:[%s1322_s14 + $0x48] sm:$0xff] %v800_v48  ;;  %896 = vst [vmem:[%s1322_s14 + $0x148] sm:$0xff] %v832_v49  ;;  %v1097_v50 = vpop.f32.mrb[12].mxu0  ;;  %v1129_v51 = vpop.f32.mrb[12].mxu1 }
 0x112   : > { %v593_v52 = vadd.f32 %v1097_v50, %v1314_v40  ;;  %v721_v53 = vadd.f32 %v1129_v51, %v1314_v40  ;;  %v584_v54 = vpop.f32.mrb[13].mxu0  ;;  %v712_v55 = vpop.f32.mrb[13].mxu1 }
 0x113   : > { %v585_v56 = vadd.f32 %v1314_v40, %v584_v54  ;;  %v713_v57 = vadd.f32 %v1314_v40, %v712_v55  ;;  %v1098_v58 = vpop.f32.mrb[14].mxu0  ;;  %v1130_v59 = vpop.f32.mrb[14].mxu1 }
 0x114   : > { %v805_v60 = vmax.f32 %v593_v52, 0.0  ;;  %v837_v61 = vmax.f32 %v721_v53, 0.0  ;;  %v596_v62 = vadd.f32 %v1098_v58, %v1314_v40  ;;  %v724_v63 = vadd.f32 %v1130_v59, %v1314_v40  ;;  %v587_v0 = vpop.f32.mrb[15].mxu0  ;;  %v715_v1 = vpop.f32.mrb[15].mxu1 }
 0x115   : > { %v803_v2 = vmax.f32 %v585_v56, 0.0  ;;  %v835_v3 = vmax.f32 %v713_v57, 0.0  ;;  %v588_v4 = vadd.f32 %v1314_v40, %v587_v0  ;;  %v716_v5 = vadd.f32 %v1314_v40, %v715_v1 }
 0x116   : > { %869 = vst [vmem:[%s1322_s14 + $0x70] sm:$0xff] %v805_v60  ;;  %901 = vst [vmem:[%s1322_s14 + $0x170] sm:$0xff] %v837_v61  ;;  %v806_v6 = vmax.f32 %v596_v62, 0.0  ;;  %v838_v7 = vmax.f32 %v724_v63, 0.0 }
 0x117   : > { %867 = vst [vmem:[%s1322_s14 + $0x60] sm:$0xff] %v803_v2  ;;  %899 = vst [vmem:[%s1322_s14 + $0x160] sm:$0xff] %v835_v3  ;;  %v804_v8 = vmax.f32 %v588_v4, 0.0  ;;  %v836_v9 = vmax.f32 %v716_v5, 0.0 }
 0x118   : > { %870 = vst [vmem:[%s1322_s14 + $0x78] sm:$0xff] %v806_v6  ;;  %902 = vst [vmem:[%s1322_s14 + $0x178] sm:$0xff] %v838_v7 }
 0x119   : > { %868 = vst [vmem:[%s1322_s14 + $0x68] sm:$0xff] %v804_v8  ;;  %900 = vst [vmem:[%s1322_s14 + $0x168] sm:$0xff] %v836_v9  ;;  %v1101_v10 = vpop.f32.mrb[16].mxu0  ;;  %v1133_v11 = vpop.f32.mrb[16].mxu1 }
 0x11a   : > { %v609_v12 = vadd.f32 %v1101_v10, %v1314_v40  ;;  %v737_v13 = vadd.f32 %v1133_v11, %v1314_v40  ;;  %v600_v14 = vpop.f32.mrb[17].mxu0  ;;  %v728_v15 = vpop.f32.mrb[17].mxu1 }
 0x11b   : > { %v601_v16 = vadd.f32 %v1314_v40, %v600_v14  ;;  %v729_v17 = vadd.f32 %v1314_v40, %v728_v15  ;;  %v1102_v18 = vpop.f32.mrb[18].mxu0  ;;  %v1134_v19 = vpop.f32.mrb[18].mxu1 }
 0x11c   : > { %v809_v20 = vmax.f32 %v609_v12, 0.0  ;;  %v841_v21 = vmax.f32 %v737_v13, 0.0  ;;  %v612_v22 = vadd.f32 %v1102_v18, %v1314_v40  ;;  %v740_v23 = vadd.f32 %v1134_v19, %v1314_v40  ;;  %v603_v24 = vpop.f32.mrb[19].mxu0  ;;  %v731_v25 = vpop.f32.mrb[19].mxu1 }
 0x11d   : > { %v807_v26 = vmax.f32 %v601_v16, 0.0  ;;  %v839_v27 = vmax.f32 %v729_v17, 0.0  ;;  %v604_v28 = vadd.f32 %v1314_v40, %v603_v24  ;;  %v732_v29 = vadd.f32 %v1314_v40, %v731_v25 }
 0x11e   : > { %873 = vst [vmem:[%s1322_s14 + $0x90] sm:$0xff] %v809_v20  ;;  %905 = vst [vmem:[%s1322_s14 + $0x190] sm:$0xff] %v841_v21  ;;  %v810_v30 = vmax.f32 %v612_v22, 0.0  ;;  %v842_v31 = vmax.f32 %v740_v23, 0.0 }
 0x11f   : > { %871 = vst [vmem:[%s1322_s14 + $0x80] sm:$0xff] %v807_v26  ;;  %903 = vst [vmem:[%s1322_s14 + $0x180] sm:$0xff] %v839_v27  ;;  %v808_v32 = vmax.f32 %v604_v28, 0.0  ;;  %v840_v33 = vmax.f32 %v732_v29, 0.0 }
 0x120   : > { %874 = vst [vmem:[%s1322_s14 + $0x98] sm:$0xff] %v810_v30  ;;  %906 = vst [vmem:[%s1322_s14 + $0x198] sm:$0xff] %v842_v31 }
 0x121   : > { %872 = vst [vmem:[%s1322_s14 + $0x88] sm:$0xff] %v808_v32  ;;  %904 = vst [vmem:[%s1322_s14 + $0x188] sm:$0xff] %v840_v33  ;;  %v1105_v34 = vpop.f32.mrb[20].mxu0  ;;  %v1137_v35 = vpop.f32.mrb[20].mxu1 }
 0x122   : > { %v625_v36 = vadd.f32 %v1105_v34, %v1314_v40  ;;  %v753_v37 = vadd.f32 %v1137_v35, %v1314_v40  ;;  %v616_v38 = vpop.f32.mrb[21].mxu0  ;;  %v744_v39 = vpop.f32.mrb[21].mxu1 }
 0x123   : > { %v617_v41 = vadd.f32 %v1314_v40, %v616_v38  ;;  %v745_v42 = vadd.f32 %v1314_v40, %v744_v39  ;;  %v1106_v43 = vpop.f32.mrb[22].mxu0  ;;  %v1138_v44 = vpop.f32.mrb[22].mxu1 }
 0x124   : > { %v813_v45 = vmax.f32 %v625_v36, 0.0  ;;  %v845_v46 = vmax.f32 %v753_v37, 0.0  ;;  %v628_v47 = vadd.f32 %v1106_v43, %v1314_v40  ;;  %v756_v48 = vadd.f32 %v1138_v44, %v1314_v40  ;;  %v619_v49 = vpop.f32.mrb[23].mxu0  ;;  %v747_v50 = vpop.f32.mrb[23].mxu1 }
 0x125   : > { %v811_v51 = vmax.f32 %v617_v41, 0.0  ;;  %v843_v52 = vmax.f32 %v745_v42, 0.0  ;;  %v620_v53 = vadd.f32 %v1314_v40, %v619_v49  ;;  %v748_v54 = vadd.f32 %v1314_v40, %v747_v50 }
 0x126   : > { %877 = vst [vmem:[%s1322_s14 + $0xb0] sm:$0xff] %v813_v45  ;;  %909 = vst [vmem:[%s1322_s14 + $0x1b0] sm:$0xff] %v845_v46  ;;  %v814_v55 = vmax.f32 %v628_v47, 0.0  ;;  %v846_v56 = vmax.f32 %v756_v48, 0.0 }
 0x127   : > { %875 = vst [vmem:[%s1322_s14 + $0xa0] sm:$0xff] %v811_v51  ;;  %907 = vst [vmem:[%s1322_s14 + $0x1a0] sm:$0xff] %v843_v52  ;;  %v812_v57 = vmax.f32 %v620_v53, 0.0  ;;  %v844_v58 = vmax.f32 %v748_v54, 0.0 }
 0x128   : > { %878 = vst [vmem:[%s1322_s14 + $0xb8] sm:$0xff] %v814_v55  ;;  %910 = vst [vmem:[%s1322_s14 + $0x1b8] sm:$0xff] %v846_v56 }
 0x129   : > { %876 = vst [vmem:[%s1322_s14 + $0xa8] sm:$0xff] %v812_v57  ;;  %908 = vst [vmem:[%s1322_s14 + $0x1a8] sm:$0xff] %v844_v58  ;;  %v1109_v59 = vpop.f32.mrb[24].mxu0  ;;  %v1141_v60 = vpop.f32.mrb[24].mxu1 }
 0x12a   : > { %v641_v61 = vadd.f32 %v1109_v59, %v1314_v40  ;;  %v769_v62 = vadd.f32 %v1141_v60, %v1314_v40  ;;  %v632_v63 = vpop.f32.mrb[25].mxu0  ;;  %v760_v0 = vpop.f32.mrb[25].mxu1 }
 0x12b   : > { %v633_v1 = vadd.f32 %v1314_v40, %v632_v63  ;;  %v761_v2 = vadd.f32 %v1314_v40, %v760_v0  ;;  %v1110_v3 = vpop.f32.mrb[26].mxu0  ;;  %v1142_v4 = vpop.f32.mrb[26].mxu1 }
 0x12c   : > { %v817_v5 = vmax.f32 %v641_v61, 0.0  ;;  %v849_v6 = vmax.f32 %v769_v62, 0.0  ;;  %v644_v7 = vadd.f32 %v1110_v3, %v1314_v40  ;;  %v772_v8 = vadd.f32 %v1142_v4, %v1314_v40  ;;  %v635_v9 = vpop.f32.mrb[27].mxu0  ;;  %v763_v10 = vpop.f32.mrb[27].mxu1 }
 0x12d   : > { %v815_v11 = vmax.f32 %v633_v1, 0.0  ;;  %v847_v12 = vmax.f32 %v761_v2, 0.0  ;;  %v636_v13 = vadd.f32 %v1314_v40, %v635_v9  ;;  %v764_v14 = vadd.f32 %v1314_v40, %v763_v10 }
 0x12e   : > { %881 = vst [vmem:[%s1322_s14 + $0xd0] sm:$0xff] %v817_v5  ;;  %913 = vst [vmem:[%s1322_s14 + $0x1d0] sm:$0xff] %v849_v6  ;;  %v818_v15 = vmax.f32 %v644_v7, 0.0  ;;  %v850_v16 = vmax.f32 %v772_v8, 0.0 }
 0x12f   : > { %879 = vst [vmem:[%s1322_s14 + $0xc0] sm:$0xff] %v815_v11  ;;  %911 = vst [vmem:[%s1322_s14 + $0x1c0] sm:$0xff] %v847_v12  ;;  %v816_v17 = vmax.f32 %v636_v13, 0.0  ;;  %v848_v18 = vmax.f32 %v764_v14, 0.0 }
 0x130   : > { %882 = vst [vmem:[%s1322_s14 + $0xd8] sm:$0xff] %v818_v15  ;;  %914 = vst [vmem:[%s1322_s14 + $0x1d8] sm:$0xff] %v850_v16 }
 0x131   : > { %880 = vst [vmem:[%s1322_s14 + $0xc8] sm:$0xff] %v816_v17  ;;  %912 = vst [vmem:[%s1322_s14 + $0x1c8] sm:$0xff] %v848_v18  ;;  %v1113_v19 = vpop.f32.mrb[28].mxu0  ;;  %v1145_v20 = vpop.f32.mrb[28].mxu1 }
 0x132   : > { %v657_v21 = vadd.f32 %v1113_v19, %v1314_v40  ;;  %v785_v22 = vadd.f32 %v1145_v20, %v1314_v40  ;;  %v648_v23 = vpop.f32.mrb[29].mxu0  ;;  %v776_v24 = vpop.f32.mrb[29].mxu1 }
 0x133   : > { %v649_v25 = vadd.f32 %v1314_v40, %v648_v23  ;;  %v777_v26 = vadd.f32 %v1314_v40, %v776_v24  ;;  %v1114_v27 = vpop.f32.mrb[30].mxu0  ;;  %v1146_v28 = vpop.f32.mrb[30].mxu1 }
 0x134   : > { %v821_v29 = vmax.f32 %v657_v21, 0.0  ;;  %v853_v30 = vmax.f32 %v785_v22, 0.0  ;;  %v660_v31 = vadd.f32 %v1114_v27, %v1314_v40  ;;  %v788_v32 = vadd.f32 %v1146_v28, %v1314_v40  ;;  %v651_v33 = vpop.f32.mrb[31].mxu0  ;;  %v779_v34 = vpop.f32.mrb[31].mxu1 }
 0x135   : > { %v819_v35 = vmax.f32 %v649_v25, 0.0  ;;  %v851_v36 = vmax.f32 %v777_v26, 0.0  ;;  %v652_v37 = vadd.f32 %v1314_v40, %v651_v33  ;;  %v780_v38 = vadd.f32 %v1314_v40, %v779_v34 }
 0x136   : > { %885 = vst [vmem:[%s1322_s14 + $0xf0] sm:$0xff] %v821_v29  ;;  %917 = vst [vmem:[%s1322_s14 + $0x1f0] sm:$0xff] %v853_v30  ;;  %v822_v39 = vmax.f32 %v660_v31, 0.0  ;;  %v854_v41 = vmax.f32 %v788_v32, 0.0 }
 0x137   : > { %883 = vst [vmem:[%s1322_s14 + $0xe0] sm:$0xff] %v819_v35  ;;  %915 = vst [vmem:[%s1322_s14 + $0x1e0] sm:$0xff] %v851_v36  ;;  %v820_v42 = vmax.f32 %v652_v37, 0.0  ;;  %v852_v43 = vmax.f32 %v780_v38, 0.0 }
 0x138   : > { %886 = vst [vmem:[%s1322_s14 + $0xf8] sm:$0xff] %v822_v39  ;;  %918 = vst [vmem:[%s1322_s14 + $0x1f8] sm:$0xff] %v854_v41 }
 0x139   : > { %884 = vst [vmem:[%s1322_s14 + $0xe8] sm:$0xff] %v820_v42  ;;  %916 = vst [vmem:[%s1322_s14 + $0x1e8] sm:$0xff] %v852_v43 }
 0x13a PF: > { %s13_s12 = sadd.s32 1, %s1217_s12  }
 0x13b   : > { %p10_p4 = scmp.ge.s32.totalorder %s13_s12, 6  }
 0x13d   :  { %12 = sbr.rel (!%p10_p4) target bundleno = 1 (0x1), region = 62 }

// kernel: _forward_impl.5
= control target key start
LH: loop header
LB: loop body
LE: loop exit
PB: predicated region body
PF: predicated region fallthrough
CT: control target
= control target key end

     0   :  { %v5354_v0 = vmov 0   ;;  %s7223_s1 = inlined_call_operand.vmem [shape: bf16[1152,128], index: 1, kind: input, shape index: {}]   ;;  %s7224_s0 = inlined_call_operand.vmem [shape: bf16[512,1152], index: 0, kind: input, shape index: {}]   ;;  %s7225_s2 = inlined_call_operand.vmem [shape: f32[1,128], index: 2, kind: input, shape index: {}]   ;;  %s7226_s3 = inlined_call_operand.vmem [shape: f32[512,128], index: 3, kind: output, shape index: {}]  }
   0x1   :  { %2390 = vmatprep.subr.bf16.mxu1 %v5354_v0  ;;  %2679 = vmatprep.subr.bf16.mxu0 %v5354_v0  ;;  %v4865_v1 = vld [vmem:[%s7223_s1] sm:$0xff]   ;;  %v4867_v3 = vld [vmem:[%s7223_s1 + $0x8] sm:$0xff]   ;;  %v4869_v5 = vld [vmem:[%s7223_s1 + $0x10] sm:$0xff]  }
   0x2   :  { %v5383_v2 = vld [vmem:[%s7223_s1 + $0x80] sm:$0xff]   ;;  %2391 = vmatpush1.bf16.msra.mxu1 %v4865_v1  ;;  %v5393_v4 = vld [vmem:[%s7223_s1 + $0x88] sm:$0xff]   ;;  %v5404_v6 = vld [vmem:[%s7223_s1 + $0x90] sm:$0xff]  }
   0x3   :  { %2680 = vmatpush1.bf16.msra.mxu0 %v5383_v2  ;;  %2392 = vmatprep.subr.bf16.mxu1 %v5354_v0  ;;  %v4871_v7 = vld [vmem:[%s7223_s1 + $0x18] sm:$0xff]   ;;  %v4873_v9 = vld [vmem:[%s7223_s1 + $0x20] sm:$0xff]   ;;  %v4875_v11 = vld [vmem:[%s7223_s1 + $0x28] sm:$0xff]  }
   0x4   :  { %2681 = vmatprep.subr.bf16.mxu0 %v5354_v0  ;;  %v5415_v8 = vld [vmem:[%s7223_s1 + $0x98] sm:$0xff]   ;;  %v5426_v10 = vld [vmem:[%s7223_s1 + $0xa0] sm:$0xff]   ;;  %v5437_v12 = vld [vmem:[%s7223_s1 + $0xa8] sm:$0xff]  }
   0x5   :  { %v4877_v13 = vld [vmem:[%s7223_s1 + $0x30] sm:$0xff]   ;;  %v4879_v15 = vld [vmem:[%s7223_s1 + $0x38] sm:$0xff]   ;;  %v4881_v17 = vld [vmem:[%s7223_s1 + $0x40] sm:$0xff]  }
   0x6   :  { %2393 = vmatpush1.bf16.msra.mxu1 %v4867_v3  ;;  %v5448_v14 = vld [vmem:[%s7223_s1 + $0xb0] sm:$0xff]   ;;  %v5459_v16 = vld [vmem:[%s7223_s1 + $0xb8] sm:$0xff]   ;;  %v5470_v18 = vld [vmem:[%s7223_s1 + $0xc0] sm:$0xff]  }
   0x7   :  { %2682 = vmatpush1.bf16.msra.mxu0 %v5393_v4  ;;  %2394 = vmatprep.subr.bf16.mxu1 %v5354_v0  ;;  %v4899_v19 = vld [vmem:[%s7224_s0 + $0x4] ss:$36 sps:$4 sm:$0xff]   ;;  %v4902_v21 = vld [vmem:[%s7224_s0 + $0xc] ss:$36 sps:$4 sm:$0xff]   ;;  %v4887_v25 = vld [vmem:[%s7223_s1 + $0x58] sm:$0xff]  }
   0x8   :  { %2683 = vmatprep.subr.bf16.mxu0 %v5354_v0  ;;  %v4883_v20 = vld [vmem:[%s7223_s1 + $0x48] sm:$0xff]   ;;  %2422 = vmatprep.mubr.bf16.mxu1 %v4899_v19  ;;  %v4885_v23 = vld [vmem:[%s7223_s1 + $0x50] sm:$0xff]   ;;  %v5509_v26 = vld [vmem:[%s7223_s1 + $0xd8] sm:$0xff]  }
   0x9   :  { %v5487_v22 = vld [vmem:[%s7223_s1 + $0xc8] sm:$0xff]   ;;  %2711 = vmatprep.mubr.bf16.mxu0 %v4902_v21  ;;  %v5498_v24 = vld [vmem:[%s7223_s1 + $0xd0] sm:$0xff]   ;;  %v4889_v27 = vld [vmem:[%s7223_s1 + $0x60] sm:$0xff]  }
   0xa   :  { %2395 = vmatpush1.bf16.msra.mxu1 %v4869_v5  ;;  %v5520_v28 = vld [vmem:[%s7223_s1 + $0xe0] sm:$0xff]   ;;  %v4891_v29 = vld [vmem:[%s7223_s1 + $0x68] sm:$0xff]   ;;  %v4893_v31 = vld [vmem:[%s7223_s1 + $0x70] sm:$0xff]  }
   0xb   :  { %2684 = vmatpush1.bf16.msra.mxu0 %v5404_v6  ;;  %2396 = vmatprep.subr.bf16.mxu1 %v5354_v0  ;;  %v5531_v30 = vld [vmem:[%s7223_s1 + $0xe8] sm:$0xff]   ;;  %v5542_v32 = vld [vmem:[%s7223_s1 + $0xf0] sm:$0xff]   ;;  %v4895_v33 = vld [vmem:[%s7223_s1 + $0x78] sm:$0xff]  }
   0xc   :  { %2685 = vmatprep.subr.bf16.mxu0 %v5354_v0  ;;  %v5553_v34 = vld [vmem:[%s7223_s1 + $0xf8] sm:$0xff]   ;;  %v4897_v35 = vld [vmem:[%s7224_s0] ss:$36 sps:$4 sm:$0xff]   ;;  %v4900_v36 = vld [vmem:[%s7224_s0 + $0x8] ss:$36 sps:$4 sm:$0xff]  }
   0xd   :  { %v4903_v37 = vld [vmem:[%s7223_s1 + $0x100] sm:$0xff]   ;;  %v4905_v38 = vld [vmem:[%s7224_s0 + $0x4c] ss:$36 sps:$4 sm:$0xff]   ;;  %v4907_v39 = vld [vmem:[%s7224_s0 + $0x54] ss:$36 sps:$4 sm:$0xff]  }
   0xe   :  { %2397 = vmatpush1.bf16.msra.mxu1 %v4871_v7  ;;  %v4904_v40 = vld [vmem:[%s7223_s1 + $0x108] sm:$0xff]   ;;  %v4910_v42 = vld [vmem:[%s7224_s0 + $0x50] ss:$36 sps:$4 sm:$0xff]   ;;  %v4915_v45 = vld [vmem:[%s7224_s0 + $0x9c] ss:$36 sps:$4 sm:$0xff]  }
   0xf   :  { %2686 = vmatpush1.bf16.msra.mxu0 %v5415_v8  ;;  %2398 = vmatprep.subr.bf16.mxu1 %v5354_v0  ;;  %v4909_v41 = vld [vmem:[%s7224_s0 + $0x48] ss:$36 sps:$4 sm:$0xff]   ;;  %v4913_v43 = vld [vmem:[%s7224_s0 + $0x94] ss:$36 sps:$4 sm:$0xff]   ;;  %v4919_v49 = vld [vmem:[%s7223_s1 + $0x120] sm:$0xff]  }
  0x10   :  { %2687 = vmatprep.subr.bf16.mxu0 %v5354_v0  ;;  %v4911_v44 = vld [vmem:[%s7223_s1 + $0x110] sm:$0xff]   ;;  %v4912_v46 = vld [vmem:[%s7223_s1 + $0x118] sm:$0xff]   ;;  %v4923_v51 = vld [vmem:[%s7224_s0 + $0xe4] ss:$36 sps:$4 sm:$0xff]  }
  0x11   :  { %v4917_v47 = vld [vmem:[%s7224_s0 + $0x90] ss:$36 sps:$4 sm:$0xff]   ;;  %v4918_v48 = vld [vmem:[%s7224_s0 + $0x98] ss:$36 sps:$4 sm:$0xff]   ;;  %v4920_v52 = vld [vmem:[%s7223_s1 + $0x128] sm:$0xff]  }
  0x12   :  { %2399 = vmatpush1.bf16.msra.mxu1 %v4873_v9  ;;  %v4921_v50 = vld [vmem:[%s7224_s0 + $0xdc] ss:$36 sps:$4 sm:$0xff]   ;;  %v4929_v55 = vld [vmem:[%s7224_s0 + $0x124] ss:$36 sps:$4 sm:$0xff]   ;;  %v4927_v56 = vld [vmem:[%s7223_s1 + $0x130] sm:$0xff]  }
  0x13   :  { %2688 = vmatpush1.bf16.msra.mxu0 %v5426_v10  ;;  %2400 = vmatprep.subr.bf16.mxu1 %v5354_v0  ;;  %v4925_v53 = vld [vmem:[%s7224_s0 + $0xd8] ss:$36 sps:$4 sm:$0xff]   ;;  %v4926_v54 = vld [vmem:[%s7224_s0 + $0xe0] ss:$36 sps:$4 sm:$0xff]   ;;  %v4931_v57 = vld [vmem:[%s7224_s0 + $0x12c] ss:$36 sps:$4 sm:$0xff]  }
  0x14   :  { %2689 = vmatprep.subr.bf16.mxu0 %v5354_v0  ;;  %v4928_v58 = vld [vmem:[%s7223_s1 + $0x138] sm:$0xff]   ;;  %v4933_v59 = vld [vmem:[%s7224_s0 + $0x120] ss:$36 sps:$4 sm:$0xff]   ;;  %v4934_v60 = vld [vmem:[%s7224_s0 + $0x128] ss:$36 sps:$4 sm:$0xff]  }
  0x15   :  { %v4935_v61 = vld [vmem:[%s7223_s1 + $0x140] sm:$0xff]   ;;  %v4937_v62 = vld [vmem:[%s7224_s0 + $0x16c] ss:$36 sps:$4 sm:$0xff]   ;;  %v4939_v63 = vld [vmem:[%s7224_s0 + $0x174] ss:$36 sps:$4 sm:$0xff]  }
  0x16   :  { %2401 = vmatpush1.bf16.msra.mxu1 %v4875_v11  ;;  %v4936_v1 = vld [vmem:[%s7223_s1 + $0x148] sm:$0xff]   ;;  %v4942_v3 = vld [vmem:[%s7224_s0 + $0x170] ss:$36 sps:$4 sm:$0xff]   ;;  %v4944_v7 = vld [vmem:[%s7223_s1 + $0x158] sm:$0xff]  }
  0x17   :  { %2690 = vmatpush1.bf16.msra.mxu0 %v5437_v12  ;;  %2402 = vmatprep.subr.bf16.mxu1 %v5354_v0  ;;  %v4943_v5 = vld [vmem:[%s7223_s1 + $0x150] sm:$0xff]   ;;  %v4950_v9 = vld [vmem:[%s7224_s0 + $0x1b8] ss:$36 sps:$4 sm:$0xff]  }
  0x18   :  { %2691 = vmatprep.subr.bf16.mxu0 %v5354_v0  ;;  %v4953_v11 = vld [vmem:[%s7224_s0 + $0x1fc] ss:$36 sps:$4 sm:$0xff]   ;;  %v4963_v21 = vld [vmem:[%s7224_s0 + $0x10] ss:$36 sps:$4 sm:$0xff]  }
  0x19   :  { %v4960_v19 = vld [vmem:[%s7223_s1 + $0x178] sm:$0xff]  }
  0x1a   :  { %2403 = vmatpush1.bf16.msra.mxu1 %v4877_v13  ;;  %v4952_v13 = vld [vmem:[%s7223_s1 + $0x168] sm:$0xff]  }
  0x1b   :  { %2692 = vmatpush1.bf16.msra.mxu0 %v5448_v14  ;;  %2404 = vmatprep.subr.bf16.mxu1 %v5354_v0 }
  0x1c   :  { %2693 = vmatprep.subr.bf16.mxu0 %v5354_v0 }
  0x1e   :  { %2405 = vmatpush1.bf16.msra.mxu1 %v4879_v15  ;;  %v4958_v15 = vld [vmem:[%s7224_s0 + $0x200] ss:$36 sps:$4 sm:$0xff]  }
  0x1f   :  { %2694 = vmatpush1.bf16.msra.mxu0 %v5459_v16  ;;  %2406 = vmatprep.subr.bf16.mxu1 %v5354_v0 }
  0x20   :  { %2695 = vmatprep.subr.bf16.mxu0 %v5354_v0 }
  0x22   :  { %2407 = vmatpush1.bf16.msra.mxu1 %v4881_v17  ;;  %v4959_v17 = vld [vmem:[%s7223_s1 + $0x170] sm:$0xff]  }
  0x23   :  { %2696 = vmatpush1.bf16.msra.mxu0 %v5470_v18  ;;  %2408 = vmatprep.subr.bf16.mxu1 %v5354_v0 }
  0x24   :  { %2697 = vmatprep.subr.bf16.mxu0 %v5354_v0 }
  0x26   :  { %2409 = vmatpush1.bf16.msra.mxu1 %v4883_v20  ;;  %v4966_v20 = vld [vmem:[%s7224_s0 + $0x240] ss:$36 sps:$4 sm:$0xff]  }
  0x27   :  { %2698 = vmatpush1.bf16.msra.mxu0 %v5487_v22  ;;  %2410 = vmatprep.subr.bf16.mxu1 %v5354_v0 }
  0x28   :  { %2699 = vmatprep.subr.bf16.mxu0 %v5354_v0 }
  0x2a   :  { %2411 = vmatpush1.bf16.msra.mxu1 %v4885_v23  ;;  %v4967_v23 = vld [vmem:[%s7223_s1 + $0x180] sm:$0xff]  }
  0x2b   :  { %2700 = vmatpush1.bf16.msra.mxu0 %v5498_v24  ;;  %2412 = vmatprep.subr.bf16.mxu1 %v5354_v0 }
  0x2c   :  { %2701 = vmatprep.subr.bf16.mxu0 %v5354_v0 }
  0x2e   :  { %2413 = vmatpush1.bf16.msra.mxu1 %v4887_v25  ;;  %v4972_v25 = vld [vmem:[%s7224_s0 + $0x288] ss:$36 sps:$4 sm:$0xff]  }
  0x2f   :  { %2702 = vmatpush1.bf16.msra.mxu0 %v5509_v26  ;;  %2414 = vmatprep.subr.bf16.mxu1 %v5354_v0 }
  0x30   :  { %2703 = vmatprep.subr.bf16.mxu0 %v5354_v0 }
  0x32   :  { %2415 = vmatpush1.bf16.msra.mxu1 %v4889_v27  ;;  %v4973_v27 = vld [vmem:[%s7224_s0 + $0x58] ss:$36 sps:$4 sm:$0xff]  }
  0x33   :  { %2704 = vmatpush1.bf16.msra.mxu0 %v5520_v28  ;;  %2416 = vmatprep.subr.bf16.mxu1 %v5354_v0 }
  0x34   :  { %2705 = vmatprep.subr.bf16.mxu0 %v5354_v0 }
  0x36   :  { %2417 = vmatpush1.bf16.msra.mxu1 %v4891_v29  ;;  %v4976_v29 = vld [vmem:[%s7224_s0 + $0xa4] ss:$36 sps:$4 sm:$0xff]  }
  0x37   :  { %2706 = vmatpush1.bf16.msra.mxu0 %v5531_v30  ;;  %2418 = vmatprep.subr.bf16.mxu1 %v5354_v0 }
  0x38   :  { %2707 = vmatprep.subr.bf16.mxu0 %v5354_v0 }
  0x3a   :  { %2419 = vmatpush1.bf16.msra.mxu1 %v4893_v31  ;;  %v4978_v31 = vld [vmem:[%s7224_s0 + $0x2d0] ss:$36 sps:$4 sm:$0xff]  }
  0x3b   :  { %2708 = vmatpush1.bf16.msra.mxu0 %v5542_v32  ;;  %2420 = vmatprep.subr.bf16.mxu1 %v5354_v0 }
  0x3c   :  { %2709 = vmatprep.subr.bf16.mxu0 %v5354_v0 }
  0x3e   :  { %2421 = vmatpush1.bf16.msra.mxu1 %v4895_v33  ;;  %v4979_v33 = vld [vmem:[%s7224_s0 + $0xa0] ss:$36 sps:$4 sm:$0xff]  }
  0x3f   :  { %2710 = vmatpush1.bf16.msra.mxu0 %v5553_v34  ;;  %4448 = vmatprep.subr.bf16.mxu1 %v5354_v0 }
  0x40   :  { %2968 = vmatprep.subr.bf16.mxu0 %v5354_v0 }
  0x41   :  { %2423 = vmatmul.mubr.bf16.vlgmr.msra.gmra.mrb[0].mxu1 %v4897_v35  ;;  %v4983_v35 = vld [vmem:[%s7224_s0 + $0xec] ss:$36 sps:$4 sm:$0xff]  }
  0x42   :  { %2712 = vmatmul.mubr.bf16.vlgmr.msra.gmra.mrb[0].mxu0 %v4900_v36  ;;  %4464 = vmatpush1.bf16.msra.mxu1 %v5383_v2  ;;  %v4941_v2 = vld [vmem:[%s7224_s0 + $0x168] ss:$36 sps:$4 sm:$0xff]   ;;  %v5019_v36 = vld [vmem:[%s7223_s1 + $0x1a0] sm:$0xff]  }
  0x43   :  { %2969 = vmatpush1.bf16.msra.mxu0 %v4903_v37  ;;  %2430 = vmatprep.mubr.bf16.mxu1 %v4905_v38  ;;  %v4985_v37 = vld [vmem:[%s7224_s0 + $0x318] ss:$36 sps:$4 sm:$0xff]   ;;  %v5032_v38 = vld [vmem:[%s7223_s1 + $0x1a8] sm:$0xff]  }
  0x44   :  { %2970 = vmatprep.subr.bf16.mxu0 %v5354_v0  ;;  %2719 = vmatprep.mubr.bf16.mxu0 %v4907_v39  ;;  %v4986_v39 = vld [vmem:[%s7224_s0 + $0xe8] ss:$36 sps:$4 sm:$0xff]  }
  0x45   :  { %4449 = vmatprep.subr.bf16.mxu1 %v5354_v0 }
  0x46   :  { %4465 = vmatpush1.bf16.msra.mxu1 %v5393_v4  ;;  %v4945_v4 = vld [vmem:[%s7224_s0 + $0x1b4] ss:$36 sps:$4 sm:$0xff]  }
  0x47   :  { %2971 = vmatpush1.bf16.msra.mxu0 %v4904_v40  ;;  %4450 = vmatprep.subr.bf16.mxu1 %v5354_v0  ;;  %v4987_v40 = vld [vmem:[%s7224_s0 + $0x364] ss:$36 sps:$4 sm:$0xff]  }
  0x48   :  { %2972 = vmatprep.subr.bf16.mxu0 %v5354_v0 }
  0x49   :  { %2431 = vmatmul.mubr.bf16.gmra.mrb[4].mxu1 %v4909_v41  ;;  %v4989_v41 = vld [vmem:[%s7224_s0 + $0x134] ss:$36 sps:$4 sm:$0xff]  }
  0x4a   :  { %2720 = vmatmul.mubr.bf16.gmra.mrb[4].mxu0 %v4910_v42  ;;  %2438 = vmatprep.mubr.bf16.mxu1 %v4913_v43  ;;  %v5045_v42 = vld [vmem:[%s7223_s1 + $0x1b0] sm:$0xff]   ;;  %v5058_v43 = vld [vmem:[%s7223_s1 + $0x1b8] sm:$0xff]  }
  0x4b   :  { %2973 = vmatpush1.bf16.msra.mxu0 %v4911_v44  ;;  %2727 = vmatprep.mubr.bf16.mxu0 %v4915_v45  ;;  %v4991_v44 = vld [vmem:[%s7224_s0 + $0x360] ss:$36 sps:$4 sm:$0xff]   ;;  %v4992_v45 = vld [vmem:[%s7224_s0 + $0x130] ss:$36 sps:$4 sm:$0xff]  }
  0x4c   :  { %2974 = vmatprep.subr.bf16.mxu0 %v5354_v0  ;;  %4466 = vmatpush1.bf16.msra.mxu1 %v5404_v6  ;;  %v4947_v6 = vld [vmem:[%s7224_s0 + $0x1bc] ss:$36 sps:$4 sm:$0xff]  }
  0x4d   :  { %4451 = vmatprep.subr.bf16.mxu1 %v5354_v0 }
  0x4f   :  { %2975 = vmatpush1.bf16.msra.mxu0 %v4912_v46  ;;  %v4994_v46 = vld [vmem:[%s7224_s0 + $0x3ac] ss:$36 sps:$4 sm:$0xff]  }
  0x50   :  { %2976 = vmatprep.subr.bf16.mxu0 %v5354_v0  ;;  %4467 = vmatpush1.bf16.msra.mxu1 %v5415_v8  ;;  %v4949_v8 = vld [vmem:[%s7224_s0 + $0x1b0] ss:$36 sps:$4 sm:$0xff]  }
  0x51   :  { %2439 = vmatmul.mubr.bf16.gmra.mrb[8].mxu1 %v4917_v47  ;;  %4452 = vmatprep.subr.bf16.mxu1 %v5354_v0  ;;  %v4996_v47 = vld [vmem:[%s7224_s0 + $0x17c] ss:$36 sps:$4 sm:$0xff]  }
  0x52   :  { %2728 = vmatmul.mubr.bf16.gmra.mrb[8].mxu0 %v4918_v48  ;;  %2446 = vmatprep.mubr.bf16.mxu1 %v4921_v50  ;;  %v5071_v48 = vld [vmem:[%s7223_s1 + $0x1c0] sm:$0xff]   ;;  %v4998_v50 = vld [vmem:[%s7224_s0 + $0x3a8] ss:$36 sps:$4 sm:$0xff]  }
  0x53   :  { %2977 = vmatpush1.bf16.msra.mxu0 %v4919_v49  ;;  %2735 = vmatprep.mubr.bf16.mxu0 %v4923_v51  ;;  %v5084_v49 = vld [vmem:[%s7223_s1 + $0x1c8] sm:$0xff]   ;;  %v4999_v51 = vld [vmem:[%s7224_s0 + $0x178] ss:$36 sps:$4 sm:$0xff]  }
  0x54   :  { %2978 = vmatprep.subr.bf16.mxu0 %v5354_v0  ;;  %4468 = vmatpush1.bf16.msra.mxu1 %v5426_v10  ;;  %v4951_v10 = vld [vmem:[%s7223_s1 + $0x160] sm:$0xff]  }
  0x55   :  { %4453 = vmatprep.subr.bf16.mxu1 %v5354_v0 }
  0x57   :  { %2979 = vmatpush1.bf16.msra.mxu0 %v4920_v52  ;;  %v5000_v52 = vld [vmem:[%s7224_s0 + $0x3f4] ss:$36 sps:$4 sm:$0xff]  }
  0x58   :  { %2980 = vmatprep.subr.bf16.mxu0 %v5354_v0  ;;  %4469 = vmatpush1.bf16.msra.mxu1 %v5437_v12  ;;  %v4955_v12 = vld [vmem:[%s7224_s0 + $0x204] ss:$36 sps:$4 sm:$0xff]  }
  0x59   :  { %2447 = vmatmul.mubr.bf16.gmra.mrb[12].mxu1 %v4925_v53  ;;  %4454 = vmatprep.subr.bf16.mxu1 %v5354_v0  ;;  %v5002_v53 = vld [vmem:[%s7224_s0 + $0x1c4] ss:$36 sps:$4 sm:$0xff]  }
  0x5a   :  { %2736 = vmatmul.mubr.bf16.gmra.mrb[12].mxu0 %v4926_v54  ;;  %2454 = vmatprep.mubr.bf16.mxu1 %v4929_v55  ;;  %v5097_v54 = vld [vmem:[%s7223_s1 + $0x1d0] sm:$0xff]  }
  0x5b   :  { %2981 = vmatpush1.bf16.msra.mxu0 %v4927_v56  ;;  %2743 = vmatprep.mubr.bf16.mxu0 %v4931_v57  ;;  %v5004_v55 = vld [vmem:[%s7224_s0 + $0x3f0] ss:$36 sps:$4 sm:$0xff]   ;;  %v5005_v56 = vld [vmem:[%s7224_s0 + $0x1c0] ss:$36 sps:$4 sm:$0xff]  }
  0x5c   :  { %2982 = vmatprep.subr.bf16.mxu0 %v5354_v0  ;;  %4470 = vmatpush1.bf16.msra.mxu1 %v5448_v14  ;;  %v4957_v14 = vld [vmem:[%s7224_s0 + $0x1f8] ss:$36 sps:$4 sm:$0xff]  }
  0x5d   :  { %4455 = vmatprep.subr.bf16.mxu1 %v5354_v0  ;;  %v5007_v57 = vld [vmem:[%s7224_s0 + $0x43c] ss:$36 sps:$4 sm:$0xff]  }
  0x5f   :  { %2983 = vmatpush1.bf16.msra.mxu0 %v4928_v58  ;;  %v5009_v58 = vld [vmem:[%s7224_s0 + $0x20c] ss:$36 sps:$4 sm:$0xff]  }
  0x60   :  { %2984 = vmatprep.subr.bf16.mxu0 %v5354_v0  ;;  %4471 = vmatpush1.bf16.msra.mxu1 %v5459_v16  ;;  %v4961_v16 = vld [vmem:[%s7224_s0 + $0x244] ss:$36 sps:$4 sm:$0xff]  }
  0x61   :  { %2455 = vmatmul.mubr.bf16.gmra.mrb[16].mxu1 %v4933_v59  ;;  %4456 = vmatprep.subr.bf16.mxu1 %v5354_v0  ;;  %v5110_v59 = vld [vmem:[%s7223_s1 + $0x1d8] sm:$0xff]  }
  0x62   :  { %2744 = vmatmul.mubr.bf16.gmra.mrb[16].mxu0 %v4934_v60  ;;  %2462 = vmatprep.mubr.bf16.mxu1 %v4937_v62  ;;  %v5011_v60 = vld [vmem:[%s7224_s0 + $0x438] ss:$36 sps:$4 sm:$0xff]   ;;  %v5013_v62 = vld [vmem:[%s7224_s0 + $0x484] ss:$36 sps:$4 sm:$0xff]  }
  0x63   :  { %2985 = vmatpush1.bf16.msra.mxu0 %v4935_v61  ;;  %2751 = vmatprep.mubr.bf16.mxu0 %v4939_v63  ;;  %v5012_v61 = vld [vmem:[%s7224_s0 + $0x208] ss:$36 sps:$4 sm:$0xff]   ;;  %v5015_v63 = vld [vmem:[%s7224_s0 + $0x254] ss:$36 sps:$4 sm:$0xff]  }
  0x64   :  { %2986 = vmatprep.subr.bf16.mxu0 %v5354_v0  ;;  %4472 = vmatpush1.bf16.msra.mxu1 %v5470_v18  ;;  %v4965_v18 = vld [vmem:[%s7224_s0 + $0x14] ss:$36 sps:$4 sm:$0xff]  }
  0x65   :  { %4457 = vmatprep.subr.bf16.mxu1 %v5354_v0 }
  0x67   :  { %2987 = vmatpush1.bf16.msra.mxu0 %v4936_v1  ;;  %v5017_v1 = vld [vmem:[%s7224_s0 + $0x480] ss:$36 sps:$4 sm:$0xff]  }
  0x68   :  { %2988 = vmatprep.subr.bf16.mxu0 %v5354_v0  ;;  %4473 = vmatpush1.bf16.msra.mxu1 %v5487_v22  ;;  %v4968_v22 = vld [vmem:[%s7224_s0 + $0x28c] ss:$36 sps:$4 sm:$0xff]  }
  0x69   :  { %2463 = vmatmul.mubr.bf16.gmra.mrb[20].mxu1 %v4941_v2  ;;  %4458 = vmatprep.subr.bf16.mxu1 %v5354_v0  ;;  %v5018_v2 = vld [vmem:[%s7224_s0 + $0x250] ss:$36 sps:$4 sm:$0xff]  }
  0x6a   :  { %2752 = vmatmul.mubr.bf16.gmra.mrb[20].mxu0 %v4942_v3  ;;  %2470 = vmatprep.mubr.bf16.mxu1 %v4945_v4  ;;  %v5020_v3 = vld [vmem:[%s7224_s0 + $0x4cc] ss:$36 sps:$4 sm:$0xff]   ;;  %v5022_v4 = vld [vmem:[%s7224_s0 + $0x29c] ss:$36 sps:$4 sm:$0xff]  }
  0x6b   :  { %2989 = vmatpush1.bf16.msra.mxu0 %v4943_v5  ;;  %2759 = vmatprep.mubr.bf16.mxu0 %v4947_v6  ;;  %v5123_v5 = vld [vmem:[%s7223_s1 + $0x1e0] sm:$0xff]  }
  0x6c   :  { %2990 = vmatprep.subr.bf16.mxu0 %v5354_v0  ;;  %4474 = vmatpush1.bf16.msra.mxu1 %v5498_v24  ;;  %v4970_v24 = vld [vmem:[%s7224_s0 + $0x5c] ss:$36 sps:$4 sm:$0xff]  }
  0x6d   :  { %4459 = vmatprep.subr.bf16.mxu1 %v5354_v0  ;;  %v5912_v6 = vld [vmem:[%s7223_s1 + $0x200] sm:$0xff]  }
  0x6f   :  { %2991 = vmatpush1.bf16.msra.mxu0 %v4944_v7  ;;  %v5024_v7 = vld [vmem:[%s7224_s0 + $0x4c8] ss:$36 sps:$4 sm:$0xff]  }
  0x70   :  { %2992 = vmatprep.subr.bf16.mxu0 %v5354_v0  ;;  %4475 = vmatpush1.bf16.msra.mxu1 %v5509_v26  ;;  %v4980_v26 = vld [vmem:[%s7223_s1 + $0x188] sm:$0xff]  }
  0x71   :  { %2471 = vmatmul.mubr.bf16.gmra.mrb[24].mxu1 %v4949_v8  ;;  %4460 = vmatprep.subr.bf16.mxu1 %v5354_v0  ;;  %v5025_v8 = vld [vmem:[%s7224_s0 + $0x298] ss:$36 sps:$4 sm:$0xff]  }
  0x72   :  { %2760 = vmatmul.mubr.bf16.gmra.mrb[24].mxu0 %v4950_v9  ;;  %2478 = vmatprep.mubr.bf16.mxu1 %v4953_v11  ;;  %v5026_v9 = vld [vmem:[%s7224_s0 + $0x514] ss:$36 sps:$4 sm:$0xff]  }
  0x73   :  { %2993 = vmatpush1.bf16.msra.mxu0 %v4951_v10  ;;  %2767 = vmatprep.mubr.bf16.mxu0 %v4955_v12  ;;  %v5028_v10 = vld [vmem:[%s7224_s0 + $0x2e4] ss:$36 sps:$4 sm:$0xff]   ;;  %v5030_v11 = vld [vmem:[%s7224_s0 + $0x510] ss:$36 sps:$4 sm:$0xff]  }
  0x74   :  { %2994 = vmatprep.subr.bf16.mxu0 %v5354_v0  ;;  %4476 = vmatpush1.bf16.msra.mxu1 %v5520_v28  ;;  %v4974_v28 = vld [vmem:[%s7224_s0 + $0x2d4] ss:$36 sps:$4 sm:$0xff]   ;;  %v5031_v12 = vld [vmem:[%s7224_s0 + $0x2e0] ss:$36 sps:$4 sm:$0xff]  }
  0x75   :  { %4461 = vmatprep.subr.bf16.mxu1 %v5354_v0 }
  0x77   :  { %2995 = vmatpush1.bf16.msra.mxu0 %v4952_v13  ;;  %v5033_v13 = vld [vmem:[%s7224_s0 + $0x55c] ss:$36 sps:$4 sm:$0xff]  }
  0x78   :  { %2996 = vmatprep.subr.bf16.mxu0 %v5354_v0  ;;  %4477 = vmatpush1.bf16.msra.mxu1 %v5531_v30  ;;  %v4993_v30 = vld [vmem:[%s7223_s1 + $0x190] sm:$0xff]  }
  0x79   :  { %2479 = vmatmul.mubr.bf16.gmra.mrb[28].mxu1 %v4957_v14  ;;  %4462 = vmatprep.subr.bf16.mxu1 %v5354_v0  ;;  %v5035_v14 = vld [vmem:[%s7224_s0 + $0x32c] ss:$36 sps:$4 sm:$0xff]  }
  0x7a   :  { %2768 = vmatmul.mubr.bf16.gmra.mrb[28].mxu0 %v4958_v15  ;;  %2486 = vmatprep.mubr.bf16.mxu1 %v4961_v16  ;;  %v5137_v15 = vld [vmem:[%s7223_s1 + $0x1e8] sm:$0xff]   ;;  %v5037_v16 = vld [vmem:[%s7224_s0 + $0x558] ss:$36 sps:$4 sm:$0xff]  }
  0x7b   :  { %2997 = vmatpush1.bf16.msra.mxu0 %v4959_v17  ;;  %3000 = vmatprep.mubr.bf16.mxu0 %v4965_v18  ;;  %v5038_v17 = vld [vmem:[%s7224_s0 + $0x328] ss:$36 sps:$4 sm:$0xff]  }
  0x7c   :  { %2998 = vmatprep.subr.bf16.mxu0 %v5354_v0  ;;  %4478 = vmatpush1.bf16.msra.mxu1 %v5542_v32  ;;  %v5006_v32 = vld [vmem:[%s7223_s1 + $0x198] sm:$0xff]   ;;  %v5039_v18 = vld [vmem:[%s7224_s0 + $0x5a4] ss:$36 sps:$4 sm:$0xff]  }
  0x7d   :  { %4463 = vmatprep.subr.bf16.mxu1 %v5354_v0 }
  0x7f   :  { %2999 = vmatpush1.bf16.msra.mxu0 %v4960_v19  ;;  %v5041_v19 = vld [vmem:[%s7224_s0 + $0x374] ss:$36 sps:$4 sm:$0xff]  }
  0x80   :  { %3257 = vmatprep.subr.bf16.mxu0 %v5354_v0  ;;  %4479 = vmatpush1.bf16.msra.mxu1 %v5553_v34  ;;  %v4981_v34 = vld [vmem:[%s7224_s0 + $0x31c] ss:$36 sps:$4 sm:$0xff]  }
  0x81   :  { %2487 = vmatmul.mubr.bf16.gmra.mrb[32].mxu1 %v4966_v20  ;;  %4368 = vmatprep.subr.bf16.mxu1 %v5912_v6  ;;  %v5043_v20 = vld [vmem:[%s7224_s0 + $0x5a0] ss:$36 sps:$4 sm:$0xff]  }
  0x82   :  { %3001 = vmatmul.mubr.bf16.vlgmr.msra.gmra.mrb[0].mxu0 %v4963_v21  ;;  %2494 = vmatprep.mubr.bf16.mxu1 %v4968_v22  ;;  %v5044_v21 = vld [vmem:[%s7224_s0 + $0x370] ss:$36 sps:$4 sm:$0xff]  }
  0x83   :  { %3258 = vmatpush1.bf16.msra.mxu0 %v4967_v23  ;;  %3008 = vmatprep.mubr.bf16.mxu0 %v4970_v24  ;;  %v5046_v22 = vld [vmem:[%s7224_s0 + $0x5ec] ss:$36 sps:$4 sm:$0xff]   ;;  %v5048_v23 = vld [vmem:[%s7224_s0 + $0x3bc] ss:$36 sps:$4 sm:$0xff]  }
  0x84   :  { %3259 = vmatprep.subr.bf16.mxu0 %v5354_v0  ;;  %v5151_v24 = vld [vmem:[%s7223_s1 + $0x1f0] sm:$0xff]  }
  0x87   :  { %3260 = vmatpush1.bf16.msra.mxu0 %v4980_v26  ;;  %v5051_v26 = vld [vmem:[%s7224_s0 + $0x3b8] ss:$36 sps:$4 sm:$0xff]  }
  0x88   :  { %3261 = vmatprep.subr.bf16.mxu0 %v5354_v0 }
  0x89   :  { %2495 = vmatmul.mubr.bf16.gmra.mrb[36].mxu1 %v4972_v25  ;;  %v5050_v25 = vld [vmem:[%s7224_s0 + $0x5e8] ss:$36 sps:$4 sm:$0xff]  }
  0x8a   :  { %3009 = vmatmul.mubr.bf16.gmra.mrb[4].mxu0 %v4973_v27  ;;  %2502 = vmatprep.mubr.bf16.mxu1 %v4974_v28  ;;  %v5052_v27 = vld [vmem:[%s7224_s0 + $0x634] ss:$36 sps:$4 sm:$0xff]   ;;  %v5054_v28 = vld [vmem:[%s7224_s0 + $0x404] ss:$36 sps:$4 sm:$0xff]  }
  0x8b   :  { %3016 = vmatprep.mubr.bf16.mxu0 %v4976_v29  ;;  %3262 = vmatpush1.bf16.msra.mxu0 %v4993_v30  ;;  %v5057_v29 = vld [vmem:[%s7224_s0 + $0x400] ss:$36 sps:$4 sm:$0xff]  }
  0x8c   :  { %3263 = vmatprep.subr.bf16.mxu0 %v5354_v0  ;;  %v5059_v30 = vld [vmem:[%s7224_s0 + $0x67c] ss:$36 sps:$4 sm:$0xff]  }
  0x8f   :  { %3264 = vmatpush1.bf16.msra.mxu0 %v5006_v32  ;;  %v5164_v32 = vld [vmem:[%s7223_s1 + $0x1f8] sm:$0xff]  }
  0x90   :  { %3265 = vmatprep.subr.bf16.mxu0 %v5354_v0 }
  0x91   :  { %2503 = vmatmul.mubr.bf16.gmra.mrb[40].mxu1 %v4978_v31  ;;  %v5061_v31 = vld [vmem:[%s7224_s0 + $0x44c] ss:$36 sps:$4 sm:$0xff]  }
  0x92   :  { %3017 = vmatmul.mubr.bf16.gmra.mrb[8].mxu0 %v4979_v33  ;;  %2510 = vmatprep.mubr.bf16.mxu1 %v4981_v34  ;;  %v5063_v33 = vld [vmem:[%s7224_s0 + $0x678] ss:$36 sps:$4 sm:$0xff]   ;;  %v5064_v34 = vld [vmem:[%s7224_s0 + $0x448] ss:$36 sps:$4 sm:$0xff]  }
  0x93   :  { %3024 = vmatprep.mubr.bf16.mxu0 %v4983_v35  ;;  %3266 = vmatpush1.bf16.msra.mxu0 %v5019_v36  ;;  %v5065_v35 = vld [vmem:[%s7224_s0 + $0x6c4] ss:$36 sps:$4 sm:$0xff]   ;;  %v5067_v36 = vld [vmem:[%s7224_s0 + $0x494] ss:$36 sps:$4 sm:$0xff]  }
  0x94   :  { %3267 = vmatprep.subr.bf16.mxu0 %v5354_v0 }
  0x97   :  { %3268 = vmatpush1.bf16.msra.mxu0 %v5032_v38  ;;  %v5070_v38 = vld [vmem:[%s7224_s0 + $0x490] ss:$36 sps:$4 sm:$0xff]  }
  0x98   :  { %3269 = vmatprep.subr.bf16.mxu0 %v5354_v0 }
  0x99   :  { %2511 = vmatmul.mubr.bf16.gmra.mrb[44].mxu1 %v4985_v37  ;;  %v5069_v37 = vld [vmem:[%s7224_s0 + $0x6c0] ss:$36 sps:$4 sm:$0xff]  }
  0x9a   :  { %3025 = vmatmul.mubr.bf16.gmra.mrb[12].mxu0 %v4986_v39  ;;  %2518 = vmatprep.mubr.bf16.mxu1 %v4987_v40  ;;  %v5072_v39 = vld [vmem:[%s7224_s0 + $0x70c] ss:$36 sps:$4 sm:$0xff]   ;;  %v5074_v40 = vld [vmem:[%s7224_s0 + $0x4dc] ss:$36 sps:$4 sm:$0xff]  }
  0x9b   :  { %3032 = vmatprep.mubr.bf16.mxu0 %v4989_v41  ;;  %3270 = vmatpush1.bf16.msra.mxu0 %v5045_v42  ;;  %v5076_v41 = vld [vmem:[%s7224_s0 + $0x708] ss:$36 sps:$4 sm:$0xff]   ;;  %v5077_v42 = vld [vmem:[%s7224_s0 + $0x4d8] ss:$36 sps:$4 sm:$0xff]  }
  0x9c   :  { %3271 = vmatprep.subr.bf16.mxu0 %v5354_v0 }
  0x9f   :  { %3272 = vmatpush1.bf16.msra.mxu0 %v5058_v43  ;;  %v5078_v43 = vld [vmem:[%s7224_s0 + $0x754] ss:$36 sps:$4 sm:$0xff]  }
  0xa0   :  { %3273 = vmatprep.subr.bf16.mxu0 %v5354_v0 }
  0xa1   :  { %2519 = vmatmul.mubr.bf16.gmra.mrb[48].mxu1 %v4991_v44  ;;  %v5080_v44 = vld [vmem:[%s7224_s0 + $0x524] ss:$36 sps:$4 sm:$0xff]  }
  0xa2   :  { %3033 = vmatmul.mubr.bf16.gmra.mrb[16].mxu0 %v4992_v45  ;;  %2526 = vmatprep.mubr.bf16.mxu1 %v4994_v46  ;;  %v5082_v45 = vld [vmem:[%s7224_s0 + $0x750] ss:$36 sps:$4 sm:$0xff]   ;;  %v5083_v46 = vld [vmem:[%s7224_s0 + $0x520] ss:$36 sps:$4 sm:$0xff]  }
  0xa3   :  { %3040 = vmatprep.mubr.bf16.mxu0 %v4996_v47  ;;  %3274 = vmatpush1.bf16.msra.mxu0 %v5071_v48  ;;  %v5085_v47 = vld [vmem:[%s7224_s0 + $0x79c] ss:$36 sps:$4 sm:$0xff]   ;;  %v5087_v48 = vld [vmem:[%s7224_s0 + $0x56c] ss:$36 sps:$4 sm:$0xff]  }
  0xa4   :  { %3275 = vmatprep.subr.bf16.mxu0 %v5354_v0 }
  0xa7   :  { %3276 = vmatpush1.bf16.msra.mxu0 %v5084_v49 }
  0xa8   :  { %3277 = vmatprep.subr.bf16.mxu0 %v5354_v0 }
  0xa9   :  { %2527 = vmatmul.mubr.bf16.gmra.mrb[52].mxu1 %v4998_v50 }
  0xaa   :  { %3041 = vmatmul.mubr.bf16.gmra.mrb[20].mxu0 %v4999_v51  ;;  %2534 = vmatprep.mubr.bf16.mxu1 %v5000_v52  ;;  %v5089_v51 = vld [vmem:[%s7224_s0 + $0x798] ss:$36 sps:$4 sm:$0xff]  }
  0xab   :  { %3048 = vmatprep.mubr.bf16.mxu0 %v5002_v53  ;;  %3278 = vmatpush1.bf16.msra.mxu0 %v5097_v54  ;;  %v5090_v53 = vld [vmem:[%s7224_s0 + $0x568] ss:$36 sps:$4 sm:$0xff]  }
  0xac   :  { %3279 = vmatprep.subr.bf16.mxu0 %v5354_v0  ;;  %v5091_v54 = vld [vmem:[%s7224_s0 + $0x7e4] ss:$36 sps:$4 sm:$0xff]  }
  0xaf   :  { %3280 = vmatpush1.bf16.msra.mxu0 %v5110_v59  ;;  %v5095_v59 = vld [vmem:[%s7224_s0 + $0x7e0] ss:$36 sps:$4 sm:$0xff]  }
  0xb0   :  { %3281 = vmatprep.subr.bf16.mxu0 %v5354_v0 }
  0xb1   :  { %2535 = vmatmul.mubr.bf16.gmra.mrb[56].mxu1 %v5004_v55 }
  0xb2   :  { %3049 = vmatmul.mubr.bf16.gmra.mrb[24].mxu0 %v5005_v56  ;;  %2542 = vmatprep.mubr.bf16.mxu1 %v5007_v57  ;;  %v5093_v56 = vld [vmem:[%s7224_s0 + $0x5b4] ss:$36 sps:$4 sm:$0xff]  }
  0xb3   :  { %3056 = vmatprep.mubr.bf16.mxu0 %v5009_v58  ;;  %3282 = vmatpush1.bf16.msra.mxu0 %v5123_v5 }
  0xb4   :  { %3283 = vmatprep.subr.bf16.mxu0 %v5354_v0 }
  0xb7   :  { %3284 = vmatpush1.bf16.msra.mxu0 %v5137_v15  ;;  %v5109_v15 = vld [vmem:[%s7224_s0 + $0x640] ss:$36 sps:$4 sm:$0xff]  }
  0xb8   :  { %3285 = vmatprep.subr.bf16.mxu0 %v5354_v0 }
  0xb9   :  { %2543 = vmatmul.mubr.bf16.gmra.mrb[60].mxu1 %v5011_v60 }
  0xba   :  { %3057 = vmatmul.mubr.bf16.gmra.mrb[28].mxu0 %v5012_v61  ;;  %2550 = vmatprep.mubr.bf16.mxu1 %v5013_v62  ;;  %v5096_v61 = vld [vmem:[%s7224_s0 + $0x5b0] ss:$36 sps:$4 sm:$0xff]  }
  0xbb   :  { %3064 = vmatprep.mubr.bf16.mxu0 %v5015_v63  ;;  %3286 = vmatpush1.bf16.msra.mxu0 %v5151_v24  ;;  %v5098_v62 = vld [vmem:[%s7224_s0 + $0x82c] ss:$36 sps:$4 sm:$0xff]  }
  0xbc   :  { %3287 = vmatprep.subr.bf16.mxu0 %v5354_v0  ;;  %v5056_v0 = vld [vmem:[%s7224_s0 + $0x630] ss:$36 sps:$4 sm:$0xff]  }
  0xbd   :  { %v5119_v24 = vld [vmem:[%s7224_s0 + $0x24c] ss:$36 sps:$4 sm:$0xff]  }
  0xbf   :  { %3288 = vmatpush1.bf16.msra.mxu0 %v5164_v32  ;;  %v5125_v32 = vld [vmem:[%s7224_s0 + $0x294] ss:$36 sps:$4 sm:$0xff]  }
  0xc1   :  { %2551 = vmatmul.mubr.bf16.gmra.mrb[64].mxu1 %v5017_v1  ;;  %v5100_v1 = vld [vmem:[%s7224_s0 + $0x5fc] ss:$36 sps:$4 sm:$0xff]  }
  0xc2   :  { %3065 = vmatmul.mubr.bf16.gmra.mrb[32].mxu0 %v5018_v2  ;;  %2558 = vmatprep.mubr.bf16.mxu1 %v5020_v3 }
  0xc3   :  { %3072 = vmatprep.mubr.bf16.mxu0 %v5022_v4  ;;  %v5102_v4 = vld [vmem:[%s7224_s0 + $0x828] ss:$36 sps:$4 sm:$0xff]  }
  0xc9   :  { %2559 = vmatmul.mubr.bf16.gmra.mrb[68].mxu1 %v5024_v7  ;;  %v5103_v7 = vld [vmem:[%s7224_s0 + $0x5f8] ss:$36 sps:$4 sm:$0xff]  }
  0xca   :  { %3073 = vmatmul.mubr.bf16.gmra.mrb[36].mxu0 %v5025_v8  ;;  %2566 = vmatprep.mubr.bf16.mxu1 %v5026_v9  ;;  %v5104_v8 = vld [vmem:[%s7224_s0 + $0x874] ss:$36 sps:$4 sm:$0xff]  }
  0xcb   :  { %3080 = vmatprep.mubr.bf16.mxu0 %v5028_v10  ;;  %v5106_v10 = vld [vmem:[%s7224_s0 + $0x644] ss:$36 sps:$4 sm:$0xff]  }
  0xd1   :  { %2567 = vmatmul.mubr.bf16.gmra.mrb[72].mxu1 %v5030_v11 }
  0xd2   :  { %3081 = vmatmul.mubr.bf16.gmra.mrb[40].mxu0 %v5031_v12  ;;  %2574 = vmatprep.mubr.bf16.mxu1 %v5033_v13  ;;  %v5108_v13 = vld [vmem:[%s7224_s0 + $0x870] ss:$36 sps:$4 sm:$0xff]  }
  0xd3   :  { %3088 = vmatprep.mubr.bf16.mxu0 %v5035_v14 }
  0xd9   :  { %2575 = vmatmul.mubr.bf16.gmra.mrb[76].mxu1 %v5037_v16  ;;  %v5111_v16 = vld [vmem:[%s7224_s0 + $0x8bc] ss:$36 sps:$4 sm:$0xff]  }
  0xda   :  { %3089 = vmatmul.mubr.bf16.gmra.mrb[44].mxu0 %v5038_v17  ;;  %2582 = vmatprep.mubr.bf16.mxu1 %v5039_v18  ;;  %v5113_v18 = vld [vmem:[%s7224_s0 + $0x68c] ss:$36 sps:$4 sm:$0xff]  }
  0xdb   :  { %3096 = vmatprep.mubr.bf16.mxu0 %v5041_v19 }
  0xe1   :  { %2583 = vmatmul.mubr.bf16.gmra.mrb[80].mxu1 %v5043_v20 }
  0xe2   :  { %3097 = vmatmul.mubr.bf16.gmra.mrb[48].mxu0 %v5044_v21  ;;  %2590 = vmatprep.mubr.bf16.mxu1 %v5046_v22  ;;  %v5115_v21 = vld [vmem:[%s7224_s0 + $0x8b8] ss:$36 sps:$4 sm:$0xff]  }
  0xe3   :  { %3104 = vmatprep.mubr.bf16.mxu0 %v5048_v23  ;;  %v5116_v23 = vld [vmem:[%s7224_s0 + $0x688] ss:$36 sps:$4 sm:$0xff]  }
  0xe9   :  { %2591 = vmatmul.mubr.bf16.gmra.mrb[84].mxu1 %v5050_v25 }
  0xea   :  { %3105 = vmatmul.mubr.bf16.gmra.mrb[52].mxu0 %v5051_v26  ;;  %2598 = vmatprep.mubr.bf16.mxu1 %v5052_v27  ;;  %v5120_v26 = vld [vmem:[%s7224_s0 + $0x6d4] ss:$36 sps:$4 sm:$0xff]  }
  0xeb   :  { %3112 = vmatprep.mubr.bf16.mxu0 %v5054_v28 }
  0xf1   :  { %2599 = vmatmul.mubr.bf16.gmra.mrb[88].mxu1 %v5056_v0  ;;  %v5117_v0 = vld [vmem:[%s7224_s0 + $0x248] ss:$36 sps:$4 sm:$0xff]  }
  0xf2   :  { %3113 = vmatmul.mubr.bf16.gmra.mrb[56].mxu0 %v5057_v29  ;;  %2606 = vmatprep.mubr.bf16.mxu1 %v5059_v30  ;;  %v5122_v30 = vld [vmem:[%s7224_s0 + $0x6d0] ss:$36 sps:$4 sm:$0xff]  }
  0xf3   :  { %3120 = vmatprep.mubr.bf16.mxu0 %v5061_v31 }
  0xf9   :  { %2607 = vmatmul.mubr.bf16.gmra.mrb[92].mxu1 %v5063_v33  ;;  %v5127_v33 = vld [vmem:[%s7224_s0 + $0x71c] ss:$36 sps:$4 sm:$0xff]  }
  0xfa   :  { %3121 = vmatmul.mubr.bf16.gmra.mrb[60].mxu0 %v5064_v34  ;;  %2614 = vmatprep.mubr.bf16.mxu1 %v5065_v35  ;;  %v5144_v34 = vld [vmem:[%s7223_s1 + $0x208] sm:$0xff]   ;;  %v5165_v35 = vld [vmem:[%s7223_s1 + $0x210] sm:$0xff]  }
  0xfb   :  { %3128 = vmatprep.mubr.bf16.mxu0 %v5067_v36 }
 0x101   :  { %2615 = vmatmul.mubr.bf16.gmra.mrb[96].mxu1 %v5069_v37 }
 0x102   :  { %3129 = vmatmul.mubr.bf16.gmra.mrb[64].mxu0 %v5070_v38  ;;  %2622 = vmatprep.mubr.bf16.mxu1 %v5072_v39  ;;  %v5129_v38 = vld [vmem:[%s7224_s0 + $0x290] ss:$36 sps:$4 sm:$0xff]  }
 0x103   :  { %3136 = vmatprep.mubr.bf16.mxu0 %v5074_v40  ;;  %v5131_v40 = vld [vmem:[%s7224_s0 + $0x2dc] ss:$36 sps:$4 sm:$0xff]  }
 0x109   :  { %2623 = vmatmul.mubr.bf16.gmra.mrb[100].mxu1 %v5076_v41 }
 0x10a   :  { %3137 = vmatmul.mubr.bf16.gmra.mrb[68].mxu0 %v5077_v42  ;;  %2630 = vmatprep.mubr.bf16.mxu1 %v5078_v43  ;;  %v5133_v42 = vld [vmem:[%s7224_s0 + $0x764] ss:$36 sps:$4 sm:$0xff]   ;;  %v5184_v43 = vld [vmem:[%s7223_s1 + $0x218] sm:$0xff]  }
 0x10b   :  { %3144 = vmatprep.mubr.bf16.mxu0 %v5080_v44 }
 0x111   :  { %2631 = vmatmul.mubr.bf16.gmra.mrb[104].mxu1 %v5082_v45  ;;  %v5203_v45 = vld [vmem:[%s7223_s1 + $0x220] sm:$0xff]  }
 0x112   :  { %3145 = vmatmul.mubr.bf16.gmra.mrb[72].mxu0 %v5083_v46  ;;  %2638 = vmatprep.mubr.bf16.mxu1 %v5085_v47  ;;  %v5135_v47 = vld [vmem:[%s7224_s0 + $0x2d8] ss:$36 sps:$4 sm:$0xff]  }
 0x113   :  { %3152 = vmatprep.mubr.bf16.mxu0 %v5087_v48 }
 0x114   :  { %v6047_v49 = vpop.f32.mrb[0].mxu1 }
 0x115   :  { %v2426_v50 = vpop.f32.mrb[1].mxu1 }
 0x116   :  { %v6052_v52 = vpop.f32.mrb[2].mxu1  ;;  %v5136_v50 = vld [vmem:[%s7224_s0 + $0x760] ss:$36 sps:$4 sm:$0xff]  }
 0x117   :  { %v2429_v55 = vpop.f32.mrb[3].mxu1 }
 0x118   :  { %v5222_v55 = vld [vmem:[%s7223_s1 + $0x228] sm:$0xff]  }
 0x119   :  { %2639 = vmatmul.mubr.bf16.gmra.mrb[108].mxu1 %v5089_v51  ;;  %v5138_v51 = vld [vmem:[%s7224_s0 + $0x324] ss:$36 sps:$4 sm:$0xff]  }
 0x11a   :  { %3153 = vmatmul.mubr.bf16.gmra.mrb[76].mxu0 %v5090_v53  ;;  %2646 = vmatprep.mubr.bf16.mxu1 %v5091_v54  ;;  %v5140_v54 = vld [vmem:[%s7224_s0 + $0x7ac] ss:$36 sps:$4 sm:$0xff]  }
 0x11b   :  { %3160 = vmatprep.mubr.bf16.mxu0 %v5093_v56  ;;  %v5241_v56 = vld [vmem:[%s7223_s1 + $0x230] sm:$0xff]  }
 0x11c   :  { %v6063_v57 = vpop.f32.mrb[4].mxu1 }
 0x11d   :  { %v2434_v58 = vpop.f32.mrb[5].mxu1 }
 0x11e   :  { %v6068_v60 = vpop.f32.mrb[6].mxu1  ;;  %v5142_v58 = vld [vmem:[%s7224_s0 + $0x320] ss:$36 sps:$4 sm:$0xff]  }
 0x11f   :  { %v2437_v63 = vpop.f32.mrb[7].mxu1 }
 0x120   :  { %v5149_v63 = vld [vmem:[%s7224_s0 + $0x368] ss:$36 sps:$4 sm:$0xff]  }
 0x121   :  { %2647 = vmatmul.mubr.bf16.gmra.mrb[112].mxu1 %v5095_v59  ;;  %v5143_v59 = vld [vmem:[%s7224_s0 + $0x7a8] ss:$36 sps:$4 sm:$0xff]  }
 0x122   :  { %3161 = vmatmul.mubr.bf16.gmra.mrb[80].mxu0 %v5096_v61  ;;  %2654 = vmatprep.mubr.bf16.mxu1 %v5098_v62  ;;  %v5145_v61 = vld [vmem:[%s7224_s0 + $0x36c] ss:$36 sps:$4 sm:$0xff]   ;;  %v5147_v62 = vld [vmem:[%s7224_s0 + $0x7f4] ss:$36 sps:$4 sm:$0xff]  }
 0x123   :  { %3168 = vmatprep.mubr.bf16.mxu0 %v5100_v1  ;;  %v5150_v1 = vld [vmem:[%s7224_s0 + $0x7f0] ss:$36 sps:$4 sm:$0xff]  }
 0x124   :  { %v6079_v2 = vpop.f32.mrb[8].mxu1 }
 0x125   :  { %v2442_v3 = vpop.f32.mrb[9].mxu1 }
 0x126   :  { %v6084_v5 = vpop.f32.mrb[10].mxu1  ;;  %v5152_v3 = vld [vmem:[%s7224_s0 + $0x3b4] ss:$36 sps:$4 sm:$0xff]  }
 0x127   :  { %v2445_v9 = vpop.f32.mrb[11].mxu1 }
 0x128   :  { %v5158_v9 = vld [vmem:[%s7224_s0 + $0x3fc] ss:$36 sps:$4 sm:$0xff]  }
 0x129   :  { %2655 = vmatmul.mubr.bf16.gmra.mrb[116].mxu1 %v5102_v4  ;;  %v5154_v4 = vld [vmem:[%s7224_s0 + $0x83c] ss:$36 sps:$4 sm:$0xff]  }
 0x12a   :  { %3169 = vmatmul.mubr.bf16.gmra.mrb[84].mxu0 %v5103_v7  ;;  %2662 = vmatprep.mubr.bf16.mxu1 %v5104_v8  ;;  %v5156_v7 = vld [vmem:[%s7224_s0 + $0x3b0] ss:$36 sps:$4 sm:$0xff]   ;;  %v5157_v8 = vld [vmem:[%s7224_s0 + $0x838] ss:$36 sps:$4 sm:$0xff]  }
 0x12b   :  { %3176 = vmatprep.mubr.bf16.mxu0 %v5106_v10  ;;  %v5160_v10 = vld [vmem:[%s7224_s0 + $0x884] ss:$36 sps:$4 sm:$0xff]  }
 0x12c   :  { %v6095_v11 = vpop.f32.mrb[12].mxu1 }
 0x12d   :  { %v2450_v12 = vpop.f32.mrb[13].mxu1 }
 0x12e   :  { %v6100_v14 = vpop.f32.mrb[14].mxu1  ;;  %v5260_v12 = vld [vmem:[%s7223_s1 + $0x238] sm:$0xff]  }
 0x12f   :  { %v2453_v17 = vpop.f32.mrb[15].mxu1 }
 0x130   :  { %v5168_v17 = vld [vmem:[%s7224_s0 + $0x8cc] ss:$36 sps:$4 sm:$0xff]  }
 0x131   :  { %2663 = vmatmul.mubr.bf16.gmra.mrb[120].mxu1 %v5108_v13  ;;  %v5162_v13 = vld [vmem:[%s7224_s0 + $0x3f8] ss:$36 sps:$4 sm:$0xff]  }
 0x132   :  { %3177 = vmatmul.mubr.bf16.gmra.mrb[88].mxu0 %v5109_v15  ;;  %2670 = vmatprep.mubr.bf16.mxu1 %v5111_v16  ;;  %v5163_v15 = vld [vmem:[%s7224_s0 + $0x880] ss:$36 sps:$4 sm:$0xff]  }
 0x133   :  { %3184 = vmatprep.mubr.bf16.mxu0 %v5113_v18  ;;  %v5166_v16 = vld [vmem:[%s7224_s0 + $0x444] ss:$36 sps:$4 sm:$0xff]  }
 0x134   :  { %v6111_v19 = vpop.f32.mrb[16].mxu1  ;;  %v5170_v18 = vld [vmem:[%s7224_s0 + $0x440] ss:$36 sps:$4 sm:$0xff]  }
 0x135   :  { %v2458_v20 = vpop.f32.mrb[17].mxu1 }
 0x136   :  { %v6116_v22 = vpop.f32.mrb[18].mxu1  ;;  %v5171_v20 = vld [vmem:[%s7224_s0 + $0x8c8] ss:$36 sps:$4 sm:$0xff]  }
 0x137   :  { %v2461_v25 = vpop.f32.mrb[19].mxu1 }
 0x138   :  { %v5174_v25 = vld [vmem:[%s7224_s0 + $0x18] ss:$36 sps:$4 sm:$0xff]  }
 0x139   :  { %2671 = vmatmul.mubr.bf16.gmra.mrb[124].mxu1 %v5115_v21  ;;  %v5172_v21 = vld [vmem:[%s7224_s0 + $0x48c] ss:$36 sps:$4 sm:$0xff]  }
 0x13a   :  { %3185 = vmatmul.mubr.bf16.gmra.mrb[92].mxu0 %v5116_v23  ;;  %2775 = vmatprep.mubr.bf16.mxu1 %v5119_v24  ;;  %v5176_v23 = vld [vmem:[%s7224_s0 + $0x1c] ss:$36 sps:$4 sm:$0xff]   ;;  %v5177_v24 = vld [vmem:[%s7224_s0 + $0x488] ss:$36 sps:$4 sm:$0xff]  }
 0x13b   :  { %3192 = vmatprep.mubr.bf16.mxu0 %v5120_v26  ;;  %v5178_v26 = vld [vmem:[%s7224_s0 + $0x4d4] ss:$36 sps:$4 sm:$0xff]  }
 0x13c   :  { %v6127_v27 = vpop.f32.mrb[20].mxu1 }
 0x13d   :  { %v2466_v28 = vpop.f32.mrb[21].mxu1 }
 0x13e   :  { %v6132_v29 = vpop.f32.mrb[22].mxu1  ;;  %v5180_v28 = vld [vmem:[%s7224_s0 + $0x64] ss:$36 sps:$4 sm:$0xff]  }
 0x13f   :  { %v2469_v31 = vpop.f32.mrb[23].mxu1 }
 0x140   :  { %v5185_v31 = vld [vmem:[%s7224_s0 + $0x51c] ss:$36 sps:$4 sm:$0xff]  }
 0x141   :  { %2776 = vmatmul.mubr.bf16.vlgmr.msra.gmra.mrb[32].mxu1 %v5117_v0  ;;  %v5182_v0 = vld [vmem:[%s7224_s0 + $0x4d0] ss:$36 sps:$4 sm:$0xff]  }
 0x142   :  { %3193 = vmatmul.mubr.bf16.gmra.mrb[96].mxu0 %v5122_v30  ;;  %4369 = vmatpush3.bf16.msra.mxu1 %v5912_v6  ;;  %v5130_v6 = vld [vmem:[%s7224_s0 + $0x718] ss:$36 sps:$4 sm:$0xff]   ;;  %v5183_v30 = vld [vmem:[%s7224_s0 + $0x60] ss:$36 sps:$4 sm:$0xff]  }
 0x143   :  { %2783 = vmatprep.mubr.bf16.mxu1 %v5125_v32  ;;  %3200 = vmatprep.mubr.bf16.mxu0 %v5127_v33  ;;  %v5187_v32 = vld [vmem:[%s7224_s0 + $0xac] ss:$36 sps:$4 sm:$0xff]   ;;  %v5189_v33 = vld [vmem:[%s7224_s0 + $0x518] ss:$36 sps:$4 sm:$0xff]  }
 0x144   :  { %v6150_v36 = vpop.f32.mrb[24].mxu1  ;;  %4370 = vmatprep.subr.bf16.mxu1 %v5144_v34 }
 0x145   :  { %v2474_v37 = vpop.f32.mrb[25].mxu1 }
 0x146   :  { %v6155_v39 = vpop.f32.mrb[26].mxu1  ;;  %4371 = vmatpush3.bf16.msra.mxu1 %v5144_v34  ;;  %v5190_v34 = vld [vmem:[%s7224_s0 + $0xa8] ss:$36 sps:$4 sm:$0xff]   ;;  %v5193_v37 = vld [vmem:[%s7224_s0 + $0xf4] ss:$36 sps:$4 sm:$0xff]  }
 0x147   :  { %v2477_v41 = vpop.f32.mrb[27].mxu1  ;;  %4372 = vmatprep.subr.bf16.mxu1 %v5165_v35 }
 0x148   :  { %v5199_v41 = vld [vmem:[%s7224_s0 + $0x13c] ss:$36 sps:$4 sm:$0xff]  }
 0x149   :  { %2784 = vmatmul.mubr.bf16.gmra.mrb[36].mxu1 %v5129_v38  ;;  %v5195_v38 = vld [vmem:[%s7224_s0 + $0x560] ss:$36 sps:$4 sm:$0xff]  }
 0x14a   :  { %3201 = vmatmul.mubr.bf16.gmra.mrb[100].mxu0 %v5130_v6  ;;  %2791 = vmatprep.mubr.bf16.mxu1 %v5131_v40  ;;  %v5196_v6 = vld [vmem:[%s7224_s0 + $0xf0] ss:$36 sps:$4 sm:$0xff]  }
 0x14b   :  { %3208 = vmatprep.mubr.bf16.mxu0 %v5133_v42  ;;  %4373 = vmatpush3.bf16.msra.mxu1 %v5165_v35  ;;  %v5191_v35 = vld [vmem:[%s7224_s0 + $0x564] ss:$36 sps:$4 sm:$0xff]   ;;  %v5197_v40 = vld [vmem:[%s7224_s0 + $0x5ac] ss:$36 sps:$4 sm:$0xff]  }
 0x14c   :  { %v6169_v44 = vpop.f32.mrb[28].mxu1  ;;  %4374 = vmatprep.subr.bf16.mxu1 %v5184_v43  ;;  %v5201_v42 = vld [vmem:[%s7224_s0 + $0x5a8] ss:$36 sps:$4 sm:$0xff]  }
 0x14d   :  { %v2482_v46 = vpop.f32.mrb[29].mxu1 }
 0x14e   :  { %v6177_v48 = vpop.f32.mrb[30].mxu1  ;;  %v5206_v46 = vld [vmem:[%s7224_s0 + $0x184] ss:$36 sps:$4 sm:$0xff]  }
 0x14f   :  { %v2485_v53 = vpop.f32.mrb[31].mxu1  ;;  %4375 = vmatpush3.bf16.msra.mxu1 %v5184_v43  ;;  %v5202_v43 = vld [vmem:[%s7224_s0 + $0x138] ss:$36 sps:$4 sm:$0xff]  }
 0x150   :  { %4376 = vmatprep.subr.bf16.mxu1 %v5203_v45  ;;  %v5212_v53 = vld [vmem:[%s7224_s0 + $0x1cc] ss:$36 sps:$4 sm:$0xff]  }
 0x151   :  { %2792 = vmatmul.mubr.bf16.gmra.mrb[40].mxu1 %v5135_v47  ;;  %v5208_v47 = vld [vmem:[%s7224_s0 + $0x5f0] ss:$36 sps:$4 sm:$0xff]  }
 0x152   :  { %3209 = vmatmul.mubr.bf16.gmra.mrb[104].mxu0 %v5136_v50  ;;  %2799 = vmatprep.mubr.bf16.mxu1 %v5138_v51  ;;  %v5209_v50 = vld [vmem:[%s7224_s0 + $0x180] ss:$36 sps:$4 sm:$0xff]  }
 0x153   :  { %3216 = vmatprep.mubr.bf16.mxu0 %v5140_v54  ;;  %4377 = vmatpush3.bf16.msra.mxu1 %v5203_v45  ;;  %v5204_v45 = vld [vmem:[%s7224_s0 + $0x5f4] ss:$36 sps:$4 sm:$0xff]   ;;  %v5210_v51 = vld [vmem:[%s7224_s0 + $0x63c] ss:$36 sps:$4 sm:$0xff]  }
 0x154   :  { %4378 = vmatprep.subr.bf16.mxu1 %v5222_v55  ;;  %v5214_v54 = vld [vmem:[%s7224_s0 + $0x638] ss:$36 sps:$4 sm:$0xff]  }
 0x157   :  { %4379 = vmatpush3.bf16.msra.mxu1 %v5222_v55  ;;  %v5215_v55 = vld [vmem:[%s7224_s0 + $0x1c8] ss:$36 sps:$4 sm:$0xff]  }
 0x158   :  { %4380 = vmatprep.subr.bf16.mxu1 %v5241_v56 }
 0x159   :  { %2800 = vmatmul.mubr.bf16.gmra.mrb[44].mxu1 %v5142_v58  ;;  %v5218_v58 = vld [vmem:[%s7224_s0 + $0x214] ss:$36 sps:$4 sm:$0xff]  }
 0x15a   :  { %3217 = vmatmul.mubr.bf16.gmra.mrb[108].mxu0 %v5143_v59  ;;  %2807 = vmatprep.mubr.bf16.mxu1 %v5145_v61  ;;  %v5220_v59 = vld [vmem:[%s7224_s0 + $0x680] ss:$36 sps:$4 sm:$0xff]   ;;  %v5221_v61 = vld [vmem:[%s7224_s0 + $0x210] ss:$36 sps:$4 sm:$0xff]  }
 0x15b   :  { %3224 = vmatprep.mubr.bf16.mxu0 %v5147_v62  ;;  %4381 = vmatpush3.bf16.msra.mxu1 %v5241_v56  ;;  %v5216_v56 = vld [vmem:[%s7224_s0 + $0x684] ss:$36 sps:$4 sm:$0xff]   ;;  %v5223_v62 = vld [vmem:[%s7224_s0 + $0x6cc] ss:$36 sps:$4 sm:$0xff]  }
 0x15c   :  { %4382 = vmatprep.subr.bf16.mxu1 %v5260_v12 }
 0x15f   :  { %4383 = vmatpush3.bf16.msra.mxu1 %v5260_v12  ;;  %v5237_v12 = vld [vmem:[%s7224_s0 + $0x2ec] ss:$36 sps:$4 sm:$0xff]  }
 0x161   :  { %2808 = vmatmul.mubr.bf16.gmra.mrb[48].mxu1 %v5149_v63  ;;  %v5225_v63 = vld [vmem:[%s7224_s0 + $0x25c] ss:$36 sps:$4 sm:$0xff]  }
 0x162   :  { %3225 = vmatmul.mubr.bf16.gmra.mrb[112].mxu0 %v5150_v1  ;;  %2815 = vmatprep.mubr.bf16.mxu1 %v5152_v3  ;;  %v5227_v1 = vld [vmem:[%s7224_s0 + $0x6c8] ss:$36 sps:$4 sm:$0xff]   ;;  %v5228_v3 = vld [vmem:[%s7224_s0 + $0x258] ss:$36 sps:$4 sm:$0xff]  }
 0x163   :  { %3232 = vmatprep.mubr.bf16.mxu0 %v5154_v4  ;;  %v5229_v4 = vld [vmem:[%s7224_s0 + $0x714] ss:$36 sps:$4 sm:$0xff]  }
 0x169   :  { %2816 = vmatmul.mubr.bf16.gmra.mrb[52].mxu1 %v5156_v7  ;;  %v5231_v7 = vld [vmem:[%s7224_s0 + $0x2a4] ss:$36 sps:$4 sm:$0xff]  }
 0x16a   :  { %3233 = vmatmul.mubr.bf16.gmra.mrb[116].mxu0 %v5157_v8  ;;  %2823 = vmatprep.mubr.bf16.mxu1 %v5158_v9  ;;  %v5233_v8 = vld [vmem:[%s7224_s0 + $0x710] ss:$36 sps:$4 sm:$0xff]   ;;  %v5234_v9 = vld [vmem:[%s7224_s0 + $0x2a0] ss:$36 sps:$4 sm:$0xff]  }
 0x16b   :  { %3240 = vmatprep.mubr.bf16.mxu0 %v5160_v10  ;;  %v5235_v10 = vld [vmem:[%s7224_s0 + $0x75c] ss:$36 sps:$4 sm:$0xff]  }
 0x171   :  { %2824 = vmatmul.mubr.bf16.gmra.mrb[56].mxu1 %v5162_v13  ;;  %v5239_v13 = vld [vmem:[%s7224_s0 + $0x758] ss:$36 sps:$4 sm:$0xff]  }
 0x172   :  { %3241 = vmatmul.mubr.bf16.gmra.mrb[120].mxu0 %v5163_v15  ;;  %2831 = vmatprep.mubr.bf16.mxu1 %v5166_v16  ;;  %v5240_v15 = vld [vmem:[%s7224_s0 + $0x2e8] ss:$36 sps:$4 sm:$0xff]  }
 0x173   :  { %3248 = vmatprep.mubr.bf16.mxu0 %v5168_v17  ;;  %v5242_v16 = vld [vmem:[%s7224_s0 + $0x7a4] ss:$36 sps:$4 sm:$0xff]   ;;  %v5244_v17 = vld [vmem:[%s7224_s0 + $0x334] ss:$36 sps:$4 sm:$0xff]  }
 0x179   :  { %2832 = vmatmul.mubr.bf16.gmra.mrb[60].mxu1 %v5170_v18  ;;  %v5246_v18 = vld [vmem:[%s7224_s0 + $0x7a0] ss:$36 sps:$4 sm:$0xff]  }
 0x17a   :  { %3249 = vmatmul.mubr.bf16.gmra.mrb[124].mxu0 %v5171_v20  ;;  %2839 = vmatprep.mubr.bf16.mxu1 %v5172_v21  ;;  %v5247_v20 = vld [vmem:[%s7224_s0 + $0x330] ss:$36 sps:$4 sm:$0xff]  }
 0x17b   :  { %3289 = vmatprep.mubr.bf16.mxu0 %v5176_v23  ;;  %v5248_v21 = vld [vmem:[%s7224_s0 + $0x7ec] ss:$36 sps:$4 sm:$0xff]   ;;  %v5250_v23 = vld [vmem:[%s7224_s0 + $0x37c] ss:$36 sps:$4 sm:$0xff]  }
 0x181   :  { %2840 = vmatmul.mubr.bf16.gmra.mrb[64].mxu1 %v5177_v24  ;;  %v5252_v24 = vld [vmem:[%s7224_s0 + $0x7e8] ss:$36 sps:$4 sm:$0xff]  }
 0x182   :  { %3290 = vmatmul.mubr.bf16.vlgmr.msra.gmra.mrb[0].mxu0 %v5174_v25  ;;  %2847 = vmatprep.mubr.bf16.mxu1 %v5178_v26  ;;  %v5253_v25 = vld [vmem:[%s7224_s0 + $0x378] ss:$36 sps:$4 sm:$0xff]  }
 0x183   :  { %3297 = vmatprep.mubr.bf16.mxu0 %v5180_v28  ;;  %v5254_v26 = vld [vmem:[%s7224_s0 + $0x834] ss:$36 sps:$4 sm:$0xff]   ;;  %v5256_v28 = vld [vmem:[%s7224_s0 + $0x3c4] ss:$36 sps:$4 sm:$0xff]  }
 0x189   :  { %2848 = vmatmul.mubr.bf16.gmra.mrb[68].mxu1 %v5182_v0  ;;  %v5258_v0 = vld [vmem:[%s7224_s0 + $0x830] ss:$36 sps:$4 sm:$0xff]  }
 0x18a   :  { %3298 = vmatmul.mubr.bf16.gmra.mrb[4].mxu0 %v5183_v30  ;;  %2855 = vmatprep.mubr.bf16.mxu1 %v5185_v31  ;;  %v5259_v30 = vld [vmem:[%s7224_s0 + $0x3c0] ss:$36 sps:$4 sm:$0xff]  }
 0x18b   :  { %3305 = vmatprep.mubr.bf16.mxu0 %v5187_v32  ;;  %v5261_v31 = vld [vmem:[%s7224_s0 + $0x87c] ss:$36 sps:$4 sm:$0xff]   ;;  %v5263_v32 = vld [vmem:[%s7224_s0 + $0x40c] ss:$36 sps:$4 sm:$0xff]  }
 0x191   :  { %2856 = vmatmul.mubr.bf16.gmra.mrb[72].mxu1 %v5189_v33  ;;  %v5265_v33 = vld [vmem:[%s7224_s0 + $0x878] ss:$36 sps:$4 sm:$0xff]  }
 0x192   :  { %3306 = vmatmul.mubr.bf16.gmra.mrb[8].mxu0 %v5190_v34  ;;  %2863 = vmatprep.mubr.bf16.mxu1 %v5191_v35  ;;  %v5266_v34 = vld [vmem:[%s7224_s0 + $0x408] ss:$36 sps:$4 sm:$0xff]  }
 0x193   :  { %3313 = vmatprep.mubr.bf16.mxu0 %v5193_v37  ;;  %v5267_v35 = vld [vmem:[%s7224_s0 + $0x8c4] ss:$36 sps:$4 sm:$0xff]   ;;  %v5269_v37 = vld [vmem:[%s7224_s0 + $0x454] ss:$36 sps:$4 sm:$0xff]  }
 0x199   :  { %2864 = vmatmul.mubr.bf16.gmra.mrb[76].mxu1 %v5195_v38  ;;  %v5271_v38 = vld [vmem:[%s7224_s0 + $0x8c0] ss:$36 sps:$4 sm:$0xff]  }
 0x19a   :  { %3314 = vmatmul.mubr.bf16.gmra.mrb[12].mxu0 %v5196_v6  ;;  %2871 = vmatprep.mubr.bf16.mxu1 %v5197_v40  ;;  %v5272_v6 = vld [vmem:[%s7224_s0 + $0x450] ss:$36 sps:$4 sm:$0xff]   ;;  %v5275_v40 = vld [vmem:[%s7224_s0 + $0x20] ss:$36 sps:$4 sm:$0xff]  }
 0x19b   :  { %3321 = vmatprep.mubr.bf16.mxu0 %v5199_v41  ;;  %v5273_v41 = vld [vmem:[%s7224_s0 + $0x49c] ss:$36 sps:$4 sm:$0xff]  }
 0x1a1   :  { %2872 = vmatmul.mubr.bf16.gmra.mrb[80].mxu1 %v5201_v42  ;;  %v5277_v42 = vld [vmem:[%s7224_s0 + $0x68] ss:$36 sps:$4 sm:$0xff]  }
 0x1a2   :  { %3322 = vmatmul.mubr.bf16.gmra.mrb[16].mxu0 %v5202_v43  ;;  %2879 = vmatprep.mubr.bf16.mxu1 %v5204_v45  ;;  %v5276_v43 = vld [vmem:[%s7224_s0 + $0x498] ss:$36 sps:$4 sm:$0xff]   ;;  %v5280_v45 = vld [vmem:[%s7224_s0 + $0xb0] ss:$36 sps:$4 sm:$0xff]  }
 0x1a3   :  { %3329 = vmatprep.mubr.bf16.mxu0 %v5206_v46  ;;  %v5278_v46 = vld [vmem:[%s7224_s0 + $0x4e4] ss:$36 sps:$4 sm:$0xff]  }
 0x1a9   :  { %2880 = vmatmul.mubr.bf16.gmra.mrb[84].mxu1 %v5208_v47  ;;  %v5282_v47 = vld [vmem:[%s7224_s0 + $0xf8] ss:$36 sps:$4 sm:$0xff]  }
 0x1aa   :  { %3330 = vmatmul.mubr.bf16.gmra.mrb[20].mxu0 %v5209_v50  ;;  %2887 = vmatprep.mubr.bf16.mxu1 %v5210_v51  ;;  %v5281_v50 = vld [vmem:[%s7224_s0 + $0x4e0] ss:$36 sps:$4 sm:$0xff]  }
 0x1ab   :  { %3337 = vmatprep.mubr.bf16.mxu0 %v5212_v53  ;;  %v5285_v51 = vld [vmem:[%s7224_s0 + $0x140] ss:$36 sps:$4 sm:$0xff]   ;;  %v5283_v53 = vld [vmem:[%s7224_s0 + $0x52c] ss:$36 sps:$4 sm:$0xff]  }
 0x1b1   :  { %2888 = vmatmul.mubr.bf16.gmra.mrb[88].mxu1 %v5214_v54  ;;  %v5287_v54 = vld [vmem:[%s7224_s0 + $0x188] ss:$36 sps:$4 sm:$0xff]  }
 0x1b2   :  { %3338 = vmatmul.mubr.bf16.gmra.mrb[24].mxu0 %v5215_v55  ;;  %2895 = vmatprep.mubr.bf16.mxu1 %v5216_v56  ;;  %v5286_v55 = vld [vmem:[%s7224_s0 + $0x528] ss:$36 sps:$4 sm:$0xff]   ;;  %v5290_v56 = vld [vmem:[%s7224_s0 + $0x1d0] ss:$36 sps:$4 sm:$0xff]  }
 0x1b3   :  { %3345 = vmatprep.mubr.bf16.mxu0 %v5218_v58  ;;  %v5288_v58 = vld [vmem:[%s7224_s0 + $0x574] ss:$36 sps:$4 sm:$0xff]  }
 0x1b9   :  { %2896 = vmatmul.mubr.bf16.gmra.mrb[92].mxu1 %v5220_v59 }
 0x1ba   :  { %3346 = vmatmul.mubr.bf16.gmra.mrb[28].mxu0 %v5221_v61  ;;  %2903 = vmatprep.mubr.bf16.mxu1 %v5223_v62  ;;  %v5292_v62 = vld [vmem:[%s7224_s0 + $0x218] ss:$36 sps:$4 sm:$0xff]  }
 0x1bb   :  { %3353 = vmatprep.mubr.bf16.mxu0 %v5225_v63 }
 0x1c1   :  { %2904 = vmatmul.mubr.bf16.gmra.mrb[96].mxu1 %v5227_v1  ;;  %v5291_v1 = vld [vmem:[%s7224_s0 + $0x570] ss:$36 sps:$4 sm:$0xff]  }
 0x1c2   :  { %3354 = vmatmul.mubr.bf16.gmra.mrb[32].mxu0 %v5228_v3  ;;  %2911 = vmatprep.mubr.bf16.mxu1 %v5229_v4  ;;  %v5295_v3 = vld [vmem:[%s7224_s0 + $0x260] ss:$36 sps:$4 sm:$0xff]  }
 0x1c3   :  { %3361 = vmatprep.mubr.bf16.mxu0 %v5231_v7  ;;  %v5293_v7 = vld [vmem:[%s7224_s0 + $0x5bc] ss:$36 sps:$4 sm:$0xff]  }
 0x1c9   :  { %2912 = vmatmul.mubr.bf16.gmra.mrb[100].mxu1 %v5233_v8 }
 0x1ca   :  { %3362 = vmatmul.mubr.bf16.gmra.mrb[36].mxu0 %v5234_v9  ;;  %2919 = vmatprep.mubr.bf16.mxu1 %v5235_v10  ;;  %v5297_v10 = vld [vmem:[%s7224_s0 + $0x2a8] ss:$36 sps:$4 sm:$0xff]  }
 0x1cb   :  { %3369 = vmatprep.mubr.bf16.mxu0 %v5237_v12 }
 0x1d1   :  { %2920 = vmatmul.mubr.bf16.gmra.mrb[104].mxu1 %v5239_v13  ;;  %v5296_v13 = vld [vmem:[%s7224_s0 + $0x5b8] ss:$36 sps:$4 sm:$0xff]  }
 0x1d2   :  { %3370 = vmatmul.mubr.bf16.gmra.mrb[40].mxu0 %v5240_v15  ;;  %2927 = vmatprep.mubr.bf16.mxu1 %v5242_v16  ;;  %v5300_v15 = vld [vmem:[%s7224_s0 + $0x2f0] ss:$36 sps:$4 sm:$0xff]  }
 0x1d3   :  { %3377 = vmatprep.mubr.bf16.mxu0 %v5244_v17  ;;  %v5298_v17 = vld [vmem:[%s7224_s0 + $0x604] ss:$36 sps:$4 sm:$0xff]  }
 0x1d9   :  { %2928 = vmatmul.mubr.bf16.gmra.mrb[108].mxu1 %v5246_v18 }
 0x1da   :  { %3378 = vmatmul.mubr.bf16.gmra.mrb[44].mxu0 %v5247_v20  ;;  %2935 = vmatprep.mubr.bf16.mxu1 %v5248_v21  ;;  %v5302_v21 = vld [vmem:[%s7224_s0 + $0x338] ss:$36 sps:$4 sm:$0xff]  }
 0x1db   :  { %3385 = vmatprep.mubr.bf16.mxu0 %v5250_v23 }
 0x1e1   :  { %2936 = vmatmul.mubr.bf16.gmra.mrb[112].mxu1 %v5252_v24  ;;  %v5301_v24 = vld [vmem:[%s7224_s0 + $0x600] ss:$36 sps:$4 sm:$0xff]  }
 0x1e2   :  { %3386 = vmatmul.mubr.bf16.gmra.mrb[48].mxu0 %v5253_v25  ;;  %2943 = vmatprep.mubr.bf16.mxu1 %v5254_v26  ;;  %v5305_v25 = vld [vmem:[%s7224_s0 + $0x380] ss:$36 sps:$4 sm:$0xff]  }
 0x1e3   :  { %3393 = vmatprep.mubr.bf16.mxu0 %v5256_v28  ;;  %v5303_v28 = vld [vmem:[%s7224_s0 + $0x64c] ss:$36 sps:$4 sm:$0xff]  }
 0x1e9   :  { %2944 = vmatmul.mubr.bf16.gmra.mrb[116].mxu1 %v5258_v0 }
 0x1ea   :  { %3394 = vmatmul.mubr.bf16.gmra.mrb[52].mxu0 %v5259_v30  ;;  %2951 = vmatprep.mubr.bf16.mxu1 %v5261_v31  ;;  %v5307_v31 = vld [vmem:[%s7224_s0 + $0x3c8] ss:$36 sps:$4 sm:$0xff]  }
 0x1eb   :  { %3401 = vmatprep.mubr.bf16.mxu0 %v5263_v32 }
 0x1f1   :  { %2952 = vmatmul.mubr.bf16.gmra.mrb[120].mxu1 %v5265_v33  ;;  %v5306_v33 = vld [vmem:[%s7224_s0 + $0x648] ss:$36 sps:$4 sm:$0xff]  }
 0x1f2   :  { %3402 = vmatmul.mubr.bf16.gmra.mrb[56].mxu0 %v5266_v34  ;;  %2959 = vmatprep.mubr.bf16.mxu1 %v5267_v35  ;;  %v5310_v34 = vld [vmem:[%s7224_s0 + $0x410] ss:$36 sps:$4 sm:$0xff]  }
 0x1f3   :  { %3409 = vmatprep.mubr.bf16.mxu0 %v5269_v37  ;;  %v5308_v37 = vld [vmem:[%s7224_s0 + $0x694] ss:$36 sps:$4 sm:$0xff]  }
 0x1f9   :  { %2960 = vmatmul.mubr.bf16.gmra.mrb[124].mxu1 %v5271_v38 }
 0x1fa   :  { %3410 = vmatmul.mubr.bf16.gmra.mrb[60].mxu0 %v5272_v6  ;;  %4384 = vmatprep.mubr.bf16.mxu1 %v5275_v40  ;;  %v5312_v40 = vld [vmem:[%s7224_s0 + $0x458] ss:$36 sps:$4 sm:$0xff]  }
 0x1fb   :  { %3417 = vmatprep.mubr.bf16.mxu0 %v5273_v41 }
 0x201   :  { %4385 = vmatmul.mubr.bf16.vlgmr.msra.gmra.mrb[128].mxu1 %v5277_v42  ;;  %v5311_v42 = vld [vmem:[%s7224_s0 + $0x690] ss:$36 sps:$4 sm:$0xff]  }
 0x202   :  { %3418 = vmatmul.mubr.bf16.gmra.mrb[64].mxu0 %v5276_v43  ;;  %4388 = vmatprep.mubr.bf16.mxu1 %v5280_v45  ;;  %v5315_v43 = vld [vmem:[%s7224_s0 + $0x4a0] ss:$36 sps:$4 sm:$0xff]  }
 0x203   :  { %3425 = vmatprep.mubr.bf16.mxu0 %v5278_v46  ;;  %v5313_v46 = vld [vmem:[%s7224_s0 + $0x6dc] ss:$36 sps:$4 sm:$0xff]  }
 0x209   :  { %4389 = vmatmul.mubr.bf16.gmra.mrb[132].mxu1 %v5282_v47 }
 0x20a   :  { %3426 = vmatmul.mubr.bf16.gmra.mrb[68].mxu0 %v5281_v50  ;;  %4392 = vmatprep.mubr.bf16.mxu1 %v5285_v51  ;;  %v5317_v51 = vld [vmem:[%s7224_s0 + $0x4e8] ss:$36 sps:$4 sm:$0xff]  }
 0x20b   :  { %3433 = vmatprep.mubr.bf16.mxu0 %v5283_v53 }
 0x211   :  { %4393 = vmatmul.mubr.bf16.gmra.mrb[136].mxu1 %v5287_v54  ;;  %v5316_v54 = vld [vmem:[%s7224_s0 + $0x6d8] ss:$36 sps:$4 sm:$0xff]  }
 0x212   :  { %3434 = vmatmul.mubr.bf16.gmra.mrb[72].mxu0 %v5286_v55  ;;  %4396 = vmatprep.mubr.bf16.mxu1 %v5290_v56  ;;  %v5320_v55 = vld [vmem:[%s7224_s0 + $0x530] ss:$36 sps:$4 sm:$0xff]  }
 0x213   :  { %3441 = vmatprep.mubr.bf16.mxu0 %v5288_v58  ;;  %v5318_v58 = vld [vmem:[%s7224_s0 + $0x724] ss:$36 sps:$4 sm:$0xff]  }
 0x214   :  { %v6485_v59 = vpop.f32.mrb[32].mxu1 }
 0x215   :  { %v2779_v61 = vpop.f32.mrb[33].mxu1 }
 0x216   :  { %v6490_v63 = vpop.f32.mrb[34].mxu1 }
 0x217   :  { %v2782_v4 = vpop.f32.mrb[35].mxu1 }
 0x218   :  { %v5321_v4 = vld [vmem:[%s7224_s0 + $0x720] ss:$36 sps:$4 sm:$0xff]  }
 0x219   :  { %4397 = vmatmul.mubr.bf16.gmra.mrb[140].mxu1 %v5292_v62 }
 0x21a   :  { %3442 = vmatmul.mubr.bf16.gmra.mrb[76].mxu0 %v5291_v1  ;;  %4400 = vmatprep.mubr.bf16.mxu1 %v5295_v3  ;;  %v5322_v1 = vld [vmem:[%s7224_s0 + $0x578] ss:$36 sps:$4 sm:$0xff]  }
 0x21b   :  { %3449 = vmatprep.mubr.bf16.mxu0 %v5293_v7  ;;  %v5325_v7 = vld [vmem:[%s7224_s0 + $0x5c0] ss:$36 sps:$4 sm:$0xff]  }
 0x21c   :  { %v6501_v8 = vpop.f32.mrb[36].mxu1 }
 0x21d   :  { %v2787_v9 = vpop.f32.mrb[37].mxu1 }
 0x21e   :  { %v6506_v12 = vpop.f32.mrb[38].mxu1 }
 0x21f   :  { %v2790_v16 = vpop.f32.mrb[39].mxu1 }
 0x220   :  { %v5327_v16 = vld [vmem:[%s7224_s0 + $0x608] ss:$36 sps:$4 sm:$0xff]  }
 0x221   :  { %4401 = vmatmul.mubr.bf16.gmra.mrb[144].mxu1 %v5297_v10  ;;  %v5323_v10 = vld [vmem:[%s7224_s0 + $0x76c] ss:$36 sps:$4 sm:$0xff]  }
 0x222   :  { %3450 = vmatmul.mubr.bf16.gmra.mrb[80].mxu0 %v5296_v13  ;;  %4404 = vmatprep.mubr.bf16.mxu1 %v5300_v15 }
 0x223   :  { %3457 = vmatprep.mubr.bf16.mxu0 %v5298_v17 }
 0x224   :  { %v6517_v18 = vpop.f32.mrb[40].mxu1 }
 0x225   :  { %v2795_v20 = vpop.f32.mrb[41].mxu1 }
 0x226   :  { %v6522_v23 = vpop.f32.mrb[42].mxu1  ;;  %v5326_v20 = vld [vmem:[%s7224_s0 + $0x768] ss:$36 sps:$4 sm:$0xff]  }
 0x227   :  { %v2798_v26 = vpop.f32.mrb[43].mxu1 }
 0x228   :  { %v6616_v26 = vld [vmem:[%s7225_s2] ss:$0 sm:$0xff] }
 0x229   :  { %4405 = vmatmul.mubr.bf16.gmra.mrb[148].mxu1 %v5302_v21  ;;  %v5330_v21 = vld [vmem:[%s7224_s0 + $0x650] ss:$36 sps:$4 sm:$0xff]  }
 0x22a   :  { %3458 = vmatmul.mubr.bf16.gmra.mrb[84].mxu0 %v5301_v24  ;;  %4408 = vmatprep.mubr.bf16.mxu1 %v5305_v25  ;;  %v5328_v25 = vld [vmem:[%s7224_s0 + $0x7b4] ss:$36 sps:$4 sm:$0xff]  }
 0x22b   :  { %3465 = vmatprep.mubr.bf16.mxu0 %v5303_v28  ;;  %v2425_v28 = vadd.f32 %v6616_v26, %v6047_v49  ;;  %v5331_v49 = vld [vmem:[%s7224_s0 + $0x7b0] ss:$36 sps:$4 sm:$0xff]  }
 0x22c   :  { %v6533_v0 = vpop.f32.mrb[44].mxu1 }
 0x22d   :  { %v2803_v30 = vpop.f32.mrb[45].mxu1 }
 0x22e   :  { %v6538_v32 = vpop.f32.mrb[46].mxu1 }
 0x22f   :  { %v2806_v35 = vpop.f32.mrb[47].mxu1 }
 0x230   :  { %v2428_v35 = vadd.f32 %v6616_v26, %v6052_v52 }
 0x231   :  { %4409 = vmatmul.mubr.bf16.gmra.mrb[152].mxu1 %v5307_v31 }
 0x232   :  { %3466 = vmatmul.mubr.bf16.gmra.mrb[88].mxu0 %v5306_v33  ;;  %4412 = vmatprep.mubr.bf16.mxu1 %v5310_v34  ;;  %v5332_v34 = vld [vmem:[%s7224_s0 + $0x698] ss:$36 sps:$4 sm:$0xff]  }
 0x233   :  { %3473 = vmatprep.mubr.bf16.mxu0 %v5308_v37 }
 0x234   :  { %v6549_v38 = vpop.f32.mrb[48].mxu1 }
 0x235   :  { %v2811_v6 = vpop.f32.mrb[49].mxu1 }
 0x236   :  { %v6554_v41 = vpop.f32.mrb[50].mxu1 }
 0x237   :  { %v2814_v45 = vpop.f32.mrb[51].mxu1 }
 0x239   :  { %4413 = vmatmul.mubr.bf16.gmra.mrb[156].mxu1 %v5312_v40 }
 0x23a   :  { %3474 = vmatmul.mubr.bf16.gmra.mrb[92].mxu0 %v5311_v42  ;;  %4416 = vmatprep.mubr.bf16.mxu1 %v5315_v43  ;;  %v5335_v42 = vld [vmem:[%s7224_s0 + $0x6e0] ss:$36 sps:$4 sm:$0xff]  }
 0x23b   :  { %3481 = vmatprep.mubr.bf16.mxu0 %v5313_v46  ;;  %v5333_v46 = vld [vmem:[%s7224_s0 + $0x7fc] ss:$36 sps:$4 sm:$0xff]  }
 0x23c   :  { %v6565_v47 = vpop.f32.mrb[52].mxu1 }
 0x23d   :  { %v2819_v50 = vpop.f32.mrb[53].mxu1 }
 0x23e   :  { %v6570_v53 = vpop.f32.mrb[54].mxu1 }
 0x23f   :  { %v2822_v56 = vpop.f32.mrb[55].mxu1 }
 0x241   :  { %4417 = vmatmul.mubr.bf16.gmra.mrb[160].mxu1 %v5317_v51  ;;  %v2433_v51 = vadd.f32 %v6616_v26, %v6063_v57  ;;  %v5336_v57 = vld [vmem:[%s7224_s0 + $0x7f8] ss:$36 sps:$4 sm:$0xff]  }
 0x242   :  { %3482 = vmatmul.mubr.bf16.gmra.mrb[96].mxu0 %v5316_v54  ;;  %4420 = vmatprep.mubr.bf16.mxu1 %v5320_v55 }
 0x243   :  { %3489 = vmatprep.mubr.bf16.mxu0 %v5318_v58  ;;  %v5337_v58 = vld [vmem:[%s7224_s0 + $0x728] ss:$36 sps:$4 sm:$0xff]  }
 0x244   :  { %v6581_v61 = vpop.f32.mrb[56].mxu1 }
 0x245   :  { %v2827_v62 = vpop.f32.mrb[57].mxu1 }
 0x246   :  { %v6586_v3 = vpop.f32.mrb[58].mxu1  ;;  %v2436_v62 = vadd.f32 %v6616_v26, %v6068_v60 }
 0x247   :  { %v2830_v9 = vpop.f32.mrb[59].mxu1 }
 0x248   :  { %v5340_v9 = vld [vmem:[%s7224_s0 + $0x770] ss:$36 sps:$4 sm:$0xff]  }
 0x249   :  { %4421 = vmatmul.mubr.bf16.gmra.mrb[164].mxu1 %v5322_v1 }
 0x24a   :  { %3490 = vmatmul.mubr.bf16.gmra.mrb[100].mxu0 %v5321_v4  ;;  %4424 = vmatprep.mubr.bf16.mxu1 %v5325_v7 }
 0x24b   :  { %3497 = vmatprep.mubr.bf16.mxu0 %v5323_v10 }
 0x24c   :  { %v6597_v13 = vpop.f32.mrb[60].mxu1 }
 0x24d   :  { %v2835_v15 = vpop.f32.mrb[61].mxu1 }
 0x24e   :  { %v6602_v17 = vpop.f32.mrb[62].mxu1 }
 0x24f   :  { %v2838_v24 = vpop.f32.mrb[63].mxu1 }
 0x251   :  { %4425 = vmatmul.mubr.bf16.gmra.mrb[168].mxu1 %v5327_v16  ;;  %v5338_v16 = vld [vmem:[%s7224_s0 + $0x844] ss:$36 sps:$4 sm:$0xff]  }
 0x252   :  { %3498 = vmatmul.mubr.bf16.gmra.mrb[104].mxu0 %v5326_v20  ;;  %4428 = vmatprep.mubr.bf16.mxu1 %v5330_v21  ;;  %v2441_v21 = vadd.f32 %v6616_v26, %v6079_v2  ;;  %v5341_v2 = vld [vmem:[%s7224_s0 + $0x840] ss:$36 sps:$4 sm:$0xff]  }
 0x253   :  { %3505 = vmatprep.mubr.bf16.mxu0 %v5328_v25 }
 0x254   :  { %v6620_v30 = vpop.f32.mrb[64].mxu1 }
 0x255   :  { %v3291_v31 = vpop.f32.mrb[0].mxu0  ;;  %v2843_v33 = vpop.f32.mrb[65].mxu1 }
 0x256   :  { %v6627_v37 = vadd.f32 %v3291_v31, %v2425_v28  ;;  %v3293_v6 = vpop.f32.mrb[1].mxu0  ;;  %v6629_v40 = vpop.f32.mrb[66].mxu1  ;;  %v5342_v31 = vld [vmem:[%s7224_s0 + $0x7b8] ss:$36 sps:$4 sm:$0xff]   ;;  %v2444_v33 = vadd.f32 %v6616_v26, %v6084_v5 }
 0x257   :  { %v3294_v43 = vpop.f32.mrb[2].mxu0  ;;  %v2846_v45 = vpop.f32.mrb[67].mxu1 }
 0x258   :  { %v6640_v52 = vadd.f32 %v3294_v43, %v2428_v35  ;;  %v3296_v50 = vpop.f32.mrb[3].mxu0  ;;  %v5343_v45 = vld [vmem:[%s7224_s0 + $0x88c] ss:$36 sps:$4 sm:$0xff]  }
 0x259   :  { %4429 = vmatmul.mubr.bf16.gmra.mrb[172].mxu1 %v5332_v34  ;;  %v2449_v50 = vadd.f32 %v6616_v26, %v6095_v11  ;;  %v5346_v11 = vld [vmem:[%s7224_s0 + $0x888] ss:$36 sps:$4 sm:$0xff]  }
 0x25a   :  { %3506 = vmatmul.mubr.bf16.gmra.mrb[108].mxu0 %v5331_v49  ;;  %4432 = vmatprep.mubr.bf16.mxu1 %v5335_v42  ;;  %v5345_v49 = vld [vmem:[%s7224_s0 + $0x800] ss:$36 sps:$4 sm:$0xff]  }
 0x25b   :  { %3513 = vmatprep.mubr.bf16.mxu0 %v5333_v46 }
 0x25c   :  { %v6644_v54 = vpop.f32.mrb[68].mxu1 }
 0x25d   :  { %v3299_v55 = vpop.f32.mrb[4].mxu0  ;;  %v2851_v56 = vpop.f32.mrb[69].mxu1 }
 0x25e   :  { %v6651_v1 = vadd.f32 %v3299_v55, %v2433_v51  ;;  %v3301_v4 = vpop.f32.mrb[5].mxu0  ;;  %v6653_v7 = vpop.f32.mrb[70].mxu1 }
 0x25f   :  { %v3302_v10 = vpop.f32.mrb[6].mxu0  ;;  %v2854_v15 = vpop.f32.mrb[71].mxu1 }
 0x260   :  { %v6664_v60 = vadd.f32 %v3302_v10, %v2436_v62  ;;  %v3304_v20 = vpop.f32.mrb[7].mxu0  ;;  %v2452_v62 = vadd.f32 %v6616_v26, %v6100_v14  ;;  %v5350_v10 = vld [vmem:[%s7224_s0 + $0x890] ss:$36 sps:$4 sm:$0xff]  }
 0x261   :  { %4433 = vmatmul.mubr.bf16.gmra.mrb[176].mxu1 %v5337_v58  ;;  %v5347_v58 = vld [vmem:[%s7224_s0 + $0x848] ss:$36 sps:$4 sm:$0xff]   ;;  %v5348_v20 = vld [vmem:[%s7224_s0 + $0x8d4] ss:$36 sps:$4 sm:$0xff]  }
 0x262   :  { %3514 = vmatmul.mubr.bf16.gmra.mrb[112].mxu0 %v5336_v57  ;;  %4436 = vmatprep.mubr.bf16.mxu1 %v5340_v9 }
 0x263   :  { %3521 = vmatprep.mubr.bf16.mxu0 %v5338_v16 }
 0x264   :  { %v6668_v24 = vpop.f32.mrb[72].mxu1 }
 0x265   :  { %v3307_v25 = vpop.f32.mrb[8].mxu0  ;;  %v2859_v28 = vpop.f32.mrb[73].mxu1 }
 0x266   :  { %v6675_v34 = vadd.f32 %v3307_v25, %v2441_v21  ;;  %v3309_v35 = vpop.f32.mrb[9].mxu0  ;;  %v6677_v6 = vpop.f32.mrb[74].mxu1  ;;  %v2457_v25 = vadd.f32 %v6616_v26, %v6111_v19  ;;  %v5351_v19 = vld [vmem:[%s7224_s0 + $0x8d0] ss:$36 sps:$4 sm:$0xff]  }
 0x267   :  { %v3310_v42 = vpop.f32.mrb[10].mxu0  ;;  %v2862_v43 = vpop.f32.mrb[75].mxu1  ;;  %v5352_v35 = vld [vmem:[%s7224_s0 + $0x8d8] ss:$36 sps:$4 sm:$0xff]  }
 0x268   :  { %v6688_v5 = vadd.f32 %v3310_v42, %v2444_v33  ;;  %v3312_v46 = vpop.f32.mrb[11].mxu0 }
 0x269   :  { %4437 = vmatmul.mubr.bf16.gmra.mrb[180].mxu1 %v5342_v31 }
 0x26a   :  { %3522 = vmatmul.mubr.bf16.gmra.mrb[116].mxu0 %v5341_v2  ;;  %4440 = vmatprep.mubr.bf16.mxu1 %v5345_v49  ;;  %v2460_v2 = vadd.f32 %v6616_v26, %v6116_v22 }
 0x26b   :  { %3529 = vmatprep.mubr.bf16.mxu0 %v5343_v45 }
 0x26c   :  { %v6692_v51 = vpop.f32.mrb[76].mxu1 }
 0x26d   :  { %v3315_v55 = vpop.f32.mrb[12].mxu0  ;;  %v2867_v56 = vpop.f32.mrb[77].mxu1 }
 0x26e   :  { %v6699_v4 = vadd.f32 %v3315_v55, %v2449_v50  ;;  %v3317_v57 = vpop.f32.mrb[13].mxu0  ;;  %v6701_v9 = vpop.f32.mrb[78].mxu1  ;;  %v2465_v56 = vadd.f32 %v6616_v26, %v6127_v27  ;;  %v2473_v27 = vadd.f32 %v6616_v26, %v6150_v36  ;;  %v2481_v36 = vadd.f32 %v6616_v26, %v6169_v44 }
 0x26f   :  { %v3318_v15 = vpop.f32.mrb[14].mxu0  ;;  %v2870_v16 = vpop.f32.mrb[79].mxu1  ;;  %v2468_v57 = vadd.f32 %v6616_v26, %v6132_v29  ;;  %v2476_v29 = vadd.f32 %v6616_v26, %v6155_v39  ;;  %v2484_v39 = vadd.f32 %v6616_v26, %v6177_v48  ;;  %v4512_v44 = vadd.f32 %v6616_v26, %v6485_v59 }
 0x270   :  { %v6712_v14 = vadd.f32 %v3318_v15, %v2452_v62  ;;  %v3320_v21 = vpop.f32.mrb[15].mxu0  ;;  %v4514_v48 = vadd.f32 %v6616_v26, %v6490_v63  ;;  %v4516_v59 = vadd.f32 %v6616_v26, %v6501_v8  ;;  %v4518_v63 = vadd.f32 %v6616_v26, %v6506_v12 }
 0x271   :  { %4441 = vmatmul.mubr.bf16.gmra.mrb[184].mxu1 %v5347_v58  ;;  %v4520_v8 = vadd.f32 %v6616_v26, %v6517_v18  ;;  %v4522_v12 = vadd.f32 %v6616_v26, %v6522_v23  ;;  %v4524_v18 = vadd.f32 %v6616_v26, %v6533_v0  ;;  %v4526_v23 = vadd.f32 %v6616_v26, %v6538_v32 }
 0x272   :  { %3530 = vmatmul.mubr.bf16.gmra.mrb[120].mxu0 %v5346_v11  ;;  %4444 = vmatprep.mubr.bf16.mxu1 %v5350_v10  ;;  %v4528_v0 = vadd.f32 %v6616_v26, %v6549_v38  ;;  %v4530_v32 = vadd.f32 %v6616_v26, %v6554_v41  ;;  %v4532_v38 = vadd.f32 %v6616_v26, %v6565_v47 }
 0x273   :  { %3537 = vmatprep.mubr.bf16.mxu0 %v5348_v20  ;;  %v4534_v41 = vadd.f32 %v6616_v26, %v6570_v53  ;;  %v4536_v47 = vadd.f32 %v6616_v26, %v6581_v61  ;;  %v4538_v53 = vadd.f32 %v6616_v26, %v6586_v3  ;;  %v4540_v61 = vadd.f32 %v6616_v26, %v6597_v13 }
 0x274   :  { %v6716_v28 = vpop.f32.mrb[80].mxu1  ;;  %v4542_v3 = vadd.f32 %v6616_v26, %v6602_v17  ;;  %v4544_v13 = vadd.f32 %v6616_v26, %v6620_v30  ;;  %v4546_v17 = vadd.f32 %v6616_v26, %v6629_v40 }
 0x275   :  { %v3323_v31 = vpop.f32.mrb[16].mxu0  ;;  %v2875_v33 = vpop.f32.mrb[81].mxu1 }
 0x276   :  { %v6723_v49 = vadd.f32 %v3323_v31, %v2457_v25  ;;  %v3325_v42 = vpop.f32.mrb[17].mxu0  ;;  %v6725_v43 = vpop.f32.mrb[82].mxu1 }
 0x277   :  { %v3326_v45 = vpop.f32.mrb[18].mxu0  ;;  %v2878_v46 = vpop.f32.mrb[83].mxu1 }
 0x278   :  { %v6730_v50 = vadd.f32 %v3326_v45, %v2460_v2  ;;  %v3328_v55 = vpop.f32.mrb[19].mxu0 }
 0x279   :  { %4445 = vmatmul.mubr.bf16.gmra.mrb[188].mxu1 %v5352_v35 }
 0x27a   :  { %3538 = vmatmul.mubr.bf16.gmra.mrb[124].mxu0 %v5351_v19 }
 0x27c   :  { %v6734_v22 = vpop.f32.mrb[84].mxu1 }
 0x27d   :  { %v3331_v58 = vpop.f32.mrb[20].mxu0  ;;  %v2883_v62 = vpop.f32.mrb[85].mxu1 }
 0x27e   :  { %v6738_v11 = vadd.f32 %v3331_v58, %v2465_v56  ;;  %v3333_v10 = vpop.f32.mrb[21].mxu0  ;;  %v6740_v15 = vpop.f32.mrb[86].mxu1 }
 0x27f   :  { %v3334_v16 = vpop.f32.mrb[22].mxu0  ;;  %v2886_v20 = vpop.f32.mrb[87].mxu1 }
 0x280   :  { %v6742_v21 = vadd.f32 %v3334_v16, %v2468_v57  ;;  %v3336_v25 = vpop.f32.mrb[23].mxu0 }
 0x284   :  { %v6746_v31 = vpop.f32.mrb[88].mxu1 }
 0x285   :  { %v3339_v33 = vpop.f32.mrb[24].mxu0  ;;  %v2891_v35 = vpop.f32.mrb[89].mxu1 }
 0x286   :  { %v6750_v2 = vadd.f32 %v3339_v33, %v2473_v27  ;;  %v3341_v42 = vpop.f32.mrb[25].mxu0  ;;  %v6752_v19 = vpop.f32.mrb[90].mxu1 }
 0x287   :  { %v3342_v45 = vpop.f32.mrb[26].mxu0  ;;  %v2894_v46 = vpop.f32.mrb[91].mxu1 }
 0x288   :  { %v6754_v55 = vadd.f32 %v3342_v45, %v2476_v29  ;;  %v3344_v56 = vpop.f32.mrb[27].mxu0 }
 0x28c   :  { %v6758_v58 = vpop.f32.mrb[92].mxu1 }
 0x28d   :  { %v3347_v62 = vpop.f32.mrb[28].mxu0  ;;  %v2899_v57 = vpop.f32.mrb[93].mxu1 }
 0x28e   :  { %v6762_v10 = vadd.f32 %v3347_v62, %v2481_v36  ;;  %v3349_v16 = vpop.f32.mrb[29].mxu0  ;;  %v6764_v20 = vpop.f32.mrb[94].mxu1 }
 0x28f   :  { %v3350_v25 = vpop.f32.mrb[30].mxu0  ;;  %v2902_v27 = vpop.f32.mrb[95].mxu1 }
 0x290   :  { %v6766_v33 = vadd.f32 %v3350_v25, %v2484_v39  ;;  %v3352_v35 = vpop.f32.mrb[31].mxu0 }
 0x294   :  { %v6770_v29 = vpop.f32.mrb[96].mxu1 }
 0x295   :  { %7227 = vst [vmem:[#allocation2_spill] sm:$0xff] %v6770_v29  ;;  %v3355_v42 = vpop.f32.mrb[32].mxu0  ;;  %v2907_v45 = vpop.f32.mrb[97].mxu1 }
 0x296   :  { %v6774_v46 = vadd.f32 %v4512_v44, %v3355_v42  ;;  %v3357_v56 = vpop.f32.mrb[33].mxu0  ;;  %v6776_v36 = vpop.f32.mrb[98].mxu1 }
 0x297   :  { %7228 = vst [vmem:[#allocation3_spill] sm:$0xff] %v6776_v36  ;;  %v3358_v62 = vpop.f32.mrb[34].mxu0  ;;  %v2910_v57 = vpop.f32.mrb[99].mxu1 }
 0x298   :  { %v6778_v39 = vadd.f32 %v4514_v48, %v3358_v62  ;;  %v3360_v16 = vpop.f32.mrb[35].mxu0 }
 0x29c   :  { %v6782_v25 = vpop.f32.mrb[100].mxu1 }
 0x29d   :  { %7229 = vst [vmem:[#allocation4_spill] sm:$0xff] %v6782_v25  ;;  %v3363_v27 = vpop.f32.mrb[36].mxu0  ;;  %v2915_v35 = vpop.f32.mrb[101].mxu1 }
 0x29e   :  { %v6786_v44 = vadd.f32 %v4516_v59, %v3363_v27  ;;  %v3365_v42 = vpop.f32.mrb[37].mxu0  ;;  %v6788_v45 = vpop.f32.mrb[102].mxu1 }
 0x29f   :  { %7230 = vst [vmem:[#allocation5_spill] sm:$0xff] %v6788_v45  ;;  %v3366_v56 = vpop.f32.mrb[38].mxu0  ;;  %v2918_v57 = vpop.f32.mrb[103].mxu1 }
 0x2a0   :  { %v6790_v48 = vadd.f32 %v4518_v63, %v3366_v56  ;;  %v3368_v62 = vpop.f32.mrb[39].mxu0 }
 0x2a4   :  { %v6794_v16 = vpop.f32.mrb[104].mxu1 }
 0x2a5   :  { %7231 = vst [vmem:[#allocation6_spill] sm:$0xff] %v6794_v16  ;;  %v3371_v25 = vpop.f32.mrb[40].mxu0  ;;  %v2923_v35 = vpop.f32.mrb[105].mxu1 }
 0x2a6   :  { %v6798_v59 = vadd.f32 %v4520_v8, %v3371_v25  ;;  %v3373_v27 = vpop.f32.mrb[41].mxu0  ;;  %v6800_v42 = vpop.f32.mrb[106].mxu1 }
 0x2a7   :  { %7232 = vst [vmem:[#allocation7_spill] sm:$0xff] %v6800_v42  ;;  %v3374_v45 = vpop.f32.mrb[42].mxu0  ;;  %v2926_v57 = vpop.f32.mrb[107].mxu1 }
 0x2a8   :  { %v6802_v63 = vadd.f32 %v4522_v12, %v3374_v45  ;;  %v3376_v56 = vpop.f32.mrb[43].mxu0 }
 0x2ac   :  { %v6806_v62 = vpop.f32.mrb[108].mxu1 }
 0x2ad   :  { %7233 = vst [vmem:[#allocation8_spill] sm:$0xff] %v6806_v62  ;;  %v3379_v16 = vpop.f32.mrb[44].mxu0  ;;  %v2931_v35 = vpop.f32.mrb[109].mxu1 }
 0x2ae   :  { %v6810_v25 = vadd.f32 %v4524_v18, %v3379_v16  ;;  %v3381_v8 = vpop.f32.mrb[45].mxu0  ;;  %v6812_v27 = vpop.f32.mrb[110].mxu1 }
 0x2af   :  { %7234 = vst [vmem:[#allocation9_spill] sm:$0xff] %v6812_v27  ;;  %v3382_v42 = vpop.f32.mrb[46].mxu0  ;;  %v2934_v57 = vpop.f32.mrb[111].mxu1 }
 0x2b0   :  { %v6814_v45 = vadd.f32 %v4526_v23, %v3382_v42  ;;  %v3384_v12 = vpop.f32.mrb[47].mxu0 }
 0x2b4   :  { %v6818_v56 = vpop.f32.mrb[112].mxu1 }
 0x2b5   :  { %7235 = vst [vmem:[#allocation10_spill] sm:$0xff] %v6818_v56  ;;  %v3387_v62 = vpop.f32.mrb[48].mxu0  ;;  %v2939_v35 = vpop.f32.mrb[113].mxu1 }
 0x2b6   :  { %v6822_v16 = vadd.f32 %v4528_v0, %v3387_v62  ;;  %v3389_v18 = vpop.f32.mrb[49].mxu0  ;;  %v6824_v8 = vpop.f32.mrb[114].mxu1 }
 0x2b7   :  { %7236 = vst [vmem:[#allocation11_spill] sm:$0xff] %v6824_v8  ;;  %v3390_v27 = vpop.f32.mrb[50].mxu0  ;;  %v2942_v57 = vpop.f32.mrb[115].mxu1 }
 0x2b8   :  { %v6826_v42 = vadd.f32 %v4530_v32, %v3390_v27  ;;  %v3392_v23 = vpop.f32.mrb[51].mxu0 }
 0x2bc   :  { %v6830_v12 = vpop.f32.mrb[116].mxu1 }
 0x2bd   :  { %7237 = vst [vmem:[#allocation12_spill] sm:$0xff] %v6830_v12  ;;  %v3395_v56 = vpop.f32.mrb[52].mxu0  ;;  %v2947_v35 = vpop.f32.mrb[117].mxu1 }
 0x2be   :  { %v6834_v62 = vadd.f32 %v4532_v38, %v3395_v56  ;;  %v3397_v0 = vpop.f32.mrb[53].mxu0  ;;  %v6836_v18 = vpop.f32.mrb[118].mxu1 }
 0x2bf   :  { %7238 = vst [vmem:[#allocation13_spill] sm:$0xff] %v6836_v18  ;;  %v3398_v8 = vpop.f32.mrb[54].mxu0  ;;  %v2950_v57 = vpop.f32.mrb[119].mxu1 }
 0x2c0   :  { %v6838_v27 = vadd.f32 %v4534_v41, %v3398_v8  ;;  %v3400_v32 = vpop.f32.mrb[55].mxu0 }
 0x2c4   :  { %v6842_v23 = vpop.f32.mrb[120].mxu1 }
 0x2c5   :  { %7239 = vst [vmem:[#allocation14_spill] sm:$0xff] %v6842_v23  ;;  %v3403_v12 = vpop.f32.mrb[56].mxu0  ;;  %v2955_v35 = vpop.f32.mrb[121].mxu1 }
 0x2c6   :  { %v6846_v56 = vadd.f32 %v4536_v47, %v3403_v12  ;;  %v3405_v38 = vpop.f32.mrb[57].mxu0  ;;  %v6848_v0 = vpop.f32.mrb[122].mxu1 }
 0x2c7   :  { %7240 = vst [vmem:[#allocation15_spill] sm:$0xff] %v6848_v0  ;;  %v3406_v18 = vpop.f32.mrb[58].mxu0  ;;  %v2958_v57 = vpop.f32.mrb[123].mxu1 }
 0x2c8   :  { %v6850_v8 = vadd.f32 %v4538_v53, %v3406_v18  ;;  %v3408_v41 = vpop.f32.mrb[59].mxu0 }
 0x2ca   :  { %7241 = vst [vmem:[#allocation16_spill] sm:$0xff] %v6850_v8 }
 0x2cc   :  { %v6854_v32 = vpop.f32.mrb[124].mxu1 }
 0x2cd   :  { %7242 = vst [vmem:[#allocation17_spill] sm:$0xff] %v6854_v32  ;;  %v3411_v23 = vpop.f32.mrb[60].mxu0  ;;  %v2963_v35 = vpop.f32.mrb[125].mxu1 }
 0x2ce   :  { %v6858_v12 = vadd.f32 %v4540_v61, %v3411_v23  ;;  %v3413_v47 = vpop.f32.mrb[61].mxu0  ;;  %v6860_v38 = vpop.f32.mrb[126].mxu1 }
 0x2cf   :  { %7243 = vst [vmem:[#allocation18_spill] sm:$0xff] %v6860_v38  ;;  %v3414_v0 = vpop.f32.mrb[62].mxu0  ;;  %v2966_v57 = vpop.f32.mrb[127].mxu1 }
 0x2d0   :  { %v6862_v18 = vadd.f32 %v4542_v3, %v3414_v0  ;;  %v3416_v53 = vpop.f32.mrb[63].mxu0 }
 0x2d4   :  { %v4386_v41 = vpop.f32.mrb[128].mxu1 }
 0x2d5   :  { %v3419_v32 = vpop.f32.mrb[64].mxu0  ;;  %v3589_v35 = vadd.f32 %v6651_v1, %v4386_v41  ;;  %v3580_v36 = vpop.f32.mrb[129].mxu1 }
 0x2d6   :  { %v6869_v23 = vadd.f32 %v4544_v13, %v3419_v32  ;;  %v3421_v61 = vpop.f32.mrb[65].mxu0  ;;  %v3581_v47 = vadd.f32 %v6627_v37, %v3580_v36  ;;  %v4387_v57 = vpop.f32.mrb[130].mxu1 }
 0x2d7   :  { %v3837_v0 = vmax.f32 %v3589_v35, 0.0  ;;  %v3422_v3 = vpop.f32.mrb[66].mxu0  ;;  %v3592_v53 = vadd.f32 %v6664_v60, %v4387_v57  ;;  %v3583_v38 = vpop.f32.mrb[131].mxu1  ;;  %v4548_v60 = vadd.f32 %v6616_v26, %v6644_v54 }
 0x2d8   :  { %v3835_v30 = vmax.f32 %v3581_v47, 0.0  ;;  %v6873_v29 = vadd.f32 %v4546_v17, %v3422_v3  ;;  %v3424_v8 = vpop.f32.mrb[67].mxu0  ;;  %v3584_v1 = vadd.f32 %v6640_v52, %v3583_v38  ;;  %v4550_v38 = vadd.f32 %v6616_v26, %v6653_v7 }
 0x2d9   :  { %3901 = vst [vmem:[%s7226_s3 + $0x10] sm:$0xff] %v3837_v0  ;;  %v3838_v40 = vmax.f32 %v3592_v53, 0.0 }
 0x2da   :  { %3899 = vst [vmem:[%s7226_s3] sm:$0xff] %v3835_v30  ;;  %v3836_v37 = vmax.f32 %v3584_v1, 0.0 }
 0x2db   :  { %3902 = vst [vmem:[%s7226_s3 + $0x18] sm:$0xff] %v3838_v40 }
 0x2dc   :  { %3900 = vst [vmem:[%s7226_s3 + $0x8] sm:$0xff] %v3836_v37  ;;  %v4390_v52 = vpop.f32.mrb[132].mxu1  ;;  %v4554_v37 = vadd.f32 %v6616_v26, %v6677_v6 }
 0x2dd   :  { %v3427_v36 = vpop.f32.mrb[68].mxu0  ;;  %v3605_v8 = vadd.f32 %v6699_v4, %v4390_v52  ;;  %v3596_v32 = vpop.f32.mrb[133].mxu1 }
 0x2de   :  { %v6893_v13 = vadd.f32 %v4548_v60, %v3427_v36  ;;  %v3429_v41 = vpop.f32.mrb[69].mxu0  ;;  %v3597_v35 = vadd.f32 %v6675_v34, %v3596_v32  ;;  %v4391_v17 = vpop.f32.mrb[134].mxu1 }
 0x2df   :  { %v3841_v61 = vmax.f32 %v3605_v8, 0.0  ;;  %v3430_v54 = vpop.f32.mrb[70].mxu0  ;;  %v3608_v47 = vadd.f32 %v6712_v14, %v4391_v17  ;;  %v3599_v57 = vpop.f32.mrb[135].mxu1  ;;  %v4552_v14 = vadd.f32 %v6616_v26, %v6668_v24 }
 0x2e0   :  { %v3839_v0 = vmax.f32 %v3597_v35, 0.0  ;;  %v6897_v3 = vadd.f32 %v4550_v38, %v3430_v54  ;;  %v3432_v53 = vpop.f32.mrb[71].mxu0  ;;  %v3600_v4 = vadd.f32 %v6688_v5, %v3599_v57 }
 0x2e1   :  { %3905 = vst [vmem:[%s7226_s3 + $0x30] sm:$0xff] %v3841_v61  ;;  %v3842_v7 = vmax.f32 %v3608_v47, 0.0 }
 0x2e2   :  { %3903 = vst [vmem:[%s7226_s3 + $0x20] sm:$0xff] %v3839_v0  ;;  %v3840_v34 = vmax.f32 %v3600_v4, 0.0  ;;  %v4558_v0 = vadd.f32 %v6616_v26, %v6701_v9 }
 0x2e3   :  { %3906 = vst [vmem:[%s7226_s3 + $0x38] sm:$0xff] %v3842_v7 }
 0x2e4   :  { %3904 = vst [vmem:[%s7226_s3 + $0x28] sm:$0xff] %v3840_v34  ;;  %v4394_v5 = vpop.f32.mrb[136].mxu1 }
 0x2e5   :  { %v3435_v30 = vpop.f32.mrb[72].mxu0  ;;  %v3621_v1 = vadd.f32 %v6738_v11, %v4394_v5  ;;  %v3612_v40 = vpop.f32.mrb[137].mxu1 }
 0x2e6   :  { %v6917_v60 = vadd.f32 %v4552_v14, %v3435_v30  ;;  %v3437_v52 = vpop.f32.mrb[73].mxu0  ;;  %v3613_v36 = vadd.f32 %v6723_v49, %v3612_v40  ;;  %v4395_v8 = vpop.f32.mrb[138].mxu1 }
 0x2e7   :  { %v3845_v32 = vmax.f32 %v3621_v1, 0.0  ;;  %v3438_v24 = vpop.f32.mrb[74].mxu0  ;;  %v3624_v38 = vadd.f32 %v6742_v21, %v4395_v8  ;;  %v3615_v41 = vpop.f32.mrb[139].mxu1  ;;  %v4556_v21 = vadd.f32 %v6616_v26, %v6692_v51 }
 0x2e8   :  { %v3843_v35 = vmax.f32 %v3613_v36, 0.0  ;;  %v6921_v17 = vadd.f32 %v4554_v37, %v3438_v24  ;;  %v3440_v61 = vpop.f32.mrb[75].mxu0  ;;  %v3616_v11 = vadd.f32 %v6730_v50, %v3615_v41 }
 0x2e9   :  { %3909 = vst [vmem:[%s7226_s3 + $0x50] sm:$0xff] %v3845_v32  ;;  %v3846_v6 = vmax.f32 %v3624_v38, 0.0  ;;  %v4562_v32 = vadd.f32 %v6616_v26, %v6725_v43 }
 0x2ea   :  { %3907 = vst [vmem:[%s7226_s3 + $0x40] sm:$0xff] %v3843_v35  ;;  %v3844_v49 = vmax.f32 %v3616_v11, 0.0 }
 0x2eb   :  { %3910 = vst [vmem:[%s7226_s3 + $0x58] sm:$0xff] %v3846_v6 }
 0x2ec   :  { %3908 = vst [vmem:[%s7226_s3 + $0x48] sm:$0xff] %v3844_v49  ;;  %v4398_v50 = vpop.f32.mrb[140].mxu1 }
 0x2ed   :  { %v3443_v54 = vpop.f32.mrb[76].mxu0  ;;  %v3637_v47 = vadd.f32 %v6762_v10, %v4398_v50  ;;  %v3628_v57 = vpop.f32.mrb[141].mxu1 }
 0x2ee   :  { %v6941_v53 = vadd.f32 %v4556_v21, %v3443_v54  ;;  %v3445_v4 = vpop.f32.mrb[77].mxu0  ;;  %v3629_v7 = vadd.f32 %v6750_v2, %v3628_v57  ;;  %v4399_v34 = vpop.f32.mrb[142].mxu1 }
 0x2ef   :  { %v3849_v14 = vmax.f32 %v3637_v47, 0.0  ;;  %v3446_v51 = vpop.f32.mrb[78].mxu0  ;;  %v3640_v5 = vadd.f32 %v6766_v33, %v4399_v34  ;;  %v3631_v30 = vpop.f32.mrb[143].mxu1  ;;  %v4560_v33 = vadd.f32 %v6616_v26, %v6716_v28 }
 0x2f0   :  { %v3847_v1 = vmax.f32 %v3629_v7, 0.0  ;;  %v6945_v40 = vadd.f32 %v4558_v0, %v3446_v51  ;;  %v3448_v37 = vpop.f32.mrb[79].mxu0  ;;  %v3632_v10 = vadd.f32 %v6754_v55, %v3631_v30  ;;  %v4566_v0 = vadd.f32 %v6616_v26, %v6740_v15 }
 0x2f1   :  { %3913 = vst [vmem:[%s7226_s3 + $0x70] sm:$0xff] %v3849_v14  ;;  %v3850_v9 = vmax.f32 %v3640_v5, 0.0 }
 0x2f2   :  { %3911 = vst [vmem:[%s7226_s3 + $0x60] sm:$0xff] %v3847_v1  ;;  %v3848_v2 = vmax.f32 %v3632_v10, 0.0 }
 0x2f3   :  { %3914 = vst [vmem:[%s7226_s3 + $0x78] sm:$0xff] %v3850_v9 }
 0x2f4   :  { %3912 = vst [vmem:[%s7226_s3 + $0x68] sm:$0xff] %v3848_v2  ;;  %v4402_v55 = vpop.f32.mrb[144].mxu1 }
 0x2f5   :  { %v3451_v52 = vpop.f32.mrb[80].mxu0  ;;  %v3653_v36 = vadd.f32 %v6786_v44, %v4402_v55  ;;  %v3644_v8 = vpop.f32.mrb[145].mxu1  ;;  %v4570_v55 = vadd.f32 %v6616_v26, %v6752_v19 }
 0x2f6   :  { %v6965_v24 = vadd.f32 %v4560_v33, %v3451_v52  ;;  %v3453_v38 = vpop.f32.mrb[81].mxu0  ;;  %v3645_v41 = vadd.f32 %v6774_v46, %v3644_v8  ;;  %v4403_v35 = vpop.f32.mrb[146].mxu1 }
 0x2f7   :  { %v3853_v61 = vmax.f32 %v3653_v36, 0.0  ;;  %v3454_v28 = vpop.f32.mrb[82].mxu0  ;;  %v3656_v11 = vadd.f32 %v6790_v48, %v4403_v35  ;;  %v3647_v6 = vpop.f32.mrb[147].mxu1  ;;  %v4564_v48 = vadd.f32 %v6616_v26, %v6734_v22 }
 0x2f8   :  { %v3851_v49 = vmax.f32 %v3645_v41, 0.0  ;;  %v6969_v21 = vadd.f32 %v4562_v32, %v3454_v28  ;;  %v3456_v50 = vpop.f32.mrb[83].mxu0  ;;  %v3648_v44 = vadd.f32 %v6778_v39, %v3647_v6 }
 0x2f9   :  { %3917 = vst [vmem:[%s7226_s3 + $0x90] sm:$0xff] %v3853_v61  ;;  %v3854_v43 = vmax.f32 %v3656_v11, 0.0 }
 0x2fa   :  { %3915 = vst [vmem:[%s7226_s3 + $0x80] sm:$0xff] %v3851_v49  ;;  %v3852_v46 = vmax.f32 %v3648_v44, 0.0  ;;  %v4574_v44 = vadd.f32 %v6616_v26, %v6764_v20 }
 0x2fb   :  { %3918 = vst [vmem:[%s7226_s3 + $0x98] sm:$0xff] %v3854_v43 }
 0x2fc   :  { %3916 = vst [vmem:[%s7226_s3 + $0x88] sm:$0xff] %v3852_v46  ;;  %v4406_v39 = vpop.f32.mrb[148].mxu1 }
 0x2fd   :  { %v3459_v54 = vpop.f32.mrb[84].mxu0  ;;  %v3669_v47 = vadd.f32 %v6810_v25, %v4406_v39  ;;  %v3660_v57 = vpop.f32.mrb[149].mxu1 }
 0x2fe   :  { %v6989_v4 = vadd.f32 %v4564_v48, %v3459_v54  ;;  %v3461_v7 = vpop.f32.mrb[85].mxu0  ;;  %v3661_v34 = vadd.f32 %v6798_v59, %v3660_v57  ;;  %v4407_v14 = vpop.f32.mrb[150].mxu1 }
 0x2ff   :  { %v3857_v51 = vmax.f32 %v3669_v47, 0.0  ;;  %v3462_v22 = vpop.f32.mrb[86].mxu0  ;;  %v3672_v5 = vadd.f32 %v6814_v45, %v4407_v14  ;;  %v3663_v30 = vpop.f32.mrb[151].mxu1  ;;  %v4568_v45 = vadd.f32 %v6616_v26, %v6746_v31 }
 0x300   :  { %v3855_v1 = vmax.f32 %v3661_v34, 0.0  ;;  %v6993_v37 = vadd.f32 %v4566_v0, %v3462_v22  ;;  %v3464_v10 = vpop.f32.mrb[87].mxu0  ;;  %v3664_v25 = vadd.f32 %v6802_v63, %v3663_v30 }
 0x301   :  { %3921 = vst [vmem:[%s7226_s3 + $0xb0] sm:$0xff] %v3857_v51  ;;  %v3858_v15 = vmax.f32 %v3672_v5, 0.0  ;;  %v7246_v10 = vld [vmem:[#allocation3_spill] sm:$0xff] }
 0x302   :  { %3919 = vst [vmem:[%s7226_s3 + $0xa0] sm:$0xff] %v3855_v1  ;;  %v3856_v59 = vmax.f32 %v3664_v25, 0.0  ;;  %v4578_v25 = vadd.f32 %v6616_v26, %v7246_v10 }
 0x303   :  { %3922 = vst [vmem:[%s7226_s3 + $0xb8] sm:$0xff] %v3858_v15 }
 0x304   :  { %3920 = vst [vmem:[%s7226_s3 + $0xa8] sm:$0xff] %v3856_v59  ;;  %v4410_v63 = vpop.f32.mrb[152].mxu1 }
 0x305   :  { %v3467_v9 = vpop.f32.mrb[88].mxu0  ;;  %v3685_v2 = vadd.f32 %v6834_v62, %v4410_v63  ;;  %v3676_v33 = vpop.f32.mrb[153].mxu1 }
 0x306   :  { %v7013_v52 = vadd.f32 %v4568_v45, %v3467_v9  ;;  %v3469_v36 = vpop.f32.mrb[89].mxu0  ;;  %v3677_v8 = vadd.f32 %v6822_v16, %v3676_v33  ;;  %v4411_v32 = vpop.f32.mrb[154].mxu1 }
 0x307   :  { %v3861_v38 = vmax.f32 %v3685_v2, 0.0  ;;  %v3470_v31 = vpop.f32.mrb[90].mxu0  ;;  %v3688_v41 = vadd.f32 %v6838_v27, %v4411_v32  ;;  %v3679_v35 = vpop.f32.mrb[155].mxu1  ;;  %v4572_v27 = vadd.f32 %v6616_v26, %v6758_v58 }
 0x308   :  { %v3859_v61 = vmax.f32 %v3677_v8, 0.0  ;;  %v7017_v28 = vadd.f32 %v4570_v55, %v3470_v31  ;;  %v3472_v11 = vpop.f32.mrb[91].mxu0  ;;  %v3680_v62 = vadd.f32 %v6826_v42, %v3679_v35 }
 0x309   :  { %3925 = vst [vmem:[%s7226_s3 + $0xd0] sm:$0xff] %v3861_v38  ;;  %v3862_v19 = vmax.f32 %v3688_v41, 0.0  ;;  %v7248_v11 = vld [vmem:[#allocation5_spill] sm:$0xff] }
 0x30a   :  { %3923 = vst [vmem:[%s7226_s3 + $0xc0] sm:$0xff] %v3859_v61  ;;  %v3860_v16 = vmax.f32 %v3680_v62, 0.0  ;;  %v4582_v62 = vadd.f32 %v6616_v26, %v7248_v11 }
 0x30b   :  { %3926 = vst [vmem:[%s7226_s3 + $0xd8] sm:$0xff] %v3862_v19 }
 0x30c   :  { %3924 = vst [vmem:[%s7226_s3 + $0xc8] sm:$0xff] %v3860_v16  ;;  %v4414_v42 = vpop.f32.mrb[156].mxu1 }
 0x30d   :  { %v3475_v6 = vpop.f32.mrb[92].mxu0  ;;  %v3701_v49 = vadd.f32 %v6858_v12, %v4414_v42  ;;  %v3692_v50 = vpop.f32.mrb[157].mxu1  ;;  %v7244_v12 = vld [vmem:[#allocation16_spill] sm:$0xff] }
 0x30e   :  { %v7037_v43 = vadd.f32 %v4572_v27, %v3475_v6  ;;  %v3477_v46 = vpop.f32.mrb[93].mxu0  ;;  %v3693_v48 = vadd.f32 %v6846_v56, %v3692_v50  ;;  %v4415_v39 = vpop.f32.mrb[158].mxu1 }
 0x30f   :  { %v3865_v54 = vmax.f32 %v3701_v49, 0.0  ;;  %v3478_v58 = vpop.f32.mrb[94].mxu0  ;;  %v3704_v47 = vadd.f32 %v6862_v18, %v4415_v39  ;;  %v3695_v57 = vpop.f32.mrb[159].mxu1  ;;  %v7245_v18 = vld [vmem:[#allocation2_spill] sm:$0xff] }
 0x310   :  { %v3863_v0 = vmax.f32 %v3693_v48, 0.0  ;;  %v7041_v7 = vadd.f32 %v4574_v44, %v3478_v58  ;;  %v3480_v34 = vpop.f32.mrb[95].mxu0  ;;  %v3696_v14 = vadd.f32 %v7244_v12, %v3695_v57  ;;  %v4576_v51 = vadd.f32 %v6616_v26, %v7245_v18 }
 0x311   :  { %3929 = vst [vmem:[%s7226_s3 + $0xf0] sm:$0xff] %v3865_v54  ;;  %v3866_v20 = vmax.f32 %v3704_v47, 0.0  ;;  %v7250_v34 = vld [vmem:[#allocation7_spill] sm:$0xff] }
 0x312   :  { %3927 = vst [vmem:[%s7226_s3 + $0xe0] sm:$0xff] %v3863_v0  ;;  %v3864_v56 = vmax.f32 %v3696_v14, 0.0  ;;  %v4586_v12 = vadd.f32 %v6616_v26, %v7250_v34 }
 0x313   :  { %3930 = vst [vmem:[%s7226_s3 + $0xf8] sm:$0xff] %v3866_v20 }
 0x314   :  { %3928 = vst [vmem:[%s7226_s3 + $0xe8] sm:$0xff] %v3864_v56  ;;  %v4418_v22 = vpop.f32.mrb[160].mxu1 }
 0x315   :  { %v3483_v5 = vpop.f32.mrb[96].mxu0  ;;  %v3717_v30 = vadd.f32 %v6893_v13, %v4418_v22  ;;  %v3708_v1 = vpop.f32.mrb[161].mxu1 }
 0x316   :  { %v7061_v15 = vadd.f32 %v4576_v51, %v3483_v5  ;;  %v3485_v59 = vpop.f32.mrb[97].mxu0  ;;  %v3709_v45 = vadd.f32 %v6869_v23, %v3708_v1  ;;  %v4419_v63 = vpop.f32.mrb[162].mxu1 }
 0x317   :  { %v3869_v9 = vmax.f32 %v3717_v30, 0.0  ;;  %v3486_v2 = vpop.f32.mrb[98].mxu0  ;;  %v3720_v33 = vadd.f32 %v6897_v3, %v4419_v63  ;;  %v3711_v55 = vpop.f32.mrb[163].mxu1  ;;  %v7247_v3 = vld [vmem:[#allocation4_spill] sm:$0xff] }
 0x318   :  { %v3867_v36 = vmax.f32 %v3709_v45, 0.0  ;;  %v7065_v8 = vadd.f32 %v4578_v25, %v3486_v2  ;;  %v3488_v32 = vpop.f32.mrb[99].mxu0  ;;  %v3712_v13 = vadd.f32 %v6873_v29, %v3711_v55  ;;  %v4580_v31 = vadd.f32 %v6616_v26, %v7247_v3 }
 0x319   :  { %3933 = vst [vmem:[%s7226_s3 + $0x110] sm:$0xff] %v3869_v9  ;;  %v3870_v38 = vmax.f32 %v3720_v33, 0.0  ;;  %v7252_v33 = vld [vmem:[#allocation9_spill] sm:$0xff] }
 0x31a   :  { %3931 = vst [vmem:[%s7226_s3 + $0x100] sm:$0xff] %v3867_v36  ;;  %v3868_v23 = vmax.f32 %v3712_v13, 0.0  ;;  %v4590_v55 = vadd.f32 %v6616_v26, %v7252_v33 }
 0x31b   :  { %3934 = vst [vmem:[%s7226_s3 + $0x118] sm:$0xff] %v3870_v38 }
 0x31c   :  { %3932 = vst [vmem:[%s7226_s3 + $0x108] sm:$0xff] %v3868_v23  ;;  %v4422_v29 = vpop.f32.mrb[164].mxu1 }
 0x31d   :  { %v3491_v41 = vpop.f32.mrb[100].mxu0  ;;  %v3733_v35 = vadd.f32 %v6941_v53, %v4422_v29  ;;  %v3724_v61 = vpop.f32.mrb[165].mxu1 }
 0x31e   :  { %v7085_v19 = vadd.f32 %v4580_v31, %v3491_v41  ;;  %v3493_v16 = vpop.f32.mrb[101].mxu0  ;;  %v3725_v27 = vadd.f32 %v6917_v60, %v3724_v61  ;;  %v4423_v42 = vpop.f32.mrb[166].mxu1 }
 0x31f   :  { %v3873_v6 = vmax.f32 %v3733_v35, 0.0  ;;  %v3494_v49 = vpop.f32.mrb[102].mxu0  ;;  %v3736_v50 = vadd.f32 %v6945_v40, %v4423_v42  ;;  %v3727_v44 = vpop.f32.mrb[167].mxu1  ;;  %v7249_v40 = vld [vmem:[#allocation6_spill] sm:$0xff] }
 0x320   :  { %v3871_v46 = vmax.f32 %v3725_v27, 0.0  ;;  %v7089_v48 = vadd.f32 %v4582_v62, %v3494_v49  ;;  %v3496_v39 = vpop.f32.mrb[103].mxu0  ;;  %v3728_v53 = vadd.f32 %v6921_v17, %v3727_v44  ;;  %v4584_v58 = vadd.f32 %v6616_v26, %v7249_v40 }
 0x321   :  { %3937 = vst [vmem:[%s7226_s3 + $0x130] sm:$0xff] %v3873_v6  ;;  %v3874_v54 = vmax.f32 %v3736_v50, 0.0  ;;  %v7254_v6 = vld [vmem:[#allocation11_spill] sm:$0xff] }
 0x322   :  { %3935 = vst [vmem:[%s7226_s3 + $0x120] sm:$0xff] %v3871_v46  ;;  %v3872_v60 = vmax.f32 %v3728_v53, 0.0 }
 0x323   :  { %3938 = vst [vmem:[%s7226_s3 + $0x138] sm:$0xff] %v3874_v54 }
 0x324   :  { %3936 = vst [vmem:[%s7226_s3 + $0x128] sm:$0xff] %v3872_v60  ;;  %v4426_v17 = vpop.f32.mrb[168].mxu1 }
 0x325   :  { %v3499_v47 = vpop.f32.mrb[104].mxu0  ;;  %v3749_v57 = vadd.f32 %v6989_v4, %v4426_v17  ;;  %v3740_v0 = vpop.f32.mrb[169].mxu1 }
 0x326   :  { %v7109_v14 = vadd.f32 %v4584_v58, %v3499_v47  ;;  %v3501_v20 = vpop.f32.mrb[105].mxu0  ;;  %v3741_v56 = vadd.f32 %v6965_v24, %v3740_v0  ;;  %v4427_v18 = vpop.f32.mrb[170].mxu1 }
 0x327   :  { %v3877_v51 = vmax.f32 %v3749_v57, 0.0  ;;  %v3502_v22 = vpop.f32.mrb[106].mxu0  ;;  %v3752_v5 = vadd.f32 %v6993_v37, %v4427_v18  ;;  %v3743_v30 = vpop.f32.mrb[171].mxu1  ;;  %v7251_v37 = vld [vmem:[#allocation8_spill] sm:$0xff] }
 0x328   :  { %v3875_v1 = vmax.f32 %v3741_v56, 0.0  ;;  %v7113_v10 = vadd.f32 %v4586_v12, %v3502_v22  ;;  %v3504_v25 = vpop.f32.mrb[107].mxu0  ;;  %v3744_v4 = vadd.f32 %v6969_v21, %v3743_v30  ;;  %v4588_v45 = vadd.f32 %v6616_v26, %v7251_v37  ;;  %v7256_v56 = vld [vmem:[#allocation13_spill] sm:$0xff] }
 0x329   :  { %3941 = vst [vmem:[%s7226_s3 + $0x150] sm:$0xff] %v3877_v51  ;;  %v3878_v59 = vmax.f32 %v3752_v5, 0.0 }
 0x32a   :  { %3939 = vst [vmem:[%s7226_s3 + $0x140] sm:$0xff] %v3875_v1  ;;  %v3876_v24 = vmax.f32 %v3744_v4, 0.0 }
 0x32b   :  { %3942 = vst [vmem:[%s7226_s3 + $0x158] sm:$0xff] %v3878_v59 }
 0x32c   :  { %3940 = vst [vmem:[%s7226_s3 + $0x148] sm:$0xff] %v3876_v24  ;;  %v4430_v21 = vpop.f32.mrb[172].mxu1 }
 0x32d   :  { %v3507_v63 = vpop.f32.mrb[108].mxu0  ;;  %v3765_v9 = vadd.f32 %v7037_v43, %v4430_v21  ;;  %v3756_v2 = vpop.f32.mrb[173].mxu1  ;;  %v7148_v43 = vld [vmem:[%s7225_s2] ss:$0 sm:$0xff] }
 0x32e   :  { %v4589_v36 = vadd.f32 %v4588_v45, %v3507_v63  ;;  %v3509_v32 = vpop.f32.mrb[109].mxu0  ;;  %v3757_v13 = vadd.f32 %v7013_v52, %v3756_v2  ;;  %v4431_v38 = vpop.f32.mrb[174].mxu1  ;;  %v4594_v49 = vadd.f32 %v7148_v43, %v7254_v6  ;;  %v4598_v18 = vadd.f32 %v7148_v43, %v7256_v56 }
 0x32f   :  { %v3881_v23 = vmax.f32 %v3765_v9, 0.0  ;;  %v3510_v3 = vpop.f32.mrb[110].mxu0  ;;  %v3768_v31 = vadd.f32 %v7041_v7, %v4431_v38  ;;  %v3759_v29 = vpop.f32.mrb[175].mxu1  ;;  %v7257_v9 = vld [vmem:[#allocation14_spill] sm:$0xff]  ;;  %v7258_v32 = vld [vmem:[#allocation15_spill] sm:$0xff] }
 0x330   :  { %v3879_v41 = vmax.f32 %v3757_v13, 0.0  ;;  %v4591_v35 = vadd.f32 %v4590_v55, %v3510_v3  ;;  %v3512_v61 = vpop.f32.mrb[111].mxu0  ;;  %v3760_v11 = vadd.f32 %v7017_v28, %v3759_v29  ;;  %v7253_v28 = vld [vmem:[#allocation10_spill] sm:$0xff]  ;;  %v4600_v2 = vadd.f32 %v7148_v43, %v7257_v9 }
 0x331   :  { %3945 = vst [vmem:[%s7226_s3 + $0x170] sm:$0xff] %v3881_v23  ;;  %v3882_v26 = vmax.f32 %v3768_v31, 0.0  ;;  %v4592_v7 = vadd.f32 %v7148_v43, %v7253_v28  ;;  %v4602_v13 = vadd.f32 %v7148_v43, %v7258_v32 }
 0x332   :  { %3943 = vst [vmem:[%s7226_s3 + $0x160] sm:$0xff] %v3879_v41  ;;  %v3880_v52 = vmax.f32 %v3760_v11, 0.0 }
 0x333   :  { %3946 = vst [vmem:[%s7226_s3 + $0x178] sm:$0xff] %v3882_v26 }
 0x334   :  { %3944 = vst [vmem:[%s7226_s3 + $0x168] sm:$0xff] %v3880_v52  ;;  %v4434_v62 = vpop.f32.mrb[176].mxu1 }
 0x335   :  { %v3515_v16 = vpop.f32.mrb[112].mxu0  ;;  %v3781_v27 = vadd.f32 %v7085_v19, %v4434_v62  ;;  %v3772_v42 = vpop.f32.mrb[177].mxu1 }
 0x336   :  { %v4593_v50 = vadd.f32 %v4592_v7, %v3515_v16  ;;  %v3517_v44 = vpop.f32.mrb[113].mxu0  ;;  %v3773_v46 = vadd.f32 %v7061_v15, %v3772_v42  ;;  %v4435_v39 = vpop.f32.mrb[178].mxu1  ;;  %v7259_v16 = vld [vmem:[#allocation17_spill] sm:$0xff] }
 0x337   :  { %v3885_v53 = vmax.f32 %v3781_v27, 0.0  ;;  %v3518_v54 = vpop.f32.mrb[114].mxu0  ;;  %v3784_v60 = vadd.f32 %v7089_v48, %v4435_v39  ;;  %v3775_v40 = vpop.f32.mrb[179].mxu1  ;;  %v7255_v48 = vld [vmem:[#allocation12_spill] sm:$0xff]  ;;  %v4604_v27 = vadd.f32 %v7148_v43, %v7259_v16 }
 0x338   :  { %v3883_v58 = vmax.f32 %v3773_v46, 0.0  ;;  %v4595_v17 = vadd.f32 %v4594_v49, %v3518_v54  ;;  %v3520_v47 = vpop.f32.mrb[115].mxu0  ;;  %v3776_v57 = vadd.f32 %v7065_v8, %v3775_v40  ;;  %v4596_v0 = vadd.f32 %v7148_v43, %v7255_v48 }
 0x339   :  { %3949 = vst [vmem:[%s7226_s3 + $0x190] sm:$0xff] %v3885_v53  ;;  %v3886_v19 = vmax.f32 %v3784_v60, 0.0 }
 0x33a   :  { %3947 = vst [vmem:[%s7226_s3 + $0x180] sm:$0xff] %v3883_v58  ;;  %v3884_v15 = vmax.f32 %v3776_v57, 0.0 }
 0x33b   :  { %3950 = vst [vmem:[%s7226_s3 + $0x198] sm:$0xff] %v3886_v19 }
 0x33c   :  { %3948 = vst [vmem:[%s7226_s3 + $0x188] sm:$0xff] %v3884_v15  ;;  %v4438_v8 = vpop.f32.mrb[180].mxu1 }
 0x33d   :  { %v3523_v34 = vpop.f32.mrb[116].mxu0  ;;  %v3797_v12 = vadd.f32 %v4589_v36, %v4438_v8  ;;  %v3788_v20 = vpop.f32.mrb[181].mxu1 }
 0x33e   :  { %v4597_v51 = vadd.f32 %v4596_v0, %v3523_v34  ;;  %v3525_v22 = vpop.f32.mrb[117].mxu0  ;;  %v3789_v5 = vadd.f32 %v7109_v14, %v3788_v20  ;;  %v4439_v30 = vpop.f32.mrb[182].mxu1 }
 0x33f   :  { %v3889_v1 = vmax.f32 %v3797_v12, 0.0  ;;  %v3526_v25 = vpop.f32.mrb[118].mxu0  ;;  %v3800_v4 = vadd.f32 %v4591_v35, %v4439_v30  ;;  %v3791_v59 = vpop.f32.mrb[183].mxu1 }
 0x340   :  { %v3887_v24 = vmax.f32 %v3789_v5, 0.0  ;;  %v4599_v37 = vadd.f32 %v4598_v18, %v3526_v25  ;;  %v3528_v45 = vpop.f32.mrb[119].mxu0  ;;  %v3792_v21 = vadd.f32 %v7113_v10, %v3791_v59 }
 0x341   :  { %3953 = vst [vmem:[%s7226_s3 + $0x1b0] sm:$0xff] %v3889_v1  ;;  %v3890_v63 = vmax.f32 %v3800_v4, 0.0 }
 0x342   :  { %3951 = vst [vmem:[%s7226_s3 + $0x1a0] sm:$0xff] %v3887_v24  ;;  %v3888_v14 = vmax.f32 %v3792_v21, 0.0 }
 0x343   :  { %3954 = vst [vmem:[%s7226_s3 + $0x1b8] sm:$0xff] %v3890_v63 }
 0x344   :  { %3952 = vst [vmem:[%s7226_s3 + $0x1a8] sm:$0xff] %v3888_v14  ;;  %v4442_v10 = vpop.f32.mrb[184].mxu1 }
 0x345   :  { %v3531_v33 = vpop.f32.mrb[120].mxu0  ;;  %v3813_v55 = vadd.f32 %v4597_v51, %v4442_v10  ;;  %v3804_v36 = vpop.f32.mrb[185].mxu1 }
 0x346   :  { %v4601_v38 = vadd.f32 %v4600_v2, %v3531_v33  ;;  %v3533_v23 = vpop.f32.mrb[121].mxu0  ;;  %v3805_v3 = vadd.f32 %v4593_v50, %v3804_v36  ;;  %v4443_v31 = vpop.f32.mrb[186].mxu1  ;;  %v7260_v50 = vld [vmem:[#allocation18_spill] sm:$0xff] }
 0x347   :  { %v3893_v29 = vmax.f32 %v3813_v55, 0.0  ;;  %v3534_v41 = vpop.f32.mrb[122].mxu0  ;;  %v3816_v35 = vadd.f32 %v4599_v37, %v4443_v31  ;;  %v3807_v61 = vpop.f32.mrb[187].mxu1  ;;  %v4606_v44 = vadd.f32 %v7148_v43, %v7260_v50 }
 0x348   :  { %v3891_v11 = vmax.f32 %v3805_v3, 0.0  ;;  %v4603_v26 = vadd.f32 %v4602_v13, %v3534_v41  ;;  %v3536_v52 = vpop.f32.mrb[123].mxu0  ;;  %v3808_v28 = vadd.f32 %v4595_v17, %v3807_v61 }
 0x349   :  { %3957 = vst [vmem:[%s7226_s3 + $0x1d0] sm:$0xff] %v3893_v29  ;;  %v3894_v7 = vmax.f32 %v3816_v35, 0.0 }
 0x34a   :  { %3955 = vst [vmem:[%s7226_s3 + $0x1c0] sm:$0xff] %v3891_v11  ;;  %v3892_v62 = vmax.f32 %v3808_v28, 0.0 }
 0x34b   :  { %3958 = vst [vmem:[%s7226_s3 + $0x1d8] sm:$0xff] %v3894_v7 }
 0x34c   :  { %3956 = vst [vmem:[%s7226_s3 + $0x1c8] sm:$0xff] %v3892_v62  ;;  %v4446_v42 = vpop.f32.mrb[188].mxu1 }
 0x34d   :  { %v3539_v6 = vpop.f32.mrb[124].mxu0  ;;  %v3820_v49 = vpop.f32.mrb[189].mxu1 }
 0x34e   :  { %v4605_v46 = vadd.f32 %v4604_v27, %v3539_v6  ;;  %v3541_v39 = vpop.f32.mrb[125].mxu0  ;;  %v3821_v53 = vadd.f32 %v4601_v38, %v3820_v49  ;;  %v4447_v54 = vpop.f32.mrb[190].mxu1 }
 0x34f   :  { %v3542_v60 = vpop.f32.mrb[126].mxu0  ;;  %v3823_v40 = vpop.f32.mrb[191].mxu1 }
 0x350   :  { %v3829_v58 = vadd.f32 %v4605_v46, %v4446_v42  ;;  %v3895_v17 = vmax.f32 %v3821_v53, 0.0  ;;  %v4607_v47 = vadd.f32 %v4606_v44, %v3542_v60  ;;  %v3544_v57 = vpop.f32.mrb[127].mxu0  ;;  %v3824_v19 = vadd.f32 %v4603_v26, %v3823_v40 }
 0x352   :  { %v3897_v15 = vmax.f32 %v3829_v58, 0.0  ;;  %3959 = vst [vmem:[%s7226_s3 + $0x1e0] sm:$0xff] %v3895_v17  ;;  %v3832_v48 = vadd.f32 %v4607_v47, %v4447_v54  ;;  %v3896_v0 = vmax.f32 %v3824_v19, 0.0 }
 0x354   :  { %3961 = vst [vmem:[%s7226_s3 + $0x1f0] sm:$0xff] %v3897_v15  ;;  %v3898_v43 = vmax.f32 %v3832_v48, 0.0  ;;  %3960 = vst [vmem:[%s7226_s3 + $0x1e8] sm:$0xff] %v3896_v0 }
 0x356   :  { %3962 = vst [vmem:[%s7226_s3 + $0x1f8] sm:$0xff] %v3898_v43 }

// kernel: _forward_impl.6
= control target key start
LH: loop header
LB: loop body
LE: loop exit
PB: predicated region body
PF: predicated region fallthrough
CT: control target
= control target key end

     0   :  { %s2807_s1 = inlined_call_operand.vmem [shape: bf16[1152,128], index: 1, kind: input, shape index: {}]   ;;  %s2808_s0 = inlined_call_operand.vmem [shape: bf16[128,1152], index: 0, kind: input, shape index: {}]   ;;  %s2809_s2 = inlined_call_operand.vmem [shape: f32[1,128], index: 2, kind: input, shape index: {}]   ;;  %s2810_s3 = inlined_call_operand.vmem [shape: f32[128,128], index: 3, kind: output, shape index: {}]  }
   0x1   :  { %v2032_v0 = vld [vmem:[%s2807_s1 + $0x40] sm:$0xff]   ;;  %v2036_v4 = vld [vmem:[%s2807_s1 + $0x48] sm:$0xff]   ;;  %v2040_v8 = vld [vmem:[%s2807_s1 + $0x50] sm:$0xff]  }
   0x2   :  { %v2033_v1 = vld [vmem:[%s2807_s1 + $0xc0] sm:$0xff]   ;;  %1712 = vmatprep.subr.bf16.mxu0 %v2032_v0  ;;  %v2037_v5 = vld [vmem:[%s2807_s1 + $0xc8] sm:$0xff]   ;;  %v2041_v9 = vld [vmem:[%s2807_s1 + $0xd0] sm:$0xff]  }
   0x3   :  { %v2034_v2 = vld [vmem:[%s2807_s1] sm:$0xff]   ;;  %1776 = vmatprep.subr.bf16.mxu1 %v2033_v1  ;;  %v2038_v6 = vld [vmem:[%s2807_s1 + $0x8] sm:$0xff]   ;;  %v2042_v10 = vld [vmem:[%s2807_s1 + $0x10] sm:$0xff]  }
   0x4   :  { %v2035_v3 = vld [vmem:[%s2807_s1 + $0x80] sm:$0xff]   ;;  %1713 = vmatpush3.bf16.msra.mxu0 %v2034_v2  ;;  %v2039_v7 = vld [vmem:[%s2807_s1 + $0x88] sm:$0xff]   ;;  %v2043_v11 = vld [vmem:[%s2807_s1 + $0x90] sm:$0xff]  }
   0x5   :  { %1777 = vmatpush3.bf16.msra.mxu1 %v2035_v3  ;;  %1714 = vmatprep.subr.bf16.mxu0 %v2036_v4  ;;  %v2044_v12 = vld [vmem:[%s2807_s1 + $0x58] sm:$0xff]   ;;  %v2048_v16 = vld [vmem:[%s2807_s1 + $0x60] sm:$0xff]   ;;  %v2052_v20 = vld [vmem:[%s2807_s1 + $0x68] sm:$0xff]  }
   0x6   :  { %1778 = vmatprep.subr.bf16.mxu1 %v2037_v5  ;;  %v2045_v13 = vld [vmem:[%s2807_s1 + $0xd8] sm:$0xff]   ;;  %v2049_v17 = vld [vmem:[%s2807_s1 + $0xe0] sm:$0xff]   ;;  %v2053_v21 = vld [vmem:[%s2807_s1 + $0xe8] sm:$0xff]  }
   0x7   :  { %v2046_v14 = vld [vmem:[%s2807_s1 + $0x18] sm:$0xff]   ;;  %v2050_v18 = vld [vmem:[%s2807_s1 + $0x20] sm:$0xff]   ;;  %v2054_v22 = vld [vmem:[%s2807_s1 + $0x28] sm:$0xff]  }
   0x8   :  { %1715 = vmatpush3.bf16.msra.mxu0 %v2038_v6  ;;  %v2047_v15 = vld [vmem:[%s2807_s1 + $0x98] sm:$0xff]   ;;  %v2051_v19 = vld [vmem:[%s2807_s1 + $0xa0] sm:$0xff]   ;;  %v2055_v23 = vld [vmem:[%s2807_s1 + $0xa8] sm:$0xff]  }
   0x9   :  { %1779 = vmatpush3.bf16.msra.mxu1 %v2039_v7  ;;  %1716 = vmatprep.subr.bf16.mxu0 %v2040_v8  ;;  %v2056_v24 = vld [vmem:[%s2807_s1 + $0x70] sm:$0xff]   ;;  %v2060_v28 = vld [vmem:[%s2807_s1 + $0x78] sm:$0xff]   ;;  %v2064_v32 = vld [vmem:[%s2808_s0] ss:$36 sps:$4 sm:$0xff]  }
   0xa   :  { %1780 = vmatprep.subr.bf16.mxu1 %v2041_v9  ;;  %v2057_v25 = vld [vmem:[%s2807_s1 + $0xf0] sm:$0xff]   ;;  %v2061_v29 = vld [vmem:[%s2807_s1 + $0xf8] sm:$0xff]   ;;  %v2066_v33 = vld [vmem:[%s2808_s0 + $0x4] ss:$36 sps:$4 sm:$0xff]  }
   0xb   :  { %v2058_v26 = vld [vmem:[%s2807_s1 + $0x30] sm:$0xff]   ;;  %v2062_v30 = vld [vmem:[%s2807_s1 + $0x38] sm:$0xff]   ;;  %v2067_v34 = vld [vmem:[%s2808_s0 + $0x8] ss:$36 sps:$4 sm:$0xff]   ;;  %1078 = vmatprep.mubr.bf16.mxu0 %v2066_v33 }
   0xc   :  { %1717 = vmatpush3.bf16.msra.mxu0 %v2042_v10  ;;  %v2059_v27 = vld [vmem:[%s2807_s1 + $0xb0] sm:$0xff]   ;;  %v2063_v31 = vld [vmem:[%s2807_s1 + $0xb8] sm:$0xff]   ;;  %v2070_v36 = vld [vmem:[%s2807_s1 + $0x140] sm:$0xff]  }
   0xd   :  { %1781 = vmatpush3.bf16.msra.mxu1 %v2043_v11  ;;  %1718 = vmatprep.subr.bf16.mxu0 %v2044_v12  ;;  %v2069_v35 = vld [vmem:[%s2808_s0 + $0xc] ss:$36 sps:$4 sm:$0xff]   ;;  %v2071_v37 = vld [vmem:[%s2807_s1 + $0x1c0] sm:$0xff]   ;;  %v2076_v41 = vld [vmem:[%s2808_s0 + $0x54] ss:$36 sps:$4 sm:$0xff]  }
   0xe   :  { %1782 = vmatprep.subr.bf16.mxu1 %v2045_v13  ;;  %1175 = vmatprep.mubr.bf16.mxu1 %v2069_v35  ;;  %v2072_v38 = vld [vmem:[%s2807_s1 + $0x100] sm:$0xff]   ;;  %v2074_v40 = vld [vmem:[%s2808_s0 + $0x4c] ss:$36 sps:$4 sm:$0xff]   ;;  %v2084_v48 = vld [vmem:[%s2808_s0 + $0x94] ss:$36 sps:$4 sm:$0xff]  }
   0xf   :  { %v2073_v39 = vld [vmem:[%s2807_s1 + $0x180] sm:$0xff]   ;;  %v2078_v42 = vld [vmem:[%s2808_s0 + $0x48] ss:$36 sps:$4 sm:$0xff]   ;;  %v2079_v43 = vld [vmem:[%s2808_s0 + $0x50] ss:$36 sps:$4 sm:$0xff]  }
  0x10   :  { %1719 = vmatpush3.bf16.msra.mxu0 %v2046_v14  ;;  %v2080_v44 = vld [vmem:[%s2807_s1 + $0x148] sm:$0xff]   ;;  %v2086_v49 = vld [vmem:[%s2808_s0 + $0x9c] ss:$36 sps:$4 sm:$0xff]   ;;  %v2088_v50 = vld [vmem:[%s2808_s0 + $0x90] ss:$36 sps:$4 sm:$0xff]  }
  0x11   :  { %1783 = vmatpush3.bf16.msra.mxu1 %v2047_v15  ;;  %1720 = vmatprep.subr.bf16.mxu0 %v2048_v16  ;;  %v2081_v45 = vld [vmem:[%s2807_s1 + $0x1c8] sm:$0xff]   ;;  %v2089_v51 = vld [vmem:[%s2808_s0 + $0x98] ss:$36 sps:$4 sm:$0xff]   ;;  %v2090_v52 = vld [vmem:[%s2807_s1 + $0x150] sm:$0xff]  }
  0x12   :  { %1784 = vmatprep.subr.bf16.mxu1 %v2049_v17  ;;  %v2082_v46 = vld [vmem:[%s2807_s1 + $0x108] sm:$0xff]   ;;  %v2091_v53 = vld [vmem:[%s2807_s1 + $0x1d0] sm:$0xff]   ;;  %v2094_v56 = vld [vmem:[%s2808_s0 + $0xdc] ss:$36 sps:$4 sm:$0xff]  }
  0x13   :  { %v2083_v47 = vld [vmem:[%s2807_s1 + $0x188] sm:$0xff]   ;;  %v2092_v54 = vld [vmem:[%s2807_s1 + $0x110] sm:$0xff]   ;;  %v2098_v58 = vld [vmem:[%s2808_s0 + $0xd8] ss:$36 sps:$4 sm:$0xff]  }
  0x14   :  { %1721 = vmatpush3.bf16.msra.mxu0 %v2050_v18  ;;  %v2093_v55 = vld [vmem:[%s2807_s1 + $0x190] sm:$0xff]   ;;  %v2096_v57 = vld [vmem:[%s2808_s0 + $0xe4] ss:$36 sps:$4 sm:$0xff]   ;;  %v2100_v60 = vld [vmem:[%s2807_s1 + $0x158] sm:$0xff]  }
  0x15   :  { %1785 = vmatpush3.bf16.msra.mxu1 %v2051_v19  ;;  %1722 = vmatprep.subr.bf16.mxu0 %v2052_v20  ;;  %v2099_v59 = vld [vmem:[%s2808_s0 + $0xe0] ss:$36 sps:$4 sm:$0xff]   ;;  %v2101_v61 = vld [vmem:[%s2807_s1 + $0x1d8] sm:$0xff]   ;;  %v2106_v1 = vld [vmem:[%s2808_s0 + $0x12c] ss:$36 sps:$4 sm:$0xff]  }
  0x16   :  { %1786 = vmatprep.subr.bf16.mxu1 %v2053_v21  ;;  %v2102_v62 = vld [vmem:[%s2807_s1 + $0x118] sm:$0xff]   ;;  %v2104_v0 = vld [vmem:[%s2808_s0 + $0x124] ss:$36 sps:$4 sm:$0xff]   ;;  %v2114_v8 = vld [vmem:[%s2808_s0 + $0x16c] ss:$36 sps:$4 sm:$0xff]  }
  0x17   :  { %v2103_v63 = vld [vmem:[%s2807_s1 + $0x198] sm:$0xff]   ;;  %v2108_v2 = vld [vmem:[%s2808_s0 + $0x120] ss:$36 sps:$4 sm:$0xff]   ;;  %v2109_v4 = vld [vmem:[%s2808_s0 + $0x128] ss:$36 sps:$4 sm:$0xff]  }
  0x18   :  { %1723 = vmatpush3.bf16.msra.mxu0 %v2054_v22  ;;  %v2110_v3 = vld [vmem:[%s2807_s1 + $0x160] sm:$0xff]   ;;  %v2116_v9 = vld [vmem:[%s2808_s0 + $0x174] ss:$36 sps:$4 sm:$0xff]   ;;  %v2120_v10 = vld [vmem:[%s2807_s1 + $0x168] sm:$0xff]  }
  0x19   :  { %1787 = vmatpush3.bf16.msra.mxu1 %v2055_v23  ;;  %1724 = vmatprep.subr.bf16.mxu0 %v2056_v24  ;;  %v2111_v5 = vld [vmem:[%s2807_s1 + $0x1e0] sm:$0xff]   ;;  %v2121_v11 = vld [vmem:[%s2807_s1 + $0x1e8] sm:$0xff]   ;;  %v2119_v15 = vld [vmem:[%s2808_s0 + $0x170] ss:$36 sps:$4 sm:$0xff]  }
  0x1a   :  { %1788 = vmatprep.subr.bf16.mxu1 %v2057_v25  ;;  %v2112_v6 = vld [vmem:[%s2807_s1 + $0x120] sm:$0xff]   ;;  %v2118_v12 = vld [vmem:[%s2808_s0 + $0x168] ss:$36 sps:$4 sm:$0xff]   ;;  %v2124_v16 = vld [vmem:[%s2808_s0 + $0x1b4] ss:$36 sps:$4 sm:$0xff]  }
  0x1b   :  { %v2113_v7 = vld [vmem:[%s2807_s1 + $0x1a0] sm:$0xff]   ;;  %v2122_v13 = vld [vmem:[%s2807_s1 + $0x128] sm:$0xff]   ;;  %v2130_v18 = vld [vmem:[%s2807_s1 + $0x170] sm:$0xff]  }
  0x1c   :  { %1725 = vmatpush3.bf16.msra.mxu0 %v2058_v26  ;;  %v2123_v14 = vld [vmem:[%s2807_s1 + $0x1a8] sm:$0xff]   ;;  %v2126_v17 = vld [vmem:[%s2808_s0 + $0x1bc] ss:$36 sps:$4 sm:$0xff]   ;;  %v2131_v19 = vld [vmem:[%s2807_s1 + $0x1f0] sm:$0xff]  }
  0x1d   :  { %1789 = vmatpush3.bf16.msra.mxu1 %v2059_v27  ;;  %1726 = vmatprep.subr.bf16.mxu0 %v2060_v28  ;;  %v2132_v20 = vld [vmem:[%s2807_s1 + $0x130] sm:$0xff]   ;;  %v2129_v23 = vld [vmem:[%s2808_s0 + $0x1b8] ss:$36 sps:$4 sm:$0xff]   ;;  %v2136_v25 = vld [vmem:[%s2808_s0 + $0x204] ss:$36 sps:$4 sm:$0xff]  }
  0x1e   :  { %1790 = vmatprep.subr.bf16.mxu1 %v2061_v29  ;;  %v2133_v21 = vld [vmem:[%s2807_s1 + $0x1b0] sm:$0xff]   ;;  %v2134_v24 = vld [vmem:[%s2808_s0 + $0x1fc] ss:$36 sps:$4 sm:$0xff]  }
  0x1f   :  { %v2128_v22 = vld [vmem:[%s2808_s0 + $0x1b0] ss:$36 sps:$4 sm:$0xff]   ;;  %v2140_v26 = vld [vmem:[%s2807_s1 + $0x178] sm:$0xff]  }
  0x20   :  { %1727 = vmatpush3.bf16.msra.mxu0 %v2062_v30  ;;  %v2141_v27 = vld [vmem:[%s2807_s1 + $0x1f8] sm:$0xff]   ;;  %v2144_v35 = vld [vmem:[%s2808_s0 + $0x10] ss:$36 sps:$4 sm:$0xff]  }
  0x21   :  { %1791 = vmatpush3.bf16.msra.mxu1 %v2063_v31  ;;  %1840 = vmatprep.subr.bf16.mxu0 %v2070_v36  ;;  %v2142_v28 = vld [vmem:[%s2807_s1 + $0x138] sm:$0xff]   ;;  %v2139_v31 = vld [vmem:[%s2808_s0 + $0x200] ss:$36 sps:$4 sm:$0xff]  }
  0x22   :  { %1904 = vmatprep.subr.bf16.mxu1 %v2071_v37  ;;  %v2143_v29 = vld [vmem:[%s2807_s1 + $0x1b8] sm:$0xff]  }
  0x23   :  { %1079 = vmatmul.mubr.bf16.vlgmr.msra.gmra.mrb[0].mxu0 %v2064_v32  ;;  %v2138_v30 = vld [vmem:[%s2808_s0 + $0x1f8] ss:$36 sps:$4 sm:$0xff]   ;;  %v2150_v32 = vld [vmem:[%s2807_s1 + $0x200] sm:$0xff]  }
  0x24   :  { %1176 = vmatmul.mubr.bf16.vlgmr.msra.gmra.mrb[0].mxu1 %v2067_v34  ;;  %1841 = vmatpush3.bf16.msra.mxu0 %v2072_v38  ;;  %v2146_v33 = vld [vmem:[%s2808_s0 + $0x14] ss:$36 sps:$4 sm:$0xff]   ;;  %v2149_v34 = vld [vmem:[%s2808_s0 + $0x1c] ss:$36 sps:$4 sm:$0xff]   ;;  %v2153_v38 = vld [vmem:[%s2808_s0 + $0x64] ss:$36 sps:$4 sm:$0xff]  }
  0x25   :  { %1905 = vmatpush3.bf16.msra.mxu1 %v2073_v39  ;;  %1086 = vmatprep.mubr.bf16.mxu0 %v2074_v40  ;;  %v2147_v36 = vld [vmem:[%s2808_s0 + $0x18] ss:$36 sps:$4 sm:$0xff]   ;;  %v2157_v39 = vld [vmem:[%s2807_s1 + $0x208] sm:$0xff]   ;;  %v2164_v40 = vld [vmem:[%s2807_s1 + $0x210] sm:$0xff]  }
  0x26   :  { %1183 = vmatprep.mubr.bf16.mxu1 %v2076_v41  ;;  %1842 = vmatprep.subr.bf16.mxu0 %v2080_v44  ;;  %v2151_v37 = vld [vmem:[%s2808_s0 + $0x5c] ss:$36 sps:$4 sm:$0xff]   ;;  %v2160_v44 = vld [vmem:[%s2808_s0 + $0xac] ss:$36 sps:$4 sm:$0xff]  }
  0x27   :  { %1906 = vmatprep.subr.bf16.mxu1 %v2081_v45  ;;  %v2155_v41 = vld [vmem:[%s2808_s0 + $0x58] ss:$36 sps:$4 sm:$0xff]  }
  0x28   :  { %1843 = vmatpush3.bf16.msra.mxu0 %v2082_v46  ;;  %v2171_v45 = vld [vmem:[%s2807_s1 + $0x218] sm:$0xff]   ;;  %v2178_v46 = vld [vmem:[%s2807_s1 + $0x220] sm:$0xff]  }
  0x29   :  { %1907 = vmatpush3.bf16.msra.mxu1 %v2083_v47  ;;  %1844 = vmatprep.subr.bf16.mxu0 %v2090_v52  ;;  %v2162_v47 = vld [vmem:[%s2808_s0 + $0xa0] ss:$36 sps:$4 sm:$0xff]   ;;  %v2169_v52 = vld [vmem:[%s2808_s0 + $0xe8] ss:$36 sps:$4 sm:$0xff]  }
  0x2a   :  { %1908 = vmatprep.subr.bf16.mxu1 %v2091_v53  ;;  %v2192_v53 = vld [vmem:[%s2807_s1 + $0x230] sm:$0xff]  }
  0x2b   :  { %1087 = vmatmul.mubr.bf16.gmra.mrb[4].mxu0 %v2078_v42  ;;  %v2156_v42 = vld [vmem:[%s2808_s0 + $0x60] ss:$36 sps:$4 sm:$0xff]  }
  0x2c   :  { %1184 = vmatmul.mubr.bf16.gmra.mrb[4].mxu1 %v2079_v43  ;;  %1094 = vmatprep.mubr.bf16.mxu0 %v2084_v48  ;;  %v2158_v43 = vld [vmem:[%s2808_s0 + $0xa4] ss:$36 sps:$4 sm:$0xff]  }
  0x2d   :  { %1191 = vmatprep.mubr.bf16.mxu1 %v2086_v49  ;;  %1845 = vmatpush3.bf16.msra.mxu0 %v2092_v54  ;;  %v2163_v48 = vld [vmem:[%s2808_s0 + $0xa8] ss:$36 sps:$4 sm:$0xff]   ;;  %v2170_v54 = vld [vmem:[%s2808_s0 + $0xf0] ss:$36 sps:$4 sm:$0xff]  }
  0x2e   :  { %1909 = vmatpush3.bf16.msra.mxu1 %v2093_v55  ;;  %1846 = vmatprep.subr.bf16.mxu0 %v2100_v60  ;;  %v2165_v49 = vld [vmem:[%s2808_s0 + $0xec] ss:$36 sps:$4 sm:$0xff]   ;;  %v2172_v55 = vld [vmem:[%s2808_s0 + $0x134] ss:$36 sps:$4 sm:$0xff]   ;;  %v2179_v60 = vld [vmem:[%s2808_s0 + $0x17c] ss:$36 sps:$4 sm:$0xff]  }
  0x2f   :  { %1910 = vmatprep.subr.bf16.mxu1 %v2101_v61  ;;  %v2181_v61 = vld [vmem:[%s2808_s0 + $0x184] ss:$36 sps:$4 sm:$0xff]  }
  0x31   :  { %1847 = vmatpush3.bf16.msra.mxu0 %v2102_v62  ;;  %v2183_v62 = vld [vmem:[%s2808_s0 + $0x178] ss:$36 sps:$4 sm:$0xff]  }
  0x32   :  { %1911 = vmatpush3.bf16.msra.mxu1 %v2103_v63  ;;  %1848 = vmatprep.subr.bf16.mxu0 %v2110_v3  ;;  %v2184_v63 = vld [vmem:[%s2808_s0 + $0x180] ss:$36 sps:$4 sm:$0xff]   ;;  %v2191_v3 = vld [vmem:[%s2808_s0 + $0x1c8] ss:$36 sps:$4 sm:$0xff]  }
  0x33   :  { %1095 = vmatmul.mubr.bf16.gmra.mrb[8].mxu0 %v2088_v50  ;;  %1912 = vmatprep.subr.bf16.mxu1 %v2111_v5  ;;  %v2167_v50 = vld [vmem:[%s2808_s0 + $0xf4] ss:$36 sps:$4 sm:$0xff]  }
  0x34   :  { %1192 = vmatmul.mubr.bf16.gmra.mrb[8].mxu1 %v2089_v51  ;;  %1102 = vmatprep.mubr.bf16.mxu0 %v2094_v56  ;;  %v2185_v51 = vld [vmem:[%s2807_s1 + $0x228] sm:$0xff]   ;;  %v2174_v56 = vld [vmem:[%s2808_s0 + $0x13c] ss:$36 sps:$4 sm:$0xff]   ;;  %v2195_v5 = vld [vmem:[%s2808_s0 + $0x214] ss:$36 sps:$4 sm:$0xff]  }
  0x35   :  { %1199 = vmatprep.mubr.bf16.mxu1 %v2096_v57  ;;  %1849 = vmatpush3.bf16.msra.mxu0 %v2112_v6  ;;  %v2199_v57 = vld [vmem:[%s2807_s1 + $0x238] sm:$0xff]   ;;  %v2197_v6 = vld [vmem:[%s2808_s0 + $0x208] ss:$36 sps:$4 sm:$0xff]  }
  0x36   :  { %1913 = vmatpush3.bf16.msra.mxu1 %v2113_v7  ;;  %1850 = vmatprep.subr.bf16.mxu0 %v2120_v10  ;;  %v2198_v7 = vld [vmem:[%s2808_s0 + $0x210] ss:$36 sps:$4 sm:$0xff]   ;;  %v2202_v10 = vld [vmem:[%s2808_s0 + $0x68] ss:$36 sps:$4 sm:$0xff]  }
  0x37   :  { %1914 = vmatprep.subr.bf16.mxu1 %v2121_v11  ;;  %v2203_v11 = vld [vmem:[%s2808_s0 + $0x188] ss:$36 sps:$4 sm:$0xff]  }
  0x39   :  { %1851 = vmatpush3.bf16.msra.mxu0 %v2122_v13  ;;  %v2205_v13 = vld [vmem:[%s2808_s0 + $0x1d0] ss:$36 sps:$4 sm:$0xff]  }
  0x3a   :  { %1915 = vmatpush3.bf16.msra.mxu1 %v2123_v14  ;;  %1852 = vmatprep.subr.bf16.mxu0 %v2130_v18  ;;  %v2206_v14 = vld [vmem:[%s2808_s0 + $0xf8] ss:$36 sps:$4 sm:$0xff]   ;;  %v2663_v18 = vld [vmem:[%s2809_s2] ss:$0 sm:$0xff] }
  0x3b   :  { %1103 = vmatmul.mubr.bf16.gmra.mrb[12].mxu0 %v2098_v58  ;;  %1916 = vmatprep.subr.bf16.mxu1 %v2131_v19  ;;  %v2176_v58 = vld [vmem:[%s2808_s0 + $0x130] ss:$36 sps:$4 sm:$0xff]  }
  0x3c   :  { %1200 = vmatmul.mubr.bf16.gmra.mrb[12].mxu1 %v2099_v59  ;;  %1110 = vmatprep.mubr.bf16.mxu0 %v2104_v0  ;;  %v2177_v59 = vld [vmem:[%s2808_s0 + $0x138] ss:$36 sps:$4 sm:$0xff]   ;;  %v2186_v0 = vld [vmem:[%s2808_s0 + $0x1c4] ss:$36 sps:$4 sm:$0xff]  }
  0x3d   :  { %1207 = vmatprep.mubr.bf16.mxu1 %v2106_v1  ;;  %1853 = vmatpush3.bf16.msra.mxu0 %v2132_v20  ;;  %v2188_v1 = vld [vmem:[%s2808_s0 + $0x1cc] ss:$36 sps:$4 sm:$0xff]  }
  0x3e   :  { %1917 = vmatpush3.bf16.msra.mxu1 %v2133_v21  ;;  %1854 = vmatprep.subr.bf16.mxu0 %v2140_v26 }
  0x3f   :  { %1918 = vmatprep.subr.bf16.mxu1 %v2141_v27 }
  0x41   :  { %1855 = vmatpush3.bf16.msra.mxu0 %v2142_v28 }
  0x42   :  { %1919 = vmatpush3.bf16.msra.mxu1 %v2143_v29  ;;  %1984 = vmatprep.subr.bf16.mxu0 %v2150_v32 }
  0x43   :  { %1111 = vmatmul.mubr.bf16.gmra.mrb[16].mxu0 %v2108_v2  ;;  %2016 = vmatprep.subr.bf16.mxu1 %v2150_v32  ;;  %v2190_v2 = vld [vmem:[%s2808_s0 + $0x1c0] ss:$36 sps:$4 sm:$0xff]  }
  0x44   :  { %1208 = vmatmul.mubr.bf16.gmra.mrb[16].mxu1 %v2109_v4  ;;  %1118 = vmatprep.mubr.bf16.mxu0 %v2114_v8  ;;  %v2193_v4 = vld [vmem:[%s2808_s0 + $0x20c] ss:$36 sps:$4 sm:$0xff]   ;;  %v2200_v8 = vld [vmem:[%s2808_s0 + $0x20] ss:$36 sps:$4 sm:$0xff]  }
  0x45   :  { %1215 = vmatprep.mubr.bf16.mxu1 %v2116_v9  ;;  %v2201_v9 = vld [vmem:[%s2808_s0 + $0x140] ss:$36 sps:$4 sm:$0xff]  }
  0x4b   :  { %1119 = vmatmul.mubr.bf16.gmra.mrb[20].mxu0 %v2118_v12  ;;  %v2204_v12 = vld [vmem:[%s2808_s0 + $0xb0] ss:$36 sps:$4 sm:$0xff]  }
  0x4c   :  { %1216 = vmatmul.mubr.bf16.gmra.mrb[20].mxu1 %v2119_v15  ;;  %1126 = vmatprep.mubr.bf16.mxu0 %v2124_v16  ;;  %v2207_v15 = vld [vmem:[%s2808_s0 + $0x218] ss:$36 sps:$4 sm:$0xff]  }
  0x4d   :  { %1223 = vmatprep.mubr.bf16.mxu1 %v2126_v17 }
  0x53   :  { %1127 = vmatmul.mubr.bf16.gmra.mrb[24].mxu0 %v2128_v22 }
  0x54   :  { %1224 = vmatmul.mubr.bf16.gmra.mrb[24].mxu1 %v2129_v23  ;;  %1134 = vmatprep.mubr.bf16.mxu0 %v2134_v24 }
  0x55   :  { %1231 = vmatprep.mubr.bf16.mxu1 %v2136_v25 }
  0x5b   :  { %1135 = vmatmul.mubr.bf16.gmra.mrb[28].mxu0 %v2138_v30 }
  0x5c   :  { %1232 = vmatmul.mubr.bf16.gmra.mrb[28].mxu1 %v2139_v31  ;;  %1272 = vmatprep.mubr.bf16.mxu0 %v2146_v33 }
  0x5d   :  { %1369 = vmatprep.mubr.bf16.mxu1 %v2149_v34 }
  0x63   :  { %1273 = vmatmul.mubr.bf16.vlgmr.msra.gmra.mrb[32].mxu0 %v2144_v35 }
  0x64   :  { %1370 = vmatmul.mubr.bf16.vlgmr.msra.gmra.mrb[32].mxu1 %v2147_v36  ;;  %1985 = vmatpush3.bf16.msra.mxu0 %v2150_v32 }
  0x65   :  { %2024 = vmatpush3.bf16.msra.mxu1 %v2150_v32  ;;  %1280 = vmatprep.mubr.bf16.mxu0 %v2151_v37 }
  0x66   :  { %1377 = vmatprep.mubr.bf16.mxu1 %v2153_v38  ;;  %1986 = vmatprep.subr.bf16.mxu0 %v2157_v39 }
  0x67   :  { %2017 = vmatprep.subr.bf16.mxu1 %v2157_v39 }
  0x68   :  { %1987 = vmatpush3.bf16.msra.mxu0 %v2157_v39 }
  0x69   :  { %2025 = vmatpush3.bf16.msra.mxu1 %v2157_v39  ;;  %1988 = vmatprep.subr.bf16.mxu0 %v2164_v40 }
  0x6a   :  { %2018 = vmatprep.subr.bf16.mxu1 %v2164_v40 }
  0x6b   :  { %1281 = vmatmul.mubr.bf16.gmra.mrb[36].mxu0 %v2155_v41 }
  0x6c   :  { %1378 = vmatmul.mubr.bf16.gmra.mrb[36].mxu1 %v2156_v42  ;;  %1288 = vmatprep.mubr.bf16.mxu0 %v2158_v43 }
  0x6d   :  { %1385 = vmatprep.mubr.bf16.mxu1 %v2160_v44  ;;  %1989 = vmatpush3.bf16.msra.mxu0 %v2164_v40 }
  0x6e   :  { %2026 = vmatpush3.bf16.msra.mxu1 %v2164_v40  ;;  %1990 = vmatprep.subr.bf16.mxu0 %v2171_v45 }
  0x6f   :  { %2019 = vmatprep.subr.bf16.mxu1 %v2171_v45 }
  0x71   :  { %1991 = vmatpush3.bf16.msra.mxu0 %v2171_v45 }
  0x72   :  { %2027 = vmatpush3.bf16.msra.mxu1 %v2171_v45  ;;  %1992 = vmatprep.subr.bf16.mxu0 %v2178_v46 }
  0x73   :  { %1289 = vmatmul.mubr.bf16.gmra.mrb[40].mxu0 %v2162_v47  ;;  %2020 = vmatprep.subr.bf16.mxu1 %v2178_v46 }
  0x74   :  { %1386 = vmatmul.mubr.bf16.gmra.mrb[40].mxu1 %v2163_v48  ;;  %1296 = vmatprep.mubr.bf16.mxu0 %v2165_v49 }
  0x75   :  { %1393 = vmatprep.mubr.bf16.mxu1 %v2167_v50  ;;  %1993 = vmatpush3.bf16.msra.mxu0 %v2178_v46 }
  0x76   :  { %2028 = vmatpush3.bf16.msra.mxu1 %v2178_v46  ;;  %1994 = vmatprep.subr.bf16.mxu0 %v2185_v51 }
  0x77   :  { %2021 = vmatprep.subr.bf16.mxu1 %v2185_v51 }
  0x79   :  { %1995 = vmatpush3.bf16.msra.mxu0 %v2185_v51 }
  0x7a   :  { %2029 = vmatpush3.bf16.msra.mxu1 %v2185_v51  ;;  %1996 = vmatprep.subr.bf16.mxu0 %v2192_v53 }
  0x7b   :  { %1297 = vmatmul.mubr.bf16.gmra.mrb[44].mxu0 %v2169_v52  ;;  %2022 = vmatprep.subr.bf16.mxu1 %v2192_v53 }
  0x7c   :  { %1394 = vmatmul.mubr.bf16.gmra.mrb[44].mxu1 %v2170_v54  ;;  %1304 = vmatprep.mubr.bf16.mxu0 %v2172_v55 }
  0x7d   :  { %1401 = vmatprep.mubr.bf16.mxu1 %v2174_v56  ;;  %1997 = vmatpush3.bf16.msra.mxu0 %v2192_v53 }
  0x7e   :  { %2030 = vmatpush3.bf16.msra.mxu1 %v2192_v53  ;;  %1998 = vmatprep.subr.bf16.mxu0 %v2199_v57 }
  0x7f   :  { %2023 = vmatprep.subr.bf16.mxu1 %v2199_v57 }
  0x81   :  { %1999 = vmatpush3.bf16.msra.mxu0 %v2199_v57 }
  0x82   :  { %2031 = vmatpush3.bf16.msra.mxu1 %v2199_v57 }
  0x83   :  { %1305 = vmatmul.mubr.bf16.gmra.mrb[48].mxu0 %v2176_v58 }
  0x84   :  { %1402 = vmatmul.mubr.bf16.gmra.mrb[48].mxu1 %v2177_v59  ;;  %1312 = vmatprep.mubr.bf16.mxu0 %v2179_v60 }
  0x85   :  { %1409 = vmatprep.mubr.bf16.mxu1 %v2181_v61 }
  0x8b   :  { %1313 = vmatmul.mubr.bf16.gmra.mrb[52].mxu0 %v2183_v62 }
  0x8c   :  { %1410 = vmatmul.mubr.bf16.gmra.mrb[52].mxu1 %v2184_v63  ;;  %1320 = vmatprep.mubr.bf16.mxu0 %v2186_v0 }
  0x8d   :  { %1417 = vmatprep.mubr.bf16.mxu1 %v2188_v1 }
  0x93   :  { %1321 = vmatmul.mubr.bf16.gmra.mrb[56].mxu0 %v2190_v2 }
  0x94   :  { %1418 = vmatmul.mubr.bf16.gmra.mrb[56].mxu1 %v2191_v3  ;;  %1328 = vmatprep.mubr.bf16.mxu0 %v2193_v4 }
  0x95   :  { %1425 = vmatprep.mubr.bf16.mxu1 %v2195_v5 }
  0x9b   :  { %1329 = vmatmul.mubr.bf16.gmra.mrb[60].mxu0 %v2197_v6 }
  0x9c   :  { %1426 = vmatmul.mubr.bf16.gmra.mrb[60].mxu1 %v2198_v7  ;;  %2000 = vmatprep.mubr.bf16.mxu0 %v2200_v8 }
  0x9d   :  { %2008 = vmatprep.mubr.bf16.mxu1 %v2201_v9 }
  0xa3   :  { %2001 = vmatmul.mubr.bf16.vlgmr.msra.gmra.mrb[64].mxu0 %v2202_v10 }
  0xa4   :  { %2009 = vmatmul.mubr.bf16.vlgmr.msra.gmra.mrb[64].mxu1 %v2203_v11  ;;  %2004 = vmatprep.mubr.bf16.mxu0 %v2204_v12 }
  0xa5   :  { %2012 = vmatprep.mubr.bf16.mxu1 %v2205_v13 }
  0xab   :  { %2005 = vmatmul.mubr.bf16.gmra.mrb[68].mxu0 %v2206_v14 }
  0xac   :  { %2013 = vmatmul.mubr.bf16.gmra.mrb[68].mxu1 %v2207_v15 }
  0xf6   :  { %v1728_v16 = vpop.f32.mrb[0].mxu0 }
  0xf7   :  { %v1792_v17 = vpop.f32.mrb[0].mxu1  ;;  %v1729_v19 = vpop.f32.mrb[1].mxu0 }
  0xf8   :  { %v1730_v20 = vadd.f32 %v1729_v19, %v1728_v16  ;;  %v1793_v21 = vpop.f32.mrb[1].mxu1  ;;  %v1731_v22 = vpop.f32.mrb[2].mxu0 }
  0xf9   :  { %v1794_v23 = vadd.f32 %v1793_v21, %v1792_v17  ;;  %v1795_v24 = vpop.f32.mrb[2].mxu1  ;;  %v1732_v25 = vpop.f32.mrb[3].mxu0 }
  0xfa   :  { %v1081_v26 = vadd.f32 %v1730_v20, %v2663_v18  ;;  %v1733_v27 = vadd.f32 %v1732_v25, %v1731_v22  ;;  %v1796_v28 = vpop.f32.mrb[3].mxu1 }
  0xfb   :  { %v1797_v29 = vadd.f32 %v1796_v28, %v1795_v24 }
  0xfc   :  { %v2666_v30 = vadd.f32 %v1794_v23, %v1081_v26  ;;  %v1084_v31 = vadd.f32 %v1733_v27, %v2663_v18 }
  0xfe   :  { %v2669_v32 = vadd.f32 %v1797_v29, %v1084_v31  ;;  %v1734_v33 = vpop.f32.mrb[4].mxu0 }
  0xff   :  { %v1798_v34 = vpop.f32.mrb[4].mxu1  ;;  %v1735_v35 = vpop.f32.mrb[5].mxu0 }
 0x100   :  { %v1736_v36 = vadd.f32 %v1735_v35, %v1734_v33  ;;  %v1799_v37 = vpop.f32.mrb[5].mxu1  ;;  %v1737_v38 = vpop.f32.mrb[6].mxu0 }
 0x101   :  { %v1800_v39 = vadd.f32 %v1799_v37, %v1798_v34  ;;  %v1801_v40 = vpop.f32.mrb[6].mxu1  ;;  %v1738_v41 = vpop.f32.mrb[7].mxu0 }
 0x102   :  { %v1089_v42 = vadd.f32 %v1736_v36, %v2663_v18  ;;  %v1739_v43 = vadd.f32 %v1738_v41, %v1737_v38  ;;  %v1802_v44 = vpop.f32.mrb[7].mxu1 }
 0x103   :  { %v1803_v45 = vadd.f32 %v1802_v44, %v1801_v40 }
 0x104   :  { %v2672_v46 = vadd.f32 %v1800_v39, %v1089_v42  ;;  %v1092_v47 = vadd.f32 %v1739_v43, %v2663_v18 }
 0x106   :  { %v2675_v48 = vadd.f32 %v1803_v45, %v1092_v47  ;;  %v1740_v49 = vpop.f32.mrb[8].mxu0 }
 0x107   :  { %v1804_v50 = vpop.f32.mrb[8].mxu1  ;;  %v1741_v51 = vpop.f32.mrb[9].mxu0 }
 0x108   :  { %v1742_v52 = vadd.f32 %v1741_v51, %v1740_v49  ;;  %v1805_v53 = vpop.f32.mrb[9].mxu1  ;;  %v1743_v54 = vpop.f32.mrb[10].mxu0 }
 0x109   :  { %v1806_v55 = vadd.f32 %v1805_v53, %v1804_v50  ;;  %v1807_v56 = vpop.f32.mrb[10].mxu1  ;;  %v1744_v57 = vpop.f32.mrb[11].mxu0 }
 0x10a   :  { %v1097_v58 = vadd.f32 %v1742_v52, %v2663_v18  ;;  %v1745_v59 = vadd.f32 %v1744_v57, %v1743_v54  ;;  %v1808_v60 = vpop.f32.mrb[11].mxu1 }
 0x10b   :  { %v1809_v61 = vadd.f32 %v1808_v60, %v1807_v56 }
 0x10c   :  { %v2678_v62 = vadd.f32 %v1806_v55, %v1097_v58  ;;  %v1100_v63 = vadd.f32 %v1745_v59, %v2663_v18 }
 0x10e   :  { %v2681_v0 = vadd.f32 %v1809_v61, %v1100_v63  ;;  %v1746_v1 = vpop.f32.mrb[12].mxu0 }
 0x10f   :  { %v1810_v2 = vpop.f32.mrb[12].mxu1  ;;  %v1747_v3 = vpop.f32.mrb[13].mxu0 }
 0x110   :  { %v1748_v4 = vadd.f32 %v1747_v3, %v1746_v1  ;;  %v1811_v5 = vpop.f32.mrb[13].mxu1  ;;  %v1749_v6 = vpop.f32.mrb[14].mxu0 }
 0x111   :  { %v1812_v7 = vadd.f32 %v1811_v5, %v1810_v2  ;;  %v1813_v8 = vpop.f32.mrb[14].mxu1  ;;  %v1750_v9 = vpop.f32.mrb[15].mxu0 }
 0x112   :  { %v1105_v10 = vadd.f32 %v1748_v4, %v2663_v18  ;;  %v1751_v11 = vadd.f32 %v1750_v9, %v1749_v6  ;;  %v1814_v12 = vpop.f32.mrb[15].mxu1 }
 0x113   :  { %v1815_v13 = vadd.f32 %v1814_v12, %v1813_v8 }
 0x114   :  { %v2684_v14 = vadd.f32 %v1812_v7, %v1105_v10  ;;  %v1108_v15 = vadd.f32 %v1751_v11, %v2663_v18 }
 0x116   :  { %v2687_v16 = vadd.f32 %v1815_v13, %v1108_v15  ;;  %v1752_v17 = vpop.f32.mrb[16].mxu0 }
 0x117   :  { %v1816_v19 = vpop.f32.mrb[16].mxu1  ;;  %v1753_v20 = vpop.f32.mrb[17].mxu0 }
 0x118   :  { %v1754_v21 = vadd.f32 %v1753_v20, %v1752_v17  ;;  %v1817_v22 = vpop.f32.mrb[17].mxu1  ;;  %v1755_v23 = vpop.f32.mrb[18].mxu0 }
 0x119   :  { %v1818_v24 = vadd.f32 %v1817_v22, %v1816_v19  ;;  %v1819_v25 = vpop.f32.mrb[18].mxu1  ;;  %v1756_v26 = vpop.f32.mrb[19].mxu0 }
 0x11a   :  { %v1113_v27 = vadd.f32 %v1754_v21, %v2663_v18  ;;  %v1757_v28 = vadd.f32 %v1756_v26, %v1755_v23  ;;  %v1820_v29 = vpop.f32.mrb[19].mxu1 }
 0x11b   :  { %v1821_v31 = vadd.f32 %v1820_v29, %v1819_v25 }
 0x11c   :  { %v2690_v33 = vadd.f32 %v1818_v24, %v1113_v27  ;;  %v1116_v34 = vadd.f32 %v1757_v28, %v2663_v18 }
 0x11e   :  { %v2693_v35 = vadd.f32 %v1821_v31, %v1116_v34  ;;  %v1758_v36 = vpop.f32.mrb[20].mxu0 }
 0x11f   :  { %v1822_v37 = vpop.f32.mrb[20].mxu1  ;;  %v1759_v38 = vpop.f32.mrb[21].mxu0 }
 0x120   :  { %v1760_v39 = vadd.f32 %v1759_v38, %v1758_v36  ;;  %v1823_v40 = vpop.f32.mrb[21].mxu1  ;;  %v1761_v41 = vpop.f32.mrb[22].mxu0 }
 0x121   :  { %v1824_v42 = vadd.f32 %v1823_v40, %v1822_v37  ;;  %v1825_v43 = vpop.f32.mrb[22].mxu1  ;;  %v1762_v44 = vpop.f32.mrb[23].mxu0 }
 0x122   :  { %v1121_v45 = vadd.f32 %v1760_v39, %v2663_v18  ;;  %v1763_v47 = vadd.f32 %v1762_v44, %v1761_v41  ;;  %v1826_v49 = vpop.f32.mrb[23].mxu1 }
 0x123   :  { %v1827_v50 = vadd.f32 %v1826_v49, %v1825_v43 }
 0x124   :  { %v2696_v51 = vadd.f32 %v1824_v42, %v1121_v45  ;;  %v1124_v52 = vadd.f32 %v1763_v47, %v2663_v18 }
 0x126   :  { %v2699_v53 = vadd.f32 %v1827_v50, %v1124_v52  ;;  %v1764_v54 = vpop.f32.mrb[24].mxu0 }
 0x127   :  { %v1828_v55 = vpop.f32.mrb[24].mxu1  ;;  %v1765_v56 = vpop.f32.mrb[25].mxu0 }
 0x128   :  { %v1766_v57 = vadd.f32 %v1765_v56, %v1764_v54  ;;  %v1829_v58 = vpop.f32.mrb[25].mxu1  ;;  %v1767_v59 = vpop.f32.mrb[26].mxu0 }
 0x129   :  { %v1830_v60 = vadd.f32 %v1829_v58, %v1828_v55  ;;  %v1831_v61 = vpop.f32.mrb[26].mxu1  ;;  %v1768_v63 = vpop.f32.mrb[27].mxu0 }
 0x12a   :  { %v1129_v1 = vadd.f32 %v1766_v57, %v2663_v18  ;;  %v1769_v2 = vadd.f32 %v1768_v63, %v1767_v59  ;;  %v1832_v3 = vpop.f32.mrb[27].mxu1 }
 0x12b   :  { %v1833_v4 = vadd.f32 %v1832_v3, %v1831_v61 }
 0x12c   :  { %v2702_v5 = vadd.f32 %v1830_v60, %v1129_v1  ;;  %v1132_v6 = vadd.f32 %v1769_v2, %v2663_v18 }
 0x12e   :  { %v2705_v7 = vadd.f32 %v1833_v4, %v1132_v6  ;;  %v1770_v8 = vpop.f32.mrb[28].mxu0 }
 0x12f   :  { %v1834_v9 = vpop.f32.mrb[28].mxu1  ;;  %v1771_v10 = vpop.f32.mrb[29].mxu0 }
 0x130   :  { %v1772_v11 = vadd.f32 %v1771_v10, %v1770_v8  ;;  %v1835_v12 = vpop.f32.mrb[29].mxu1  ;;  %v1773_v13 = vpop.f32.mrb[30].mxu0 }
 0x131   :  { %v1836_v15 = vadd.f32 %v1835_v12, %v1834_v9  ;;  %v1837_v17 = vpop.f32.mrb[30].mxu1  ;;  %v1774_v19 = vpop.f32.mrb[31].mxu0 }
 0x132   :  { %v1137_v20 = vadd.f32 %v1772_v11, %v2663_v18  ;;  %v1775_v21 = vadd.f32 %v1774_v19, %v1773_v13  ;;  %v1838_v22 = vpop.f32.mrb[31].mxu1 }
 0x133   :  { %v1839_v23 = vadd.f32 %v1838_v22, %v1837_v17 }
 0x134   :  { %v2708_v24 = vadd.f32 %v1836_v15, %v1137_v20  ;;  %v1140_v25 = vadd.f32 %v1775_v21, %v2663_v18 }
 0x136   :  { %v2711_v26 = vadd.f32 %v1839_v23, %v1140_v25  ;;  %v1856_v27 = vpop.f32.mrb[32].mxu0 }
 0x137   :  { %v1920_v28 = vpop.f32.mrb[32].mxu1  ;;  %v1857_v29 = vpop.f32.mrb[33].mxu0 }
 0x138   :  { %v1858_v31 = vadd.f32 %v1857_v29, %v1856_v27  ;;  %v1921_v34 = vpop.f32.mrb[33].mxu1  ;;  %v1859_v36 = vpop.f32.mrb[34].mxu0 }
 0x139   :  { %v1922_v37 = vadd.f32 %v1921_v34, %v1920_v28  ;;  %v1923_v38 = vpop.f32.mrb[34].mxu1  ;;  %v1860_v39 = vpop.f32.mrb[35].mxu0 }
 0x13a   :  { %v1275_v40 = vadd.f32 %v1858_v31, %v2666_v30  ;;  %v1861_v41 = vadd.f32 %v1860_v39, %v1859_v36  ;;  %v1924_v42 = vpop.f32.mrb[35].mxu1 }
 0x13b   :  { %v1925_v43 = vadd.f32 %v1924_v42, %v1923_v38 }
 0x13c   :  { %v1278_v44 = vadd.f32 %v1861_v41, %v2669_v32  ;;  %v2715_v45 = vadd.f32 %v1922_v37, %v1275_v40 }
 0x13e   :  { %v1862_v18 = vpop.f32.mrb[36].mxu0  ;;  %v2717_v47 = vadd.f32 %v1925_v43, %v1278_v44 }
 0x13f   :  { %v1926_v49 = vpop.f32.mrb[36].mxu1  ;;  %v1863_v50 = vpop.f32.mrb[37].mxu0 }
 0x140   :  { %v1864_v52 = vadd.f32 %v1863_v50, %v1862_v18  ;;  %v1927_v54 = vpop.f32.mrb[37].mxu1  ;;  %v1865_v55 = vpop.f32.mrb[38].mxu0 }
 0x141   :  { %v1928_v56 = vadd.f32 %v1927_v54, %v1926_v49  ;;  %v1929_v57 = vpop.f32.mrb[38].mxu1  ;;  %v1866_v58 = vpop.f32.mrb[39].mxu0 }
 0x142   :  { %v1283_v30 = vadd.f32 %v1864_v52, %v2672_v46  ;;  %v1867_v59 = vadd.f32 %v1866_v58, %v1865_v55  ;;  %v1930_v60 = vpop.f32.mrb[39].mxu1 }
 0x143   :  { %v1931_v61 = vadd.f32 %v1930_v60, %v1929_v57 }
 0x144   :  { %v1286_v32 = vadd.f32 %v1867_v59, %v2675_v48  ;;  %v2721_v63 = vadd.f32 %v1928_v56, %v1283_v30 }
 0x146   :  { %v1868_v1 = vpop.f32.mrb[40].mxu0  ;;  %v2723_v2 = vadd.f32 %v1931_v61, %v1286_v32 }
 0x147   :  { %v1932_v3 = vpop.f32.mrb[40].mxu1  ;;  %v1869_v4 = vpop.f32.mrb[41].mxu0 }
 0x148   :  { %v1870_v6 = vadd.f32 %v1869_v4, %v1868_v1  ;;  %v1933_v8 = vpop.f32.mrb[41].mxu1  ;;  %v1871_v9 = vpop.f32.mrb[42].mxu0 }
 0x149   :  { %v1934_v10 = vadd.f32 %v1933_v8, %v1932_v3  ;;  %v1935_v11 = vpop.f32.mrb[42].mxu1  ;;  %v1872_v12 = vpop.f32.mrb[43].mxu0 }
 0x14a   :  { %v1291_v46 = vadd.f32 %v1870_v6, %v2678_v62  ;;  %v1873_v13 = vadd.f32 %v1872_v12, %v1871_v9  ;;  %v1936_v15 = vpop.f32.mrb[43].mxu1 }
 0x14b   :  { %v1937_v17 = vadd.f32 %v1936_v15, %v1935_v11 }
 0x14c   :  { %v1294_v48 = vadd.f32 %v1873_v13, %v2681_v0  ;;  %v2727_v19 = vadd.f32 %v1934_v10, %v1291_v46 }
 0x14e   :  { %v1874_v20 = vpop.f32.mrb[44].mxu0  ;;  %v2729_v21 = vadd.f32 %v1937_v17, %v1294_v48 }
 0x14f   :  { %v1938_v22 = vpop.f32.mrb[44].mxu1  ;;  %v1875_v23 = vpop.f32.mrb[45].mxu0 }
 0x150   :  { %v1876_v25 = vadd.f32 %v1875_v23, %v1874_v20  ;;  %v1939_v27 = vpop.f32.mrb[45].mxu1  ;;  %v1877_v28 = vpop.f32.mrb[46].mxu0 }
 0x151   :  { %v1940_v29 = vadd.f32 %v1939_v27, %v1938_v22  ;;  %v1941_v31 = vpop.f32.mrb[46].mxu1  ;;  %v1878_v34 = vpop.f32.mrb[47].mxu0 }
 0x152   :  { %v1299_v62 = vadd.f32 %v1876_v25, %v2684_v14  ;;  %v1879_v36 = vadd.f32 %v1878_v34, %v1877_v28  ;;  %v1942_v37 = vpop.f32.mrb[47].mxu1 }
 0x153   :  { %v1943_v38 = vadd.f32 %v1942_v37, %v1941_v31 }
 0x154   :  { %v1302_v0 = vadd.f32 %v1879_v36, %v2687_v16  ;;  %v2733_v39 = vadd.f32 %v1940_v29, %v1299_v62 }
 0x156   :  { %v1880_v40 = vpop.f32.mrb[48].mxu0  ;;  %v2735_v41 = vadd.f32 %v1943_v38, %v1302_v0 }
 0x157   :  { %v1944_v42 = vpop.f32.mrb[48].mxu1  ;;  %v1881_v43 = vpop.f32.mrb[49].mxu0 }
 0x158   :  { %v1882_v44 = vadd.f32 %v1881_v43, %v1880_v40  ;;  %v1945_v18 = vpop.f32.mrb[49].mxu1  ;;  %v1883_v49 = vpop.f32.mrb[50].mxu0 }
 0x159   :  { %v1946_v50 = vadd.f32 %v1945_v18, %v1944_v42  ;;  %v1947_v52 = vpop.f32.mrb[50].mxu1  ;;  %v1884_v54 = vpop.f32.mrb[51].mxu0 }
 0x15a   :  { %v1307_v14 = vadd.f32 %v1882_v44, %v2690_v33  ;;  %v1885_v55 = vadd.f32 %v1884_v54, %v1883_v49  ;;  %v1948_v56 = vpop.f32.mrb[51].mxu1 }
 0x15b   :  { %v1949_v57 = vadd.f32 %v1948_v56, %v1947_v52 }
 0x15c   :  { %v1310_v16 = vadd.f32 %v1885_v55, %v2693_v35  ;;  %v1404_v58 = vadd.f32 %v1946_v50, %v1307_v14 }
 0x15e   :  { %v1886_v30 = vpop.f32.mrb[52].mxu0  ;;  %v2739_v59 = vadd.f32 %v1949_v57, %v1310_v16 }
 0x15f   :  { %v1950_v60 = vpop.f32.mrb[52].mxu1  ;;  %v1887_v61 = vpop.f32.mrb[53].mxu0 }
 0x160   :  { %v1888_v32 = vadd.f32 %v1887_v61, %v1886_v30  ;;  %v1951_v1 = vpop.f32.mrb[53].mxu1  ;;  %v1889_v3 = vpop.f32.mrb[54].mxu0 }
 0x161   :  { %v1952_v4 = vadd.f32 %v1951_v1, %v1950_v60  ;;  %v1953_v6 = vpop.f32.mrb[54].mxu1  ;;  %v1890_v8 = vpop.f32.mrb[55].mxu0 }
 0x162   :  { %v1315_v9 = vadd.f32 %v1888_v32, %v2696_v51  ;;  %v1891_v33 = vadd.f32 %v1890_v8, %v1889_v3  ;;  %v1954_v10 = vpop.f32.mrb[55].mxu1 }
 0x163   :  { %v1955_v11 = vadd.f32 %v1954_v10, %v1953_v6 }
 0x164   :  { %v1318_v12 = vadd.f32 %v1891_v33, %v2699_v53  ;;  %v1412_v35 = vadd.f32 %v1952_v4, %v1315_v9 }
 0x166   :  { %v1892_v46 = vpop.f32.mrb[56].mxu0  ;;  %v1415_v13 = vadd.f32 %v1955_v11, %v1318_v12 }
 0x167   :  { %v1956_v15 = vpop.f32.mrb[56].mxu1  ;;  %v1893_v17 = vpop.f32.mrb[57].mxu0 }
 0x168   :  { %v1894_v48 = vadd.f32 %v1893_v17, %v1892_v46  ;;  %v1957_v20 = vpop.f32.mrb[57].mxu1  ;;  %v1895_v22 = vpop.f32.mrb[58].mxu0 }
 0x169   :  { %v1958_v23 = vadd.f32 %v1957_v20, %v1956_v15  ;;  %v1959_v25 = vpop.f32.mrb[58].mxu1  ;;  %v1896_v27 = vpop.f32.mrb[59].mxu0 }
 0x16a   :  { %v1323_v28 = vadd.f32 %v1894_v48, %v2702_v5  ;;  %v1897_v29 = vadd.f32 %v1896_v27, %v1895_v22  ;;  %v1960_v51 = vpop.f32.mrb[59].mxu1 }
 0x16b   :  { %v1961_v31 = vadd.f32 %v1960_v51, %v1959_v25 }
 0x16c   :  { %v1326_v34 = vadd.f32 %v1897_v29, %v2705_v7  ;;  %v1420_v62 = vadd.f32 %v1958_v23, %v1323_v28 }
 0x16e   :  { %v1898_v53 = vpop.f32.mrb[60].mxu0  ;;  %v2745_v36 = vadd.f32 %v1961_v31, %v1326_v34 }
 0x16f   :  { %v1962_v37 = vpop.f32.mrb[60].mxu1  ;;  %v1899_v38 = vpop.f32.mrb[61].mxu0 }
 0x170   :  { %v1900_v0 = vadd.f32 %v1899_v38, %v1898_v53  ;;  %v1963_v40 = vpop.f32.mrb[61].mxu1  ;;  %v1901_v42 = vpop.f32.mrb[62].mxu0 }
 0x171   :  { %v1964_v43 = vadd.f32 %v1963_v40, %v1962_v37  ;;  %v1965_v44 = vpop.f32.mrb[62].mxu1  ;;  %v1902_v18 = vpop.f32.mrb[63].mxu0 }
 0x172   :  { %v1331_v49 = vadd.f32 %v1900_v0, %v2708_v24  ;;  %v1903_v5 = vadd.f32 %v1902_v18, %v1901_v42  ;;  %v1966_v50 = vpop.f32.mrb[63].mxu1 }
 0x173   :  { %v1967_v52 = vadd.f32 %v1966_v50, %v1965_v44 }
 0x174   :  { %v1334_v54 = vadd.f32 %v1903_v5, %v2711_v26  ;;  %v1428_v7 = vadd.f32 %v1964_v43, %v1331_v49 }
 0x176   :  { %v2002_v14 = vpop.f32.mrb[64].mxu0  ;;  %v1431_v55 = vadd.f32 %v1967_v52, %v1334_v54 }
 0x177   :  { %v1477_v56 = vadd.f32 %v2002_v14, %v2721_v63  ;;  %v2010_v57 = vpop.f32.mrb[64].mxu1  ;;  %v1468_v16 = vpop.f32.mrb[65].mxu0 }
 0x178   :  { %v1509_v30 = vadd.f32 %v2010_v57, %v1412_v35  ;;  %v1469_v60 = vadd.f32 %v1468_v16, %v2715_v45  ;;  %v1500_v61 = vpop.f32.mrb[65].mxu1  ;;  %v2003_v32 = vpop.f32.mrb[66].mxu0 }
 0x179   :  { %v1533_v1 = vmax.f32 %v1477_v56, 0.0  ;;  %v1501_v3 = vadd.f32 %v1500_v61, %v1404_v58  ;;  %v1480_v24 = vadd.f32 %v2003_v32, %v2723_v2  ;;  %v2011_v4 = vpop.f32.mrb[66].mxu1  ;;  %v1471_v6 = vpop.f32.mrb[67].mxu0 }
 0x17a   :  { %v1541_v8 = vmax.f32 %v1509_v30, 0.0  ;;  %v1531_v26 = vmax.f32 %v1469_v60, 0.0  ;;  %v1512_v9 = vadd.f32 %v2011_v4, %v1415_v13  ;;  %v1472_v33 = vadd.f32 %v1471_v6, %v2717_v47  ;;  %v1503_v10 = vpop.f32.mrb[67].mxu1 }
 0x17b   :  { %1549 = vst [vmem:[%s2810_s3 + $0x10] sm:$0xff] %v1533_v1  ;;  %v1539_v63 = vmax.f32 %v1501_v3, 0.0  ;;  %v1534_v45 = vmax.f32 %v1480_v24, 0.0  ;;  %v1504_v11 = vadd.f32 %v1503_v10, %v2739_v59 }
 0x17c   :  { %1557 = vst [vmem:[%s2810_s3 + $0x50] sm:$0xff] %v1541_v8  ;;  %1547 = vst [vmem:[%s2810_s3] sm:$0xff] %v1531_v26  ;;  %v1542_v2 = vmax.f32 %v1512_v9, 0.0  ;;  %v1532_v58 = vmax.f32 %v1472_v33, 0.0 }
 0x17d   :  { %1555 = vst [vmem:[%s2810_s3 + $0x40] sm:$0xff] %v1539_v63  ;;  %1550 = vst [vmem:[%s2810_s3 + $0x18] sm:$0xff] %v1534_v45  ;;  %v1540_v47 = vmax.f32 %v1504_v11, 0.0 }
 0x17e   :  { %1558 = vst [vmem:[%s2810_s3 + $0x58] sm:$0xff] %v1542_v2  ;;  %1548 = vst [vmem:[%s2810_s3 + $0x8] sm:$0xff] %v1532_v58  ;;  %v2006_v59 = vpop.f32.mrb[68].mxu0 }
 0x17f   :  { %1556 = vst [vmem:[%s2810_s3 + $0x48] sm:$0xff] %v1540_v47  ;;  %v1493_v12 = vadd.f32 %v2006_v59, %v2733_v39  ;;  %v2014_v35 = vpop.f32.mrb[68].mxu1  ;;  %v1484_v46 = vpop.f32.mrb[69].mxu0 }
 0x180   :  { %v1525_v13 = vadd.f32 %v2014_v35, %v1428_v7  ;;  %v1485_v15 = vadd.f32 %v1484_v46, %v2727_v19  ;;  %v1516_v17 = vpop.f32.mrb[69].mxu1  ;;  %v2007_v48 = vpop.f32.mrb[70].mxu0 }
 0x181   :  { %v1537_v20 = vmax.f32 %v1493_v12, 0.0  ;;  %v1517_v22 = vadd.f32 %v1516_v17, %v1420_v62  ;;  %v1496_v23 = vadd.f32 %v2007_v48, %v2735_v41  ;;  %v2015_v25 = vpop.f32.mrb[70].mxu1  ;;  %v1487_v27 = vpop.f32.mrb[71].mxu0 }
 0x182   :  { %v1545_v28 = vmax.f32 %v1525_v13, 0.0  ;;  %v1535_v29 = vmax.f32 %v1485_v15, 0.0  ;;  %v1528_v51 = vadd.f32 %v2015_v25, %v1431_v55  ;;  %v1488_v31 = vadd.f32 %v1487_v27, %v2729_v21  ;;  %v1519_v34 = vpop.f32.mrb[71].mxu1 }
 0x183   :  { %1553 = vst [vmem:[%s2810_s3 + $0x30] sm:$0xff] %v1537_v20  ;;  %v1543_v39 = vmax.f32 %v1517_v22, 0.0  ;;  %v1538_v19 = vmax.f32 %v1496_v23, 0.0  ;;  %v1520_v53 = vadd.f32 %v1519_v34, %v2745_v36 }
 0x184   :  { %1561 = vst [vmem:[%s2810_s3 + $0x70] sm:$0xff] %v1545_v28  ;;  %1551 = vst [vmem:[%s2810_s3 + $0x20] sm:$0xff] %v1535_v29  ;;  %v1546_v41 = vmax.f32 %v1528_v51, 0.0  ;;  %v1536_v62 = vmax.f32 %v1488_v31, 0.0 }
 0x185   :  { %1559 = vst [vmem:[%s2810_s3 + $0x60] sm:$0xff] %v1543_v39  ;;  %1554 = vst [vmem:[%s2810_s3 + $0x38] sm:$0xff] %v1538_v19  ;;  %v1544_v21 = vmax.f32 %v1520_v53, 0.0 }
 0x186   :  { %1562 = vst [vmem:[%s2810_s3 + $0x78] sm:$0xff] %v1546_v41  ;;  %1552 = vst [vmem:[%s2810_s3 + $0x28] sm:$0xff] %v1536_v62 }
 0x187   :  { %1560 = vst [vmem:[%s2810_s3 + $0x68] sm:$0xff] %v1544_v21 }

// kernel: _forward_impl.7
= control target key start
LH: loop header
LB: loop body
LE: loop exit
PB: predicated region body
PF: predicated region fallthrough
CT: control target
= control target key end

     0   :  { %14 = vsyncpa [#allocation3], 0  ;;  %v843_v47 = vmov 1983009808   ;;  %v107_v49 = vlaneseq  ;;  %s1234_s0 = inlined_call_operand.vmem [shape: f32[2,512], index: 0, kind: input, shape index: {}]   ;;  %s1235_s1 = inlined_call_operand.vmem [shape: f32[512,128], index: 1, kind: input, shape index: {}]   ;;  %s1236_s2 = inlined_call_operand.vmem [shape: f32[1,128], index: 2, kind: input, shape index: {}]   ;;  %s1237_s3 = inlined_call_operand.vmem [shape: f32[128,128], index: 3, kind: input, shape index: {}]   ;;  %s1238_s4 = inlined_call_operand.vmem [shape: f32[1,128], index: 4, kind: input, shape index: {}]   ;;  %s1239_s5 = inlined_call_operand.vmem [shape: f32[128,128], index: 5, kind: input, shape index: {}]   ;;  %s1240_s6 = inlined_call_operand.vmem [shape: f32[1,128], index: 6, kind: input, shape index: {}]   ;;  %s1241_s7 = inlined_call_operand.hbm [shape: f32[2,128], index: 7, kind: output, shape index: {0}]   ;;  %s1242_s8 = inlined_call_operand.hbm [shape: f32[2,128], index: 8, kind: output, shape index: {1}]  }
   0x1   :  { %v47_v0 = vld [vmem:[%s1235_s1 + $0x80] sm:$0xff]  ;;  %v48_v1 = vld [vmem:[%s1235_s1 + $0x88] sm:$0xff]  ;;  %v49_v11 = vld [vmem:[%s1235_s1 + $0x90] sm:$0xff]  ;;  %v105_v48 = vunpack.c.l.s4 %v843_v47 }
   0x2   :  { %v31_v2 = vld [vmem:[%s1235_s1] sm:$0xff]  ;;  %v672_v3 = vpack.c.bf16 %v48_v1, %v47_v0  ;;  %v32_v4 = vld [vmem:[%s1235_s1 + $0x8] sm:$0xff]  ;;  %v50_v13 = vld [vmem:[%s1235_s1 + $0x98] sm:$0xff]  ;;  %v108_v0 = vshrl.u32 %v107_v49, 7 }
   0x3   :  { %v79_v5 = vld [vmem:[%s1235_s1 + $0x180] sm:$0xff]  ;;  %v80_v6 = vld [vmem:[%s1235_s1 + $0x188] sm:$0xff]  ;;  %v674_v7 = vpack.c.bf16 %v32_v4, %v31_v2  ;;  %v33_v14 = vld [vmem:[%s1235_s1 + $0x10] sm:$0xff]  ;;  %v676_v16 = vpack.c.bf16 %v50_v13, %v49_v11  ;;  %v106_v63 = vunpack.c.0.s8 %v105_v48 }
   0x4   :  { %v704_v8 = vpack.c.bf16 %v80_v6, %v79_v5  ;;  %v63_v9 = vld [vmem:[%s1235_s1 + $0x100] sm:$0xff]  ;;  %v64_v10 = vld [vmem:[%s1235_s1 + $0x108] sm:$0xff]  ;;  %673 = vmatprep.subr.bf16.mxu0 %v672_v3  ;;  %v34_v15 = vld [vmem:[%s1235_s1 + $0x18] sm:$0xff] }
   0x5   :  { %v706_v12 = vpack.c.bf16 %v64_v10, %v63_v9  ;;  %675 = vmatpush3.bf16.msra.mxu0 %v674_v7  ;;  %v678_v17 = vpack.c.bf16 %v34_v15, %v33_v14  ;;  %v81_v18 = vld [vmem:[%s1235_s1 + $0x190] sm:$0xff]  ;;  %v82_v19 = vld [vmem:[%s1235_s1 + $0x198] sm:$0xff]  ;;  %v51_v23 = vld [vmem:[%s1235_s1 + $0xa0] sm:$0xff]  ;;  %v109_v13 = vsub.s32 %v106_v63, %v108_v0 }
   0x6   :  { %705 = vmatprep.subr.bf16.mxu1 %v704_v8  ;;  %v65_v20 = vld [vmem:[%s1235_s1 + $0x110] sm:$0xff]  ;;  %v708_v21 = vpack.c.bf16 %v82_v19, %v81_v18  ;;  %v66_v22 = vld [vmem:[%s1235_s1 + $0x118] sm:$0xff]  ;;  %v52_v24 = vld [vmem:[%s1235_s1 + $0xa8] sm:$0xff]  ;;  %677 = vmatprep.subr.bf16.mxu0 %v676_v16 }
   0x7   :  { %707 = vmatpush3.bf16.msra.mxu1 %v706_v12  ;;  %v710_v25 = vpack.c.bf16 %v66_v22, %v65_v20  ;;  %v680_v26 = vpack.c.bf16 %v52_v24, %v51_v23  ;;  %v35_v27 = vld [vmem:[%s1235_s1 + $0x20] sm:$0xff]  ;;  %v36_v28 = vld [vmem:[%s1235_s1 + $0x28] sm:$0xff]  ;;  %v53_v35 = vld [vmem:[%s1235_s1 + $0xb0] sm:$0xff] }
   0x8   :  { %v83_v29 = vld [vmem:[%s1235_s1 + $0x1a0] sm:$0xff]  ;;  %709 = vmatprep.subr.bf16.mxu1 %v708_v21  ;;  %v84_v30 = vld [vmem:[%s1235_s1 + $0x1a8] sm:$0xff]  ;;  %v682_v33 = vpack.c.bf16 %v36_v28, %v35_v27  ;;  %v54_v36 = vld [vmem:[%s1235_s1 + $0xb8] sm:$0xff] }
   0x9   :  { %v67_v31 = vld [vmem:[%s1235_s1 + $0x120] sm:$0xff]  ;;  %v68_v32 = vld [vmem:[%s1235_s1 + $0x128] sm:$0xff]  ;;  %679 = vmatpush3.bf16.msra.mxu0 %v678_v17  ;;  %v712_v34 = vpack.c.bf16 %v84_v30, %v83_v29  ;;  %v37_v37 = vld [vmem:[%s1235_s1 + $0x30] sm:$0xff]  ;;  %v684_v39 = vpack.c.bf16 %v54_v36, %v53_v35 }
   0xa   :  { %681 = vmatprep.subr.bf16.mxu0 %v680_v26  ;;  %v714_v38 = vpack.c.bf16 %v68_v32, %v67_v31  ;;  %v38_v40 = vld [vmem:[%s1235_s1 + $0x38] sm:$0xff]  ;;  %v85_v41 = vld [vmem:[%s1235_s1 + $0x1b0] sm:$0xff]  ;;  %v55_v46 = vld [vmem:[%s1235_s1 + $0xc0] sm:$0xff] }
   0xb   :  { %711 = vmatpush3.bf16.msra.mxu1 %v710_v25  ;;  %v86_v42 = vld [vmem:[%s1235_s1 + $0x1b8] sm:$0xff]  ;;  %v69_v44 = vld [vmem:[%s1235_s1 + $0x130] sm:$0xff]  ;;  %v56_v50 = vld [vmem:[%s1235_s1 + $0xc8] sm:$0xff]  ;;  %v686_v51 = vpack.c.bf16 %v38_v40, %v37_v37 }
   0xc   :  { %713 = vmatprep.subr.bf16.mxu1 %v712_v34  ;;  %v716_v43 = vpack.c.bf16 %v86_v42, %v85_v41  ;;  %v70_v45 = vld [vmem:[%s1235_s1 + $0x138] sm:$0xff]  ;;  %v87_v52 = vld [vmem:[%s1235_s1 + $0x1c0] sm:$0xff]  ;;  %v88_v53 = vld [vmem:[%s1235_s1 + $0x1c8] sm:$0xff]  ;;  %v688_v55 = vpack.c.bf16 %v56_v50, %v55_v46 }
   0xd   :  { %683 = vmatpush3.bf16.msra.mxu0 %v682_v33  ;;  %v718_v54 = vpack.c.bf16 %v70_v45, %v69_v44  ;;  %v39_v56 = vld [vmem:[%s1235_s1 + $0x40] sm:$0xff]  ;;  %v40_v57 = vld [vmem:[%s1235_s1 + $0x48] sm:$0xff]  ;;  %v720_v59 = vpack.c.bf16 %v88_v53, %v87_v52  ;;  %v57_v61 = vld [vmem:[%s1235_s1 + $0xd0] sm:$0xff] }
   0xe   :  { %685 = vmatprep.subr.bf16.mxu0 %v684_v39  ;;  %v71_v58 = vld [vmem:[%s1235_s1 + $0x140] sm:$0xff]  ;;  %v72_v60 = vld [vmem:[%s1235_s1 + $0x148] sm:$0xff]  ;;  %v58_v62 = vld [vmem:[%s1235_s1 + $0xd8] sm:$0xff]  ;;  %v690_v3 = vpack.c.bf16 %v40_v57, %v39_v56 }
   0xf   :  { %715 = vmatpush3.bf16.msra.mxu1 %v714_v38  ;;  %v89_v1 = vld [vmem:[%s1235_s1 + $0x1d0] sm:$0xff]  ;;  %v90_v2 = vld [vmem:[%s1235_s1 + $0x1d8] sm:$0xff]  ;;  %v722_v4 = vpack.c.bf16 %v72_v60, %v71_v58  ;;  %v692_v5 = vpack.c.bf16 %v58_v62, %v57_v61  ;;  %v59_v11 = vld [vmem:[%s1235_s1 + $0xe0] sm:$0xff] }
  0x10   :  { %717 = vmatprep.subr.bf16.mxu1 %v716_v43  ;;  %v41_v6 = vld [vmem:[%s1235_s1 + $0x50] sm:$0xff]  ;;  %v42_v7 = vld [vmem:[%s1235_s1 + $0x58] sm:$0xff]  ;;  %v724_v9 = vpack.c.bf16 %v90_v2, %v89_v1  ;;  %v60_v12 = vld [vmem:[%s1235_s1 + $0xe8] sm:$0xff] }
  0x11   :  { %687 = vmatpush3.bf16.msra.mxu0 %v686_v51  ;;  %v73_v8 = vld [vmem:[%s1235_s1 + $0x150] sm:$0xff]  ;;  %v74_v10 = vld [vmem:[%s1235_s1 + $0x158] sm:$0xff]  ;;  %v91_v14 = vld [vmem:[%s1235_s1 + $0x1e0] sm:$0xff]  ;;  %v694_v16 = vpack.c.bf16 %v42_v7, %v41_v6  ;;  %v696_v19 = vpack.c.bf16 %v60_v12, %v59_v11 }
  0x12   :  { %689 = vmatprep.subr.bf16.mxu0 %v688_v55  ;;  %v92_v15 = vld [vmem:[%s1235_s1 + $0x1e8] sm:$0xff]  ;;  %v43_v17 = vld [vmem:[%s1235_s1 + $0x60] sm:$0xff]  ;;  %v726_v18 = vpack.c.bf16 %v74_v10, %v73_v8  ;;  %v61_v25 = vld [vmem:[%s1235_s1 + $0xf0] sm:$0xff] }
  0x13   :  { %719 = vmatpush3.bf16.msra.mxu1 %v718_v54  ;;  %v44_v20 = vld [vmem:[%s1235_s1 + $0x68] sm:$0xff]  ;;  %v75_v21 = vld [vmem:[%s1235_s1 + $0x160] sm:$0xff]  ;;  %v728_v23 = vpack.c.bf16 %v92_v15, %v91_v14  ;;  %v62_v26 = vld [vmem:[%s1235_s1 + $0xf8] sm:$0xff] }
  0x14   :  { %721 = vmatprep.subr.bf16.mxu1 %v720_v59  ;;  %v30_v22 = vld [vmem:[%s1234_s0] sm:$0xff]  ;;  %v76_v24 = vld [vmem:[%s1235_s1 + $0x168] sm:$0xff]  ;;  %v93_v29 = vld [vmem:[%s1235_s1 + $0x1f0] sm:$0xff]  ;;  %v698_v31 = vpack.c.bf16 %v44_v20, %v43_v17  ;;  %v700_v35 = vpack.c.bf16 %v62_v26, %v61_v25 }
  0x15   :  { %691 = vmatpush3.bf16.msra.mxu0 %v690_v3  ;;  %v110_v27 = vrot.slane %v30_v22, %v109_v13  ;;  %v103_v28 = vcombine.high %v30_v22, %v30_v22  ;;  %v94_v30 = vld [vmem:[%s1235_s1 + $0x1f8] sm:$0xff]  ;;  %v730_v34 = vpack.c.bf16 %v76_v24, %v75_v21  ;;  %v45_v36 = vld [vmem:[%s1235_s1 + $0x70] sm:$0xff] }
  0x16   :  { %693 = vmatprep.subr.bf16.mxu0 %v692_v5  ;;  %v46_v37 = vld [vmem:[%s1235_s1 + $0x78] sm:$0xff] }
  0x17   :  { %723 = vmatpush3.bf16.msra.mxu1 %v722_v4  ;;  %v118_v32 = vcombine.high %v110_v27, %v110_v27  ;;  %v117_v33 = vrot.slane %v103_v28, %v109_v13 }
  0x18   :  { %725 = vmatprep.subr.bf16.mxu1 %v724_v9 }
  0x19   :  { %695 = vmatpush3.bf16.msra.mxu0 %v694_v16 }
  0x1a   :  { %697 = vmatprep.subr.bf16.mxu0 %v696_v19 }
  0x1b   :  { %727 = vmatpush3.bf16.msra.mxu1 %v726_v18 }
  0x1c   :  { %15 = vsyncpa [#allocation5], 0  ;;  %729 = vmatprep.subr.bf16.mxu1 %v728_v23  ;;  %v732_v38 = vpack.c.bf16 %v94_v30, %v93_v29  ;;  %v77_v39 = vld [vmem:[%s1235_s1 + $0x170] sm:$0xff]  ;;  %v78_v40 = vld [vmem:[%s1235_s1 + $0x178] sm:$0xff]  ;;  %188 = vmatprep.mubr.f32.mxu0 %v118_v32  ;;  %v119_v41 = vcombine.high %v117_v33, %v117_v33  ;;  %v702_v42 = vpack.c.bf16 %v46_v37, %v45_v36  ;;  %v844_v47 = vmov 0.0|0.0  }
  0x1d   :  { %699 = vmatpush3.bf16.msra.mxu0 %v698_v31  ;;  %v734_v43 = vpack.c.bf16 %v78_v40, %v77_v39  ;;  %v265_v44 = vld [vmem:[%s1237_s3] sm:$0xff]  ;;  %v266_v45 = vld [vmem:[%s1237_s3 + $0x8] sm:$0xff]  ;;  %v267_v48 = vld [vmem:[%s1237_s3 + $0x10] sm:$0xff]  ;;  %vm845_vm0 = vmmov 0   ;;  %v846_v5 = vmov 0.0   ;;  %vm358_vm1 = vcmask 1041408  }
  0x1e   :  { %258 = vmatprep.mubr.f32.mxu1 %v119_v41  ;;  %701 = vmatprep.subr.bf16.mxu0 %v700_v35  ;;  %v737_v46 = vpack.c.bf16 %v266_v45, %v265_v44  ;;  %v268_v49 = vld [vmem:[%s1237_s3 + $0x18] sm:$0xff]  ;;  %v269_v51 = vld [vmem:[%s1237_s3 + $0x20] sm:$0xff]  ;;  %v270_v52 = vld [vmem:[%s1237_s3 + $0x28] sm:$0xff] }
  0x1f   :  { %731 = vmatpush3.bf16.msra.mxu1 %v730_v34  ;;  %v740_v50 = vpack.c.bf16 %v268_v49, %v267_v48  ;;  %v743_v53 = vpack.c.bf16 %v270_v52, %v269_v51  ;;  %v271_v54 = vld [vmem:[%s1237_s3 + $0x30] sm:$0xff]  ;;  %v272_v55 = vld [vmem:[%s1237_s3 + $0x38] sm:$0xff]  ;;  %v273_v57 = vld [vmem:[%s1237_s3 + $0x40] sm:$0xff] }
  0x20   :  { %733 = vmatprep.subr.bf16.mxu1 %v732_v38  ;;  %v746_v56 = vpack.c.bf16 %v272_v55, %v271_v54  ;;  %v274_v58 = vld [vmem:[%s1237_s3 + $0x48] sm:$0xff]  ;;  %v275_v60 = vld [vmem:[%s1237_s3 + $0x50] sm:$0xff]  ;;  %v276_v61 = vld [vmem:[%s1237_s3 + $0x58] sm:$0xff] }
  0x21   :  { %703 = vmatpush3.bf16.msra.mxu0 %v702_v42  ;;  %v749_v59 = vpack.c.bf16 %v274_v58, %v273_v57  ;;  %v752_v62 = vpack.c.bf16 %v276_v61, %v275_v60  ;;  %v277_v63 = vld [vmem:[%s1237_s3 + $0x60] sm:$0xff]  ;;  %v278_v0 = vld [vmem:[%s1237_s3 + $0x68] sm:$0xff]  ;;  %v279_v2 = vld [vmem:[%s1237_s3 + $0x70] sm:$0xff] }
  0x22   :  { %736 = vmatprep.subr.bf16.mxu0 %v844_v47  ;;  %v755_v1 = vpack.c.bf16 %v278_v0, %v277_v63  ;;  %v280_v3 = vld [vmem:[%s1237_s3 + $0x78] sm:$0xff]  ;;  %v372_v6 = vld [vmem:[%s1239_s5] sm:$0xff]  ;;  %v373_v7 = vld [vmem:[%s1239_s5 + $0x8] sm:$0xff] }
  0x23   :  { %735 = vmatpush3.bf16.msra.mxu1 %v734_v43  ;;  %v758_v4 = vpack.c.bf16 %v280_v3, %v279_v2  ;;  %v374_v8 = vld [vmem:[%s1239_s5 + $0x10] sm:$0xff]  ;;  %v761_v9 = vpack.c.bf16 %v373_v7, %v372_v6  ;;  %v375_v10 = vld [vmem:[%s1239_s5 + $0x18] sm:$0xff]  ;;  %v376_v12 = vld [vmem:[%s1239_s5 + $0x20] sm:$0xff] }
  0x24   :  { %760 = vmatprep.subr.bf16.mxu1 %v844_v47  ;;  %189 = vmatmul.mubr.f32.vlgmr.msra.gmra.mrb[0].mxu0 %v110_v27  ;;  %v764_v11 = vpack.c.bf16 %v375_v10, %v374_v8  ;;  %v377_v13 = vld [vmem:[%s1239_s5 + $0x28] sm:$0xff]  ;;  %v378_v15 = vld [vmem:[%s1239_s5 + $0x30] sm:$0xff]  ;;  %v379_v16 = vld [vmem:[%s1239_s5 + $0x38] sm:$0xff] }
  0x25   :  { %738 = vmatpush3.bf16.msra.mxu0 %v737_v46  ;;  %634 = vmatprep.mubr.msk.f32.mxu0 %vm845_vm0, %v846_v5  ;;  %v767_v14 = vpack.c.bf16 %v377_v13, %v376_v12  ;;  %v770_v17 = vpack.c.bf16 %v379_v16, %v378_v15  ;;  %v380_v18 = vld [vmem:[%s1239_s5 + $0x40] sm:$0xff]  ;;  %v381_v19 = vld [vmem:[%s1239_s5 + $0x48] sm:$0xff]  ;;  %v382_v21 = vld [vmem:[%s1239_s5 + $0x50] sm:$0xff] }
  0x26   :  { %259 = vmatmul.mubr.f32.vlgmr.msra.gmra.mrb[0].mxu1 %v117_v33  ;;  %739 = vmatprep.subr.bf16.mxu0 %v844_v47  ;;  %v773_v20 = vpack.c.bf16 %v381_v19, %v380_v18  ;;  %v383_v22 = vld [vmem:[%s1239_s5 + $0x58] sm:$0xff]  ;;  %v384_v24 = vld [vmem:[%s1239_s5 + $0x60] sm:$0xff]  ;;  %v385_v25 = vld [vmem:[%s1239_s5 + $0x68] sm:$0xff] }
  0x27   :  { %669 = vmatprep.mubr.msk.f32.mxu1 %vm845_vm0, %v846_v5  ;;  %762 = vmatpush3.bf16.msra.mxu1 %v761_v9  ;;  %v776_v23 = vpack.c.bf16 %v383_v22, %v382_v21  ;;  %v779_v26 = vpack.c.bf16 %v385_v25, %v384_v24  ;;  %v495_v28 = vld [vmem:[%s1236_s2] ss:$0 sm:$0xff]  ;;  %v386_v37 = vld [vmem:[%s1239_s5 + $0x70] sm:$0xff]  ;;  %v387_v38 = vld [vmem:[%s1239_s5 + $0x78] sm:$0xff] }
  0x28   :  { %763 = vmatprep.subr.bf16.mxu1 %v844_v47  ;;  %v782_v39 = vpack.c.bf16 %v387_v38, %v386_v37  ;;  %v496_v40 = vld [vmem:[%s1238_s4] ss:$0 sm:$0xff]  ;;  %s847_s4 = smov [#allocation4]  }
  0x29   :  { %741 = vmatpush3.bf16.msra.mxu0 %v740_v50  ;;  %v497_v51 = vld [vmem:[%s1240_s6] ss:$0 sm:$0xff]  ;;  %s483_s18 = sshll.u32 %s847_s4, 4  ;;  %s484_s18 = int_to_ptr.vmem [resolvable:$true] %s483_s18 }
  0x2a   :  { %742 = vmatprep.subr.bf16.mxu0 %v844_v47  ;;  %s795_s19 = scalar_lea.vmem %s484_s18, 32  ;;  %p800_p1 = scmp.lt.s32.totalorder %s484_s18, %s484_s18 }
  0x2b   :  { %765 = vmatpush3.bf16.msra.mxu1 %v764_v11  ;;  %p796_p0 = scmp.ne.s32.totalorder %s484_s18, %s795_s19  ;;  %p801_p2 = scmp.lt.s32.totalorder %s795_s19, %s795_s19 }
  0x2c   :  { %766 = vmatprep.subr.bf16.mxu1 %v844_v47 }
  0x2d   :  { %744 = vmatpush3.bf16.msra.mxu0 %v743_v53  ;;  %p802_p3 = por %p801_p2, %p800_p1 }
  0x2e   :  { %745 = vmatprep.subr.bf16.mxu0 %v844_v47 }
  0x2f   :  { %768 = vmatpush3.bf16.msra.mxu1 %v767_v14  ;;  %p803_p4 = pnand %p802_p3, %p796_p0 }
  0x30   :  { %769 = vmatprep.subr.bf16.mxu1 %v844_v47 }
  0x31   :  { %747 = vmatpush3.bf16.msra.mxu0 %v746_v56 }
  0x32   :  { %748 = vmatprep.subr.bf16.mxu0 %v844_v47 }
  0x33   :  { %771 = vmatpush3.bf16.msra.mxu1 %v770_v17 }
  0x34   :  { %772 = vmatprep.subr.bf16.mxu1 %v844_v47 }
  0x35   :  { %750 = vmatpush3.bf16.msra.mxu0 %v749_v59 }
  0x36   :  { %751 = vmatprep.subr.bf16.mxu0 %v844_v47 }
  0x37   :  { %774 = vmatpush3.bf16.msra.mxu1 %v773_v20 }
  0x38   :  { %775 = vmatprep.subr.bf16.mxu1 %v844_v47 }
  0x39   :  { %753 = vmatpush3.bf16.msra.mxu0 %v752_v62 }
  0x3a   :  { %754 = vmatprep.subr.bf16.mxu0 %v844_v47 }
  0x3b   :  { %777 = vmatpush3.bf16.msra.mxu1 %v776_v23 }
  0x3c   :  { %778 = vmatprep.subr.bf16.mxu1 %v844_v47 }
  0x3d   :  { %756 = vmatpush3.bf16.msra.mxu0 %v755_v1 }
  0x3e   :  { %757 = vmatprep.subr.bf16.mxu0 %v844_v47 }
  0x3f   :  { %780 = vmatpush3.bf16.msra.mxu1 %v779_v26 }
  0x40   :  { %781 = vmatprep.subr.bf16.mxu1 %v844_v47 }
  0x41   :  { %759 = vmatpush3.bf16.msra.mxu0 %v758_v4 }
  0x43   :  { %783 = vmatpush3.bf16.msra.mxu1 %v782_v39 }
  0xf7   :  { %v530_v27 = vpop.f32.mrb[0].mxu0 }
  0xf8   :  { %v531_v29 = vpop.f32.mrb[1].mxu0 }
  0xf9   :  { %v565_v30 = vpop.f32.mrb[0].mxu1  ;;  %v532_v31 = vadd.f32 %v531_v29, %v530_v27 }
  0xfa   :  { %v566_v32 = vpop.f32.mrb[1].mxu1 }
  0xfb   :  { %v567_v33 = vadd.f32 %v566_v32, %v565_v30  ;;  %v191_v34 = vadd.f32 %v532_v31, %v495_v28 }
  0xfd   :  { %v261_v35 = vadd.f32 %v567_v33, %v191_v34 }
  0xff   :  { %v264_v36 = vmax.f32 %v261_v35, 0.0 }
 0x101   :  { %635 = vmatmul.mubr.f32.vlgmr.msra.gmra.mrb[2].mxu0 %v264_v36 }
 0x1d4   :  { %v354_v41 = vpop.f32.mrb[2].mxu0 }
 0x1d5   :  { %v355_v42 = vadd.f32 %v496_v40, %v354_v41  ;;  %v636_v43 = vpop.f32.mrb[3].mxu0 }
 0x1d7   :  { %v371_v44 = vmax.f32 %v355_v42, 0.0  ;;  %v359_v45 = vsel %vm358_vm1, %v355_v42, -inf }
 0x1d8   :  { %360 = vmax.xlane.f32.xlu0 %v359_v45 }
 0x1d9   :  { %670 = vmatmul.mubr.f32.vlgmr.msra.gmra.mrb[2].mxu1 %v371_v44 }
 0x265   :  { %v361_v46 = vpop.xlane.xlu0 %360 }
 0x266   :  { %v362_v47 = vsub.f32 %v355_v42, %v361_v46 }
 0x268   :  { %v363_v48 = vmul.f32 1.442695, %v362_v47 }
 0x26a   :  { %791 = vpow2.f32 %v363_v48 }
 0x274   :  { %v792_v49 = vpop.eup %791 }
 0x275   :  { %v365_v50 = vsel %vm358_vm1, %v792_v49, 0.0 }
 0x276   :  { %366 = vadd.xlane.f32.xlu0 %v365_v50 }
 0x2ac   :  { %v461_v52 = vpop.f32.mrb[2].mxu1 }
 0x2ad   :  { %v462_v53 = vadd.f32 %v497_v51, %v461_v52  ;;  %v671_v54 = vpop.f32.mrb[3].mxu1 }
 0x2af   :  { %v465_v55 = vmax.f32 %v462_v53, 0.0 }
 0x2b1   :  { %466 = vst [vmem:[#allocation4] sm:$0x3] %v465_v55 }
 0x2b2   :  { %806 = shalt.err (!%p803_p4)
}
 0x2b3   :  { %s807_s22 = scalar_lea.hbm %s1242_s8, 32 }
 0x2b4   :  { %p808_p5 = scmp.ne.s32.totalorder %s1242_s8, %s807_s22  ;;  %p811_p6 = scmp.lt.u32.totalorder %s807_s22, %s1242_s8 }
 0x2b6   :  { %p813_p7 = pnand %p811_p6, %p808_p5 }
 0x2b8   :  { %816 = shalt.err (!%p813_p7)
}
 0x2b9   :  { %486 = dma.vmem_to_hbm [thread:$0]  %s484_s18, 32, %s1242_s8, [#allocation5]  }
 0x2ba   :  { %s848_s1 = smov [#allocation2]  }
 0x2bb   :  { %s473_s28 = sshll.u32 %s848_s1, 4  ;;  %s474_s28 = int_to_ptr.vmem [resolvable:$true] %s473_s28 }
 0x2bc   :  { %s817_s29 = scalar_lea.vmem %s474_s28, 32  ;;  %p822_p9 = scmp.lt.s32.totalorder %s474_s28, %s474_s28 }
 0x2bd   :  { %p818_p8 = scmp.ne.s32.totalorder %s474_s28, %s817_s29  ;;  %p823_p10 = scmp.lt.s32.totalorder %s817_s29, %s817_s29 }
 0x2bf   :  { %p824_p11 = por %p823_p10, %p822_p9 }
 0x2c1   :  { %p825_p12 = pnand %p824_p11, %p818_p8 }
 0x303   :  { %v367_v56 = vpop.xlane.xlu0 %366 }
 0x304   :  { %793 = vrcp.f32 %v367_v56 }
 0x30e   :  { %v794_v57 = vpop.eup %793 }
 0x30f   :  { %v369_v58 = vmul.f32 %v794_v57, %v792_v49 }
 0x311   :  { %370 = vst [vmem:[#allocation2] sm:$0x3] %v369_v58 }
 0x312   :  { %828 = shalt.err (!%p825_p12)
}
 0x313   :  { %s829_s10 = scalar_lea.hbm %s1241_s7, 32 }
 0x314   :  { %p830_p13 = scmp.ne.s32.totalorder %s1241_s7, %s829_s10  ;;  %p833_p0 = scmp.lt.u32.totalorder %s829_s10, %s1241_s7 }
 0x316   :  { %p835_p1 = pnand %p833_p0, %p830_p13 }
 0x318   :  { %838 = shalt.err (!%p835_p1)
}
 0x319   :  { %476 = dma.vmem_to_hbm [thread:$0]  %s474_s28, 32, %s1241_s7, [#allocation3]  }
 0x31a   :  { %839 = dma.done.wait [#allocation3], 32  }
 0x31b   :  { %840 = vsyncadd [#allocation3], 4294967264 }
 0x31c   :  { %841 = dma.done.wait [#allocation5], 32  }
 0x31d   :  { %842 = vsyncadd [#allocation5], 4294967264 }
 0x31e   :  { %493 = vsyncpa [#allocation3], 1 }
 0x31f   :  { %494 = vsyncpa [#allocation5], 1 }

</bundles_post_ra>
